<compile_context>
chip_gen: v7x
topology: tpu7x:2x2x1
jax: 0.10.0
libtpu: 0.0.40
codegen_flags: <defaults>
</compile_context>

<pallas_src>
import functools

import jax
import jax.numpy as jnp
from jax import lax
from jax.experimental import pallas as pl
from jax.experimental.pallas import tpu as pltpu

LANE = 128  # TPU lane width; all channel dims are padded to this.


def _round_up(x, m):
    return (x + m - 1) // m * m


def _double_conv_kernel(x_ref, m_ref, w1_ref, s1_ref, b1_ref,
                        w2_ref, s2_ref, b2_ref, o_ref, *, shifts):
    """One image per grid step, flat padded-grid layout.

    x_ref : (1, Sp, Cp) f32   zero-halo-padded input, spatially flattened
    m_ref : (Sp, Cp)    f32   interior mask (1 inside HxW, 0 on halo / tail pad)
    w1/w2 : (9*Cp, Cp)  bf16  3x3 weights folded into the contraction dim (im2col)
    s*/b* : (1, Cp)     f32   folded BatchNorm scale / bias
    o_ref : (1, Sp, Cp) f32   flat padded output; wrapper slices out the interior
    """
    sp = x_ref.shape[1]

    def conv3x3(p, w_ref):
        # Build the (Sp, 9*Cp) im2col patch with XLU sublane rolls.  Rolled-in
        # "wrap" garbage only ever lands on halo/tail rows, which are zeroed by
        # the mask (intermediate) or discarded by the wrapper (final output).
        def shifted(s):
            if s == 0:
                return p
            return pltpu.roll(p, shift=(-s) % sp, axis=0)

        patch = jnp.concatenate([shifted(s) for s in shifts],
                                axis=-1).astype(jnp.bfloat16)
        # ONE bf16 MXU matmul per conv: (Sp, 9*Cp) @ (9*Cp, Cp), f32 accumulate.
        return jnp.dot(patch, w_ref[...], preferred_element_type=jnp.float32)

    x = x_ref[0]
    acc1 = conv3x3(x, w1_ref)
    # BN1 + ReLU; the mask restores the exact zero halo conv2's "same" padding needs.
    mid = jnp.maximum(acc1 * s1_ref[...] + b1_ref[...], 0.0) * m_ref[...]

    acc2 = conv3x3(mid, w2_ref)
    out = jnp.maximum(acc2 * s2_ref[...] + b2_ref[...], 0.0)
    o_ref[...] = out[None].astype(o_ref.dtype)


def _fold_bn(gamma, beta, mean, var, eps=1e-5):
    scale = gamma / jnp.sqrt(var + eps)
    bias = beta - mean * scale
    return scale, bias


def double_conv(x_nchw, w1, bn1, w2, bn2):
    """x_nchw: (N, Cin, H, W); w*: (Cout, Cin, 3, 3); bn* = (gamma, beta, mean, var)."""
    N, c_in, H, W = x_nchw.shape
    c_mid = w1.shape[0]
    c_out = w2.shape[0]
    hp, wp = H + 2, W + 2
    cp = LANE
    # TODO(synk): tile the channel dims over the grid when any exceed 128 lanes.
    assert max(c_in, c_mid, c_out) <= cp
    sp = _round_up(hp * wp, 16)          # flat spatial dim, bf16-sublane friendly

    # ---- plain-JAX glue: layout conversion, halo/lane padding, BN folding ----
    x = jnp.transpose(x_nchw, (0, 2, 3, 1)).astype(jnp.float32)          # NHWC
    xp = jnp.pad(x, ((0, 0), (1, 1), (1, 1), (0, cp - c_in)))            # halo + lanes
    xp = xp.reshape(N, hp * wp, cp)
    xp = jnp.pad(xp, ((0, 0), (0, sp - hp * wp), (0, 0)))                # tail pad

    def prep_w(w):
        # (Cout, Cin, 3, 3) -> (ky, kx, Cin, Cout) -> pad channels -> (9*Cp, Cp) bf16
        wt = jnp.transpose(w, (2, 3, 1, 0))
        wt = jnp.pad(wt, ((0, 0), (0, 0),
                          (0, cp - wt.shape[2]), (0, cp - wt.shape[3])))
        return wt.reshape(9 * cp, cp).astype(jnp.bfloat16)

    def prep_bn(bn, c):
        s, b = _fold_bn(*bn)
        s = jnp.pad(s, (0, cp - c)).reshape(1, cp).astype(jnp.float32)
        b = jnp.pad(b, (0, cp - c)).reshape(1, cp).astype(jnp.float32)
        return s, b

    w1t, w2t = prep_w(w1), prep_w(w2)
    s1, b1 = prep_bn(bn1, c_mid)
    s2, b2 = prep_bn(bn2, c_out)

    # Interior mask over the flat padded grid (1 inside the original HxW).
    idx = jnp.arange(sp)
    rows, cols = idx // wp, idx % wp
    interior = ((idx < hp * wp) & (rows >= 1) & (rows <= H)
                & (cols >= 1) & (cols <= W))
    mask = jnp.broadcast_to(interior[:, None], (sp, cp)).astype(jnp.float32)

    # Flat-index offsets of the 9 taps on the padded grid.
    shifts = tuple((ky - 1) * wp + (kx - 1) for ky in range(3) for kx in range(3))
    kernel = functools.partial(_double_conv_kernel, shifts=shifts)

    flops = 4 * N * sp * 9 * cp * cp                       # 2 convs x 2 flops/MAC
    bytes_accessed = (xp.size * 4 + mask.size * 4 + N * sp * cp * 4
                      + (w1t.size + w2t.size) * 2 + 4 * cp * 4)

    # TODO(synk): for large H*W add a spatially tiled "parallel" grid axis with a
    # 1-row halo (bounds per-step VMEM on v7x's 64 MiB and feeds its 2nd TensorCore).
    out_flat = pl.pallas_call(
        kernel,
        out_shape=jax.ShapeDtypeStruct((N, sp, cp), jnp.float32),
        grid_spec=pltpu.PrefetchScalarGridSpec(
            num_scalar_prefetch=0,
            grid=(N,),
            in_specs=[
                pl.BlockSpec((1, sp, cp), lambda n: (n, 0, 0)),    # x (flat, padded)
                pl.BlockSpec((sp, cp), lambda n: (0, 0)),          # interior mask
                pl.BlockSpec((9 * cp, cp), lambda n: (0, 0)),      # w1 (im2col)
                pl.BlockSpec((1, cp), lambda n: (0, 0)),           # s1
                pl.BlockSpec((1, cp), lambda n: (0, 0)),           # b1
                pl.BlockSpec((9 * cp, cp), lambda n: (0, 0)),      # w2 (im2col)
                pl.BlockSpec((1, cp), lambda n: (0, 0)),           # s2
                pl.BlockSpec((1, cp), lambda n: (0, 0)),           # b2
            ],
            out_specs=pl.BlockSpec((1, sp, cp), lambda n: (n, 0, 0)),
        ),
        compiler_params=pltpu.CompilerParams(
            dimension_semantics=("parallel",),
            vmem_limit_bytes=32 * 1024 * 1024),
        cost_estimate=pl.CostEstimate(
            flops=flops, transcendentals=0, bytes_accessed=bytes_accessed),
    )(xp, mask, w1t, s1, b1, w2t, s2, b2)

    out = out_flat[:, :hp * wp, :].reshape(N, hp, wp, cp)
    out = out[:, 1:H + 1, 1:W + 1, :c_out]
    return jnp.transpose(out, (0, 3, 1, 2))                # back to NCHW


def _reference(x_nchw, w1, bn1, w2, bn2):
    """Pure-JAX reference (NCHW convs, eval-mode BN) for verification."""
    def conv(x, w):
        return lax.conv_general_dilated(
            x, w, window_strides=(1, 1), padding=((1, 1), (1, 1)),
            dimension_numbers=("NCHW", "OIHW", "NCHW"))

    def bn_relu(x, params):
        s, b = _fold_bn(*params)
        return jnp.maximum(x * s[None, :, None, None] + b[None, :, None, None], 0.0)

    h = bn_relu(conv(x_nchw, w1), bn1)
    return bn_relu(conv(h, w2), bn2)


if __name__ == "__main__":
    # Small deterministic setup: batch=2, in_channels=4, out_channels=8, spatial=16.
    N, C_IN, C_OUT, H, W = 2, 4, 8, 16, 16
    key = jax.random.PRNGKey(0)
    keys = jax.random.split(key, 11)

    x = jax.random.normal(keys[0], (N, C_IN, H, W), jnp.float32)
    w1 = 0.2 * jax.random.normal(keys[1], (C_OUT, C_IN, 3, 3), jnp.float32)
    w2 = 0.2 * jax.random.normal(keys[2], (C_OUT, C_OUT, 3, 3), jnp.float32)

    # BatchNorm params (inference mode: running stats).
    # TODO(synk): PyTorch's default is train-mode BN (batch statistics); this kernel
    # implements the standard inference-mode forward with running statistics.
    bn1 = (jax.random.uniform(keys[3], (C_OUT,), minval=0.5, maxval=1.5),
           0.1 * jax.random.normal(keys[4], (C_OUT,)),
           0.1 * jax.random.normal(keys[5], (C_OUT,)),
           jax.random.uniform(keys[6], (C_OUT,), minval=0.5, maxval=1.5))
    bn2 = (jax.random.uniform(keys[7], (C_OUT,), minval=0.5, maxval=1.5),
           0.1 * jax.random.normal(keys[8], (C_OUT,)),
           0.1 * jax.random.normal(keys[9], (C_OUT,)),
           jax.random.uniform(keys[10], (C_OUT,), minval=0.5, maxval=1.5))

    out = jax.block_until_ready(double_conv(x, w1, bn1, w2, bn2))
    ref = jax.block_until_ready(_reference(x, w1, bn1, w2, bn2))

    assert out.shape == (N, C_OUT, H, W), out.shape
    # bf16 MXU operands (f32 accumulation) -> looser tolerance than pure f32.
    assert jnp.allclose(out, ref, atol=5e-2, rtol=1e-1), \
        float(jnp.max(jnp.abs(out - ref)))

    print("KERNEL_OK")
</pallas_src>

<mosaic_0001>
module attributes {stable_mosaic.version = 11 : i64} {
  func.func @_double_conv_kernel(%arg0: i32, %arg1: memref<1x336x128xf32, #tpu.memory_space<vmem>>, %arg2: memref<336x128xf32, #tpu.memory_space<vmem>>, %arg3: memref<1152x128xbf16, #tpu.memory_space<vmem>>, %arg4: memref<1x128xf32, #tpu.memory_space<vmem>>, %arg5: memref<1x128xf32, #tpu.memory_space<vmem>>, %arg6: memref<1152x128xbf16, #tpu.memory_space<vmem>>, %arg7: memref<1x128xf32, #tpu.memory_space<vmem>>, %arg8: memref<1x128xf32, #tpu.memory_space<vmem>>, %arg9: memref<1x336x128xf32, #tpu.memory_space<vmem>>) attributes {dimension_semantics = [#tpu.dimension_semantics<parallel>], iteration_bounds = array<i64: 2>, scalar_prefetch = 0 : i64, scratch_operands = 0 : i64, tpu.core_type = #tpu.core_type<tc>, window_params = [{transform_indices = @transform_0, window_bounds = array<i64: 1, 336, 128>}, {pipeline_mode = #tpu.pipeline_mode<synchronous>, transform_indices = @transform_1, window_bounds = array<i64: 336, 128>}, {pipeline_mode = #tpu.pipeline_mode<synchronous>, transform_indices = @transform_2, window_bounds = array<i64: 1152, 128>}, {pipeline_mode = #tpu.pipeline_mode<synchronous>, transform_indices = @transform_3, window_bounds = array<i64: 1, 128>}, {pipeline_mode = #tpu.pipeline_mode<synchronous>, transform_indices = @transform_4, window_bounds = array<i64: 1, 128>}, {pipeline_mode = #tpu.pipeline_mode<synchronous>, transform_indices = @transform_5, window_bounds = array<i64: 1152, 128>}, {pipeline_mode = #tpu.pipeline_mode<synchronous>, transform_indices = @transform_6, window_bounds = array<i64: 1, 128>}, {pipeline_mode = #tpu.pipeline_mode<synchronous>, transform_indices = @transform_7, window_bounds = array<i64: 1, 128>}, {transform_indices = @transform_8, window_bounds = array<i64: 1, 336, 128>}]} {
    %c0 = arith.constant 0 : index
    %c0_0 = arith.constant 0 : index
    %c0_1 = arith.constant 0 : index
    %0 = vector.load %arg1[%c0, %c0_0, %c0_1] : memref<1x336x128xf32, #tpu.memory_space<vmem>>, vector<1x336x128xf32>
    %1 = vector.shape_cast %0 : vector<1x336x128xf32> to vector<336x128xf32>
    %c19_i32 = arith.constant 19 : i32
    %2 = tpu.dynamic_rotate %1 by %c19_i32 dim 0 : vector<336x128xf32>, i32 -> vector<336x128xf32>
    %c18_i32 = arith.constant 18 : i32
    %3 = tpu.dynamic_rotate %1 by %c18_i32 dim 0 : vector<336x128xf32>, i32 -> vector<336x128xf32>
    %c17_i32 = arith.constant 17 : i32
    %4 = tpu.dynamic_rotate %1 by %c17_i32 dim 0 : vector<336x128xf32>, i32 -> vector<336x128xf32>
    %c1_i32 = arith.constant 1 : i32
    %5 = tpu.dynamic_rotate %1 by %c1_i32 dim 0 : vector<336x128xf32>, i32 -> vector<336x128xf32>
    %c335_i32 = arith.constant 335 : i32
    %6 = tpu.dynamic_rotate %1 by %c335_i32 dim 0 : vector<336x128xf32>, i32 -> vector<336x128xf32>
    %c319_i32 = arith.constant 319 : i32
    %7 = tpu.dynamic_rotate %1 by %c319_i32 dim 0 : vector<336x128xf32>, i32 -> vector<336x128xf32>
    %c318_i32 = arith.constant 318 : i32
    %8 = tpu.dynamic_rotate %1 by %c318_i32 dim 0 : vector<336x128xf32>, i32 -> vector<336x128xf32>
    %c317_i32 = arith.constant 317 : i32
    %9 = tpu.dynamic_rotate %1 by %c317_i32 dim 0 : vector<336x128xf32>, i32 -> vector<336x128xf32>
    %10 = tpu.concatenate %2, %3, %4, %5, %1, %6, %7, %8, %9 in 1 : vector<336x128xf32>, vector<336x128xf32>, vector<336x128xf32>, vector<336x128xf32>, vector<336x128xf32>, vector<336x128xf32>, vector<336x128xf32>, vector<336x128xf32>, vector<336x128xf32> -> vector<336x1152xf32>
    %11 = arith.truncf %10 : vector<336x1152xf32> to vector<336x1152xbf16>
    %c0_2 = arith.constant 0 : index
    %c0_3 = arith.constant 0 : index
    %12 = vector.load %arg3[%c0_2, %c0_3] : memref<1152x128xbf16, #tpu.memory_space<vmem>>, vector<1152x128xbf16>
    %cst = arith.constant dense<0.000000e+00> : vector<336x128xf32>
    %13 = tpu.matmul %11, %12, %cst {dimension_numbers = #tpu.dot_dimension_numbers<[1], [0], [0], [1], [0, 0, 1, 1], [], []>} : vector<336x1152xbf16>, vector<1152x128xbf16>, vector<336x128xf32> -> vector<336x128xf32>
    %c0_4 = arith.constant 0 : index
    %c0_5 = arith.constant 0 : index
    %14 = vector.load %arg4[%c0_4, %c0_5] : memref<1x128xf32, #tpu.memory_space<vmem>>, vector<1x128xf32>
    %15 = vector.broadcast %14 : vector<1x128xf32> to vector<336x128xf32>
    %16 = arith.mulf %13, %15 : vector<336x128xf32>
    %c0_6 = arith.constant 0 : index
    %c0_7 = arith.constant 0 : index
    %17 = vector.load %arg5[%c0_6, %c0_7] : memref<1x128xf32, #tpu.memory_space<vmem>>, vector<1x128xf32>
    %18 = vector.broadcast %17 : vector<1x128xf32> to vector<336x128xf32>
    %19 = arith.addf %16, %18 : vector<336x128xf32>
    %cst_8 = arith.constant 0.000000e+00 : f32
    %20 = vector.broadcast %cst_8 : f32 to vector<336x128xf32>
    %21 = arith.maximumf %19, %20 : vector<336x128xf32>
    %c0_9 = arith.constant 0 : index
    %c0_10 = arith.constant 0 : index
    %22 = vector.load %arg2[%c0_9, %c0_10] : memref<336x128xf32, #tpu.memory_space<vmem>>, vector<336x128xf32>
    %23 = arith.mulf %21, %22 : vector<336x128xf32>
    %c19_i32_11 = arith.constant 19 : i32
    %24 = tpu.dynamic_rotate %23 by %c19_i32_11 dim 0 : vector<336x128xf32>, i32 -> vector<336x128xf32>
    %c18_i32_12 = arith.constant 18 : i32
    %25 = tpu.dynamic_rotate %23 by %c18_i32_12 dim 0 : vector<336x128xf32>, i32 -> vector<336x128xf32>
    %c17_i32_13 = arith.constant 17 : i32
    %26 = tpu.dynamic_rotate %23 by %c17_i32_13 dim 0 : vector<336x128xf32>, i32 -> vector<336x128xf32>
    %c1_i32_14 = arith.constant 1 : i32
    %27 = tpu.dynamic_rotate %23 by %c1_i32_14 dim 0 : vector<336x128xf32>, i32 -> vector<336x128xf32>
    %c335_i32_15 = arith.constant 335 : i32
    %28 = tpu.dynamic_rotate %23 by %c335_i32_15 dim 0 : vector<336x128xf32>, i32 -> vector<336x128xf32>
    %c319_i32_16 = arith.constant 319 : i32
    %29 = tpu.dynamic_rotate %23 by %c319_i32_16 dim 0 : vector<336x128xf32>, i32 -> vector<336x128xf32>
    %c318_i32_17 = arith.constant 318 : i32
    %30 = tpu.dynamic_rotate %23 by %c318_i32_17 dim 0 : vector<336x128xf32>, i32 -> vector<336x128xf32>
    %c317_i32_18 = arith.constant 317 : i32
    %31 = tpu.dynamic_rotate %23 by %c317_i32_18 dim 0 : vector<336x128xf32>, i32 -> vector<336x128xf32>
    %32 = tpu.concatenate %24, %25, %26, %27, %23, %28, %29, %30, %31 in 1 : vector<336x128xf32>, vector<336x128xf32>, vector<336x128xf32>, vector<336x128xf32>, vector<336x128xf32>, vector<336x128xf32>, vector<336x128xf32>, vector<336x128xf32>, vector<336x128xf32> -> vector<336x1152xf32>
    %33 = arith.truncf %32 : vector<336x1152xf32> to vector<336x1152xbf16>
    %c0_19 = arith.constant 0 : index
    %c0_20 = arith.constant 0 : index
    %34 = vector.load %arg6[%c0_19, %c0_20] : memref<1152x128xbf16, #tpu.memory_space<vmem>>, vector<1152x128xbf16>
    %cst_21 = arith.constant dense<0.000000e+00> : vector<336x128xf32>
    %35 = tpu.matmul %33, %34, %cst_21 {dimension_numbers = #tpu.dot_dimension_numbers<[1], [0], [0], [1], [0, 0, 1, 1], [], []>} : vector<336x1152xbf16>, vector<1152x128xbf16>, vector<336x128xf32> -> vector<336x128xf32>
    %c0_22 = arith.constant 0 : index
    %c0_23 = arith.constant 0 : index
    %36 = vector.load %arg7[%c0_22, %c0_23] : memref<1x128xf32, #tpu.memory_space<vmem>>, vector<1x128xf32>
    %37 = vector.broadcast %36 : vector<1x128xf32> to vector<336x128xf32>
    %38 = arith.mulf %35, %37 : vector<336x128xf32>
    %c0_24 = arith.constant 0 : index
    %c0_25 = arith.constant 0 : index
    %39 = vector.load %arg8[%c0_24, %c0_25] : memref<1x128xf32, #tpu.memory_space<vmem>>, vector<1x128xf32>
    %40 = vector.broadcast %39 : vector<1x128xf32> to vector<336x128xf32>
    %41 = arith.addf %38, %40 : vector<336x128xf32>
    %cst_26 = arith.constant 0.000000e+00 : f32
    %42 = vector.broadcast %cst_26 : f32 to vector<336x128xf32>
    %43 = arith.maximumf %41, %42 : vector<336x128xf32>
    %44 = vector.shape_cast %43 : vector<336x128xf32> to vector<1x336x128xf32>
    %c0_27 = arith.constant 0 : index
    %c0_28 = arith.constant 0 : index
    %c0_29 = arith.constant 0 : index
    %45 = vector.load %arg9[%c0_27, %c0_28, %c0_29] : memref<1x336x128xf32, #tpu.memory_space<vmem>>, vector<1x336x128xf32>
    tpu.vector_store %arg9[%c0_27, %c0_28, %c0_29], %44 {strides = array<i32>} : memref<1x336x128xf32, #tpu.memory_space<vmem>>, vector<1x336x128xf32>,
    return
  }
  func.func @transform_0(%arg0: i32) -> (i32, i32, i32) {
    %c0_i32 = arith.constant 0 : i32
    %c0_i32_0 = arith.constant 0 : i32
    %c0_i32_1 = arith.constant 0 : i32
    return %arg0, %c0_i32, %c0_i32_0 : i32, i32, i32
  }
  func.func @transform_1(%arg0: i32) -> (i32, i32) {
    %c0_i32 = arith.constant 0 : i32
    %c0_i32_0 = arith.constant 0 : i32
    %c0_i32_1 = arith.constant 0 : i32
    return %c0_i32, %c0_i32_0 : i32, i32
  }
  func.func @transform_2(%arg0: i32) -> (i32, i32) {
    %c0_i32 = arith.constant 0 : i32
    %c0_i32_0 = arith.constant 0 : i32
    %c0_i32_1 = arith.constant 0 : i32
    return %c0_i32, %c0_i32_0 : i32, i32
  }
  func.func @transform_3(%arg0: i32) -> (i32, i32) {
    %c0_i32 = arith.constant 0 : i32
    %c0_i32_0 = arith.constant 0 : i32
    %c0_i32_1 = arith.constant 0 : i32
    return %c0_i32, %c0_i32_0 : i32, i32
  }
  func.func @transform_4(%arg0: i32) -> (i32, i32) {
    %c0_i32 = arith.constant 0 : i32
    %c0_i32_0 = arith.constant 0 : i32
    %c0_i32_1 = arith.constant 0 : i32
    return %c0_i32, %c0_i32_0 : i32, i32
  }
  func.func @transform_5(%arg0: i32) -> (i32, i32) {
    %c0_i32 = arith.constant 0 : i32
    %c0_i32_0 = arith.constant 0 : i32
    %c0_i32_1 = arith.constant 0 : i32
    return %c0_i32, %c0_i32_0 : i32, i32
  }
  func.func @transform_6(%arg0: i32) -> (i32, i32) {
    %c0_i32 = arith.constant 0 : i32
    %c0_i32_0 = arith.constant 0 : i32
    %c0_i32_1 = arith.constant 0 : i32
    return %c0_i32, %c0_i32_0 : i32, i32
  }
  func.func @transform_7(%arg0: i32) -> (i32, i32) {
    %c0_i32 = arith.constant 0 : i32
    %c0_i32_0 = arith.constant 0 : i32
    %c0_i32_1 = arith.constant 0 : i32
    return %c0_i32, %c0_i32_0 : i32, i32
  }
  func.func @transform_8(%arg0: i32) -> (i32, i32, i32) {
    %c0_i32 = arith.constant 0 : i32
    %c0_i32_0 = arith.constant 0 : i32
    %c0_i32_1 = arith.constant 0 : i32
    return %arg0, %c0_i32, %c0_i32_0 : i32, i32, i32
  }
}

</mosaic_0001>

<bundles_post_ra>
// kernel: tpu_custom_call.1
= control target key start
LH: loop header
LB: loop body
LE: loop exit
PB: predicated region body
PF: predicated region fallthrough
CT: control target
= control target key end

     0   :  { %s10216_s0 = inlined_call_operand.hbm [shape: f32[2,336,128], index: 0, kind: input, shape index: {}]   ;;  %s10217_s1 = inlined_call_operand.hbm [shape: f32[336,128], index: 1, kind: input, shape index: {}]   ;;  %s10218_s2 = inlined_call_operand.hbm [shape: bf16[1152,128], index: 2, kind: input, shape index: {}]   ;;  %s10219_s3 = inlined_call_operand.vmem [shape: f32[1,128], index: 3, kind: input, shape index: {}]   ;;  %s10220_s4 = inlined_call_operand.vmem [shape: f32[1,128], index: 4, kind: input, shape index: {}]   ;;  %s10221_s5 = inlined_call_operand.hbm [shape: bf16[1152,128], index: 5, kind: input, shape index: {}]   ;;  %s10222_s6 = inlined_call_operand.vmem [shape: f32[1,128], index: 6, kind: input, shape index: {}]   ;;  %s10223_s7 = inlined_call_operand.vmem [shape: f32[1,128], index: 7, kind: input, shape index: {}]   ;;  %s10224_s8 = inlined_call_operand.hbm [shape: f32[2,336,128], index: 8, kind: output, shape index: {}]  }
   0x1   :  { %10295 = sst [smem:[#allocation59_spill]] %s10217_s1 }
   0x2   :  { %13 = vsyncpa [#allocation3], 0 }
   0x3   :  { %15 = vsyncpa [#allocation3 + $0x1], 0 }
   0x4   :  { %16 = vsyncpa [#allocation6], 0 }
   0x5   :  { %17 = vsyncpa [#allocation9], 0 }
   0x6   :  { %18 = vsyncpa [#allocation4], 0 }
   0x7   :  { %20 = vsyncpa [#allocation4 + $0x1], 0  ;;  %s7033_s27 = smov 0   ;;  %s7035_s28 = smov 0  }
   0x8   :  { %s7037_s29 = smov 0   ;;  %s7039_s30 = smov 0  }
   0x9 LB: > { %10296 = sst [smem:[#allocation15_spill]] %s6960_s27  ;;  %s7054_s9 = sadd.s32 4294967295, %s6972_s30   ;;  %s6972_s30 = sphi %s7039_s30, %s10460_s30   ;;  %s6968_s29 = sphi %s7037_s29, %s10459_s29   ;;  %s6964_s28 = sphi %s7035_s28, %s10458_s28   ;;  %s6960_s27 = sphi %s7033_s27, %s10457_s27  }
   0xa   : > { %s5405_s10 = sadd.s32 4294967294, %s6972_s30   ;;  %p46_p0 = scmp.ne.s32.totalorder %s6964_s28, %s6960_s27 }
   0xb   : > { %p10225_p1 = scmp.eq.s32.totalorder %s7054_s9, 0  ;;  %p223_p3 = scmp.eq.s32.totalorder %s5405_s10, 1 }
   0xc   : > { %p5406_p5 = scmp.ge.s32.totalorder %s6972_s30, 1  ;;  %p230_p7 = scmp.lt.s32.totalorder %s6972_s30, 3 }
   0xd   : > { %p7063_p4 = por %p10225_p1, %p46_p0  ;;  %p7068_p6 = por %p223_p3, %p46_p0 }
   0xe   : > { %p7073_p8 = pnand %p5406_p5, %p230_p7  ;;  %s6974_s14 = smov [#allocation5]  }
   0xf   : > { %s10297_s11 = scalar_select %p7063_p4, 1, 0 }
  0x10   : > { %s10298_s12 = scalar_select %p7068_p6, 1, 0 }
  0x11   : > { %s10300_s13 = scalar_select %p7073_p8, 1, 0 }
  0x12   : > { %10299 = sst [smem:[#allocation16_spill]] %s10298_s12  ;;  %s242_s15 = sshll.u32 %s6974_s14, 4  ;;  %s7077_s15 = int_to_ptr.vmem [resolvable:$true] %s242_s15 }
  0x13   : > { %p6517_p9 = pneg %p7073_p8  ;;  %s6975_s17 = smov [#allocation7]  }
  0x14   : > { %s255_s18 = sshll.u32 %s6975_s17, 4  ;;  %s10302_s1 = sld [smem:[#allocation59_spill]]  ;;  %s7088_s18 = int_to_ptr.vmem [resolvable:$true] %s255_s18 }
  0x15   : > { %p7084_p11 = pnand %p6517_p9, %p10225_p1 }
  0x17   : > { %p7098_p13 = pneg %p7084_p11 }
  0x1a   : > { %s6784_s21 = scalar_lea.hbm %s10302_s1, 5376 }
  0x1b   : > { %p6785_p12 = scmp.ne.s32.totalorder %s10302_s1, %s6784_s21  ;;  %p6791_p5 = scmp.lt.u32.totalorder %s6784_s21, %s10302_s1 }
  0x1d   : > { %p6787_p0 = pnand %p7098_p13, %p6785_p12 }
  0x1f   : > { %p6788_p3 = pneg %p6787_p0 }
  0x21   : > { %p6793_p7 = pnand %p6791_p5, %p6788_p3 }
  0x23   : > { %6796 = shalt.err (!%p6793_p7)
}
  0x24   : > { %s6797_s10 = scalar_lea.vmem %s7077_s15, 5376  ;;  %p6805_p2 = scmp.lt.s32.totalorder %s7077_s15, %s7077_s15 }
  0x25   : > { %p6798_p9 = scmp.ne.s32.totalorder %s7077_s15, %s6797_s10  ;;  %p6806_p6 = scmp.lt.s32.totalorder %s6797_s10, %s6797_s10 }
  0x27   : > { %p6800_p10 = pnand %p6798_p9, %p7098_p13  ;;  %p6807_p12 = por %p6806_p6, %p6805_p2 }
  0x29   : > { %p6801_p1 = pneg %p6800_p10 }
  0x2b   : > { %p6808_p0 = pnand %p6807_p12, %p6801_p1 }
  0x2d   : > { %6811 = shalt.err (!%p6808_p0)
}
  0x2e   : > { %s10227_s14 = smov 128   ;;  %s10228_s17 = smov 8  }
  0x2f   : > { %6520 = dma.hbm_to_vmem [thread:$0]  (!%p7084_p11), %s10302_s1, 5376, %s7077_s15, [#allocation6], %s10227_s14, %s10227_s14, %s10228_s17  }
  0x30   : > { %s6812_s23 = scalar_lea.hbm %s10218_s2, 9216 }
  0x31   : > { %p6813_p1 = scmp.ne.s32.totalorder %s10218_s2, %s6812_s23  ;;  %p6819_p10 = scmp.lt.u32.totalorder %s6812_s23, %s10218_s2 }
  0x33   : > { %p6815_p2 = pnand %p6813_p1, %p7098_p13 }
  0x35   : > { %p6816_p6 = pneg %p6815_p2 }
  0x37   : > { %p6821_p3 = pnand %p6819_p10, %p6816_p6 }
  0x39   : > { %6824 = shalt.err (!%p6821_p3)
}
  0x3a   : > { %s6825_s15 = scalar_lea.vmem %s7088_s18, 9216  ;;  %p6833_p12 = scmp.lt.s32.totalorder %s7088_s18, %s7088_s18 }
  0x3b   : > { %p6826_p5 = scmp.ne.s32.totalorder %s7088_s18, %s6825_s15  ;;  %p6834_p0 = scmp.lt.s32.totalorder %s6825_s15, %s6825_s15 }
  0x3d   : > { %p6828_p7 = pnand %p6826_p5, %p7098_p13  ;;  %p6835_p1 = por %p6834_p0, %p6833_p12 }
  0x3f   : > { %p6829_p9 = pneg %p6828_p7 }
  0x41   : > { %p6836_p2 = pnand %p6835_p1, %p6829_p9 }
  0x43   : > { %6839 = shalt.err (!%p6836_p2)
}
  0x44   : > { %s6978_s19 = smov 64   ;;  %s6979_s12 = smov 4  }
  0x45   : > { %6523 = dma.hbm_to_vmem [thread:$0]  (!%p7084_p11), %s10218_s2, 9216, %s7088_s18, [#allocation6], %s6978_s19, %s6978_s19, %s6979_s12  }
  0x46   : > { %s6980_s22 = smov [#allocation8]   ;;  %s7146_s25 = sadd.s32 1, %s6972_s30  }
  0x47   : > { %s274_s23 = sshll.u32 %s6980_s22, 4  ;;  %s6840_s15 = scalar_lea.hbm %s10221_s5, 9216  ;;  %s275_s23 = int_to_ptr.vmem [resolvable:$true] %s274_s23 }
  0x48   : > { %p6841_p6 = scmp.ne.s32.totalorder %s10221_s5, %s6840_s15  ;;  %p6847_p5 = scmp.lt.u32.totalorder %s6840_s15, %s10221_s5 }
  0x4a   : > { %p6843_p10 = pnand %p6841_p6, %p7098_p13 }
  0x4c   : > { %p6844_p3 = pneg %p6843_p10 }
  0x4e   : > { %p6849_p7 = pnand %p6847_p5, %p6844_p3 }
  0x50   : > { %6852 = shalt.err (!%p6849_p7)
}
  0x51   : > { %s6853_s18 = scalar_lea.vmem %s275_s23, 9216  ;;  %p6861_p1 = scmp.lt.s32.totalorder %s275_s23, %s275_s23 }
  0x52   : > { %p6854_p9 = scmp.ne.s32.totalorder %s275_s23, %s6853_s18  ;;  %p6862_p2 = scmp.lt.s32.totalorder %s6853_s18, %s6853_s18 }
  0x54   : > { %p6856_p12 = pnand %p6854_p9, %p7098_p13  ;;  %p6863_p4 = por %p6862_p2, %p6861_p1 }
  0x56   : > { %p6857_p0 = pneg %p6856_p12 }
  0x58   : > { %p6864_p8 = pnand %p6863_p4, %p6857_p0 }
  0x5a   : > { %6867 = shalt.err (!%p6864_p8)
}
  0x5b   : > { %6526 = dma.hbm_to_vmem [thread:$0]  (!%p7084_p11), %s10221_s5, 9216, %s275_s23, [#allocation9], %s6978_s19, %s6978_s19, %s6979_s12  }
  0x5c   : > { %s30_s1 = ssub.s32 %s6972_s30, %s7146_s25  ;;  %s33_s27 = sadd.s32 1, %s6968_s29 }
  0x5d   : > { %p31_p4 = scmp.eq.s32.totalorder %s30_s1, 0  ;;  %p40_p8 = scmp.ne.s32.totalorder %s6968_s29, %s6964_s28 }
  0x5e   : > { %p41_p13 = scmp.eq.s32.totalorder %s6972_s30, 0  ;;  %p6538_p6 = scmp.lt.s32.totalorder %s6972_s30, 2 }
  0x5f   : > { %s7174_s16 = scalar_select %p31_p4, %s6968_s29, %s33_s27  }
  0x60   : > { %p42_p10 = por %p41_p13, %p40_p8  ;;  %p10304_p3 = scmp.eq.s32.totalorder %s7054_s9, 1 }
  0x61   : > { %s294_s20 = sand.u32 1, %s6968_s29   ;;  %s6498_s21 = smul.u32 5376, %s6972_s30 }
  0x62   : > { %p7178_p5 = por %p10304_p3, %p40_p8  ;;  %s6497_s22 = smul.u32 336, %s294_s20 }
  0x63   : > { %p7184_p7 = pnand %p6538_p6, %p42_p10  ;;  %s7191_s23 = scalar_lea.hbm %s10216_s0, %s6498_s21 }
  0x64   : > { %s298_s10 = scalar_lea.vmem [#allocation2], %s6497_s22  ;;  %s7195_s18 = scalar_lea.sflag [#allocation3], %s294_s20 }
  0x65   : > { %s305_s15 = sshll.u32 %s298_s10, 4  ;;  %s6868_s14 = scalar_lea.hbm %s7191_s23, 5376  ;;  %s7193_s15 = int_to_ptr.vmem [resolvable:$true] %s305_s15 }
  0x66   : > { %p6869_p11 = scmp.ne.s32.totalorder %s7191_s23, %s6868_s14  ;;  %p6870_p9 = pneg %p7184_p7 }
  0x67   : > { %s6873_s27 = scalar_lea.hbm %s10216_s0, 10752  ;;  %p6874_p1 = scmp.lt.u32.totalorder %s7191_s23, %s10216_s0 }
  0x68   : > { %p6871_p12 = pnand %p6870_p9, %p6869_p11  ;;  %p6875_p2 = scmp.lt.u32.totalorder %s6873_s27, %s6868_s14 }
  0x69   : > { %p6877_p8 = scmp.lt.u32.totalorder %s6868_s14, %s7191_s23 }
  0x6a   : > { %p6872_p0 = pneg %p6871_p12  ;;  %p6876_p4 = por %p6875_p2, %p6874_p1 }
  0x6c   : > { %p6878_p13 = por %p6877_p8, %p6876_p4 }
  0x6e   : > { %p6879_p6 = pnand %p6878_p13, %p6872_p0 }
  0x70   : > { %6882 = shalt.err (!%p6879_p6)
}
  0x71   : > { %s6883_s20 = scalar_lea.vmem %s7193_s15, 5376  ;;  %s6981_s22 = smov [#allocation2]  }
  0x72   : > { %p6884_p10 = scmp.ne.s32.totalorder %s7193_s15, %s6883_s20  ;;  %s6888_s12 = sshll.u32 %s6981_s22, 4  ;;  %s6889_s12 = int_to_ptr.vmem [resolvable:$false] %s6888_s12 }
  0x73   : > { %s6890_s10 = scalar_lea.vmem %s6889_s12, 10752  ;;  %p6891_p12 = scmp.lt.s32.totalorder %s7193_s15, %s6889_s12 }
  0x74   : > { %p6886_p3 = pnand %p6884_p10, %p6870_p9  ;;  %p6892_p1 = scmp.lt.s32.totalorder %s6890_s10, %s6883_s20 }
  0x76   : > { %p6887_p11 = pneg %p6886_p3  ;;  %p6893_p2 = por %p6892_p1, %p6891_p12 }
  0x78   : > { %p6894_p4 = pnand %p6893_p2, %p6887_p11 }
  0x7a   : > { %6897 = shalt.err (!%p6894_p4)
}
  0x7b   : > { %s10307_s14 = smov 8   ;;  %s10308_s17 = smov 128  }
  0x7c   : > { %6530 = dma.hbm_to_vmem [thread:$0]  (!%p7184_p7), %s7191_s23, 5376, %s7193_s15, %s7195_s18, %s10308_s17, %s10308_s17, %s10307_s14  }
  0x7d   : > { %p10309_p9 = scmp.ne.s32.totalorder %s10300_s13, 0 }
  0x7f   : > { %317 = sbr.rel (%p10309_p9) target bundleno = 2337 (0x921), region = 52 }
  0x86   : > { %s7229_s1 = sand.u32 1, %s6964_s28   ;;  %p10310_p0 = scmp.ne.s32.totalorder %s10297_s11, 0 }
  0x87   : > { %s6499_s27 = smul.u32 336, %s7229_s1  ;;  %s320_s21 = scalar_lea.sflag [#allocation3], %s7229_s1 }
  0x89   : > { %s7235_s26 = scalar_lea.vmem [#allocation2], %s6499_s27 }
  0x8a   : > { %6943 = dma.done.wait (%p10310_p0), %s320_s21, 5376  }
  0x8b   : > { %6945 = vsyncadd (%p10310_p0), %s320_s21, 4294961920  ;;  %p10311_p7 = scmp.eq.s32.totalorder %s7054_s9, 0 }
  0x8d   : > { %6947 = dma.done.wait (%p10311_p7), [#allocation6], 14592   ;;  %p10312_p8 = pmov %p10311_p7 }
  0x8e   : > { %p10313_p13 = pmov %p10311_p7 }
  0x8f   : > { %6949 = vsyncadd (%p10312_p8), [#allocation6], 4294952704 }
  0x90   : > { %6951 = dma.done.wait (%p10313_p13), [#allocation9], 9216   ;;  %p10314_p6 = pmov %p10311_p7 }
  0x91   : > { %v10232_v0 = vmov 0   ;;  %v6587_v1 = vld [vmem:[#allocation7] sm:$0xff]   ;;  %v6588_v2 = vld [vmem:[#allocation7 + $0x8] sm:$0xff]   ;;  %v6589_v3 = vld [vmem:[#allocation7 + $0x10] sm:$0xff]   ;;  %v453_v4 = vlaneseq  ;;  %vm6984_vm6 = vmmov 0   ;;  %s10041_s21 = scalar_lea.vmem [#allocation10], %s6499_s27 }
  0x92   : > { %6953 = vsyncadd (%p10314_p6), [#allocation9], 4294958080  ;;  %1646 = vmatprep.subr.bf16.mxu0 %v10232_v0  ;;  %4102 = vmatprep.subr.bf16.mxu1 %v10232_v0  ;;  %v6590_v5 = vld [vmem:[#allocation7 + $0x18] sm:$0xff]   ;;  %v6591_v7 = vld [vmem:[#allocation7 + $0x20] sm:$0xff]   ;;  %s6500_s27 = smul.u32 5376, %s7054_s9  ;;  %s5290_s9 = scalar_lea.sflag [#allocation4], %s7229_s1 }
  0x93   : > { %1647 = vmatpush1.bf16.msra.mxu0 %v6587_v1  ;;  %v7254_v6 = vshrl.u32 %v453_v4, 7  ;;  %v7258_v8 = vld [vmem:[%s7235_s26 + $0x138] sm:$0xff]  ;;  %v409_v9 = vld [vmem:[%s7235_s26 + $0x140] sm:$0xff]  ;;  %v7262_v10 = vld [vmem:[%s7235_s26 + $0x148] sm:$0xff]  ;;  %s6985_s18 = smov [#allocation10]  }
  0x94   : > { %1648 = vmatprep.subr.bf16.mxu0 %v10232_v0  ;;  %v537_v11 = vrot.slane %v7258_v8, 6  ;;  %v538_v12 = vrot.slane %v409_v9, 6  ;;  %v539_v13 = vrot.slane %v7262_v10, 6  ;;  %v6592_v14 = vld [vmem:[#allocation7 + $0x28] sm:$0xff]   ;;  %v6593_v18 = vld [vmem:[#allocation7 + $0x30] sm:$0xff]   ;;  %v6594_v19 = vld [vmem:[#allocation7 + $0x38] sm:$0xff]   ;;  %s10168_s23 = scalar_lea.hbm %s10224_s8, %s6500_s27 }
  0x95   : > { %vm540_vm0 = vcmp.lt.s32.totalorder %v7254_v6, 2  ;;  %v6595_v20 = vld [vmem:[#allocation7 + $0x40] sm:$0xff]   ;;  %v6596_v21 = vld [vmem:[#allocation7 + $0x48] sm:$0xff]   ;;  %v6597_v22 = vld [vmem:[#allocation7 + $0x50] sm:$0xff]   ;;  %v450_v27 = vrot.slane %v7258_v8, 5  ;;  %v451_v28 = vrot.slane %v409_v9, 5 }
  0x96   : > { %v541_v15 = vsel %vm540_vm0, %v538_v12, %v539_v13  ;;  %v542_v16 = vsel %vm540_vm0, %v537_v11, %v538_v12  ;;  %v6598_v23 = vld [vmem:[#allocation7 + $0x58] sm:$0xff]   ;;  %v6599_v24 = vld [vmem:[#allocation7 + $0x60] sm:$0xff]   ;;  %v6600_v26 = vld [vmem:[#allocation7 + $0x68] sm:$0xff]   ;;  %v452_v29 = vrot.slane %v7262_v10, 5  ;;  %vm455_vm1 = vcmp.lt.s32.totalorder %v7254_v6, 3  ;;  %s6902_s19 = sshll.u32 %s6985_s18, 4  ;;  %s6903_s19 = int_to_ptr.vmem [resolvable:$false] %s6902_s19 }
  0x97   : > { %1649 = vmatpush1.bf16.msra.mxu0 %v6588_v2  ;;  %v924_v17 = vpack.c.bf16 %v541_v15, %v542_v16  ;;  %v369_v25 = vld [vmem:[%s7235_s26] sm:$0xff]  ;;  %v370_v31 = vld [vmem:[%s7235_s26 + $0x8] sm:$0xff]  ;;  %v371_v34 = vld [vmem:[%s7235_s26 + $0x10] sm:$0xff]  ;;  %v457_v38 = vsel %vm455_vm1, %v450_v27, %v451_v28  ;;  %vm625_vm2 = vcmp.lt.s32.totalorder %v7254_v6, 1  ;;  %vm710_vm3 = vcmp.lt.s32.totalorder %v7254_v6, 7  ;;  %s6904_s20 = scalar_lea.vmem %s6903_s19, 10752 }
  0x98   : > { %1650 = vmatprep.subr.bf16.mxu0 %v10232_v0  ;;  %v6601_v30 = vld [vmem:[#allocation7 + $0x70] sm:$0xff]   ;;  %v498_v32 = vrot.slane %v369_v25, 6  ;;  %v499_v33 = vrot.slane %v370_v31, 6  ;;  %v7290_v35 = vld [vmem:[%s7235_s26 + $0x18] sm:$0xff]  ;;  %v456_v37 = vsel %vm455_vm1, %v451_v28, %v452_v29  ;;  %v411_v40 = vrot.slane %v369_v25, 5  ;;  %v6603_v45 = vld [vmem:[#allocation7 + $0x80] sm:$0xff]  }
  0x99   : > { %1678 = vmatprep.mubr.bf16.mxu0 %v924_v17  ;;  %v6602_v36 = vld [vmem:[#allocation7 + $0x78] sm:$0xff]   ;;  %v412_v42 = vrot.slane %v370_v31, 5  ;;  %v500_v43 = vrot.slane %v371_v34, 6  ;;  %v501_v44 = vrot.slane %v7290_v35, 6  ;;  %v923_v46 = vpack.c.bf16 %v456_v37, %v457_v38  ;;  %v373_v47 = vld [vmem:[%s7235_s26 + $0x20] sm:$0xff]  ;;  %v6604_v53 = vld [vmem:[#allocation7 + $0x88] sm:$0xff]  }
  0x9a   : > { %v582_v39 = vsel %vm540_vm0, %v539_v13, %v498_v32  ;;  %v581_v41 = vsel %vm540_vm0, %v498_v32, %v499_v33  ;;  %v7306_v48 = vld [vmem:[%s7235_s26 + $0x28] sm:$0xff]  ;;  %v497_v50 = vsel %vm455_vm1, %v452_v29, %v411_v40  ;;  %v413_v51 = vrot.slane %v371_v34, 5  ;;  %v6605_v59 = vld [vmem:[#allocation7 + $0x90] sm:$0xff]   ;;  %v7324_v62 = vld [vmem:[%s7235_s26 + $0x38] sm:$0xff] }
  0x9b   : > { %1651 = vmatpush1.bf16.msra.mxu0 %v6589_v3  ;;  %v933_v49 = vpack.c.bf16 %v581_v41, %v582_v39  ;;  %v496_v52 = vsel %vm455_vm1, %v411_v40, %v412_v42  ;;  %v414_v54 = vrot.slane %v7290_v35, 5  ;;  %v502_v55 = vrot.slane %v373_v47, 6  ;;  %v7321_v61 = vld [vmem:[%s7235_s26 + $0x30] sm:$0xff]  ;;  %v6606_v3 = vld [vmem:[#allocation7 + $0x98] sm:$0xff]   ;;  %v7340_v15 = vld [vmem:[%s7235_s26 + $0x40] sm:$0xff] }
  0x9c   : > { %1652 = vmatprep.subr.bf16.mxu0 %v10232_v0  ;;  %v503_v56 = vrot.slane %v7306_v48, 6  ;;  %v579_v57 = vsel %vm540_vm0, %v500_v43, %v501_v44  ;;  %v580_v58 = vsel %vm540_vm0, %v499_v33, %v500_v43  ;;  %v932_v60 = vpack.c.bf16 %v496_v52, %v497_v50  ;;  %v6607_v13 = vld [vmem:[#allocation7 + $0xa0] sm:$0xff]   ;;  %v7343_v16 = vld [vmem:[%s7235_s26 + $0x48] sm:$0xff]  ;;  %v7364_v32 = vld [vmem:[%s7235_s26 + $0x58] sm:$0xff] }
  0x9d   : > { %v940_v63 = vpack.c.bf16 %v579_v57, %v580_v58  ;;  %v494_v1 = vsel %vm455_vm1, %v413_v51, %v414_v54  ;;  %v495_v2 = vsel %vm455_vm1, %v412_v42, %v413_v51  ;;  %v415_v4 = vrot.slane %v373_v47, 5  ;;  %v6608_v25 = vld [vmem:[#allocation7 + $0xa8] sm:$0xff]   ;;  %v7361_v29 = vld [vmem:[%s7235_s26 + $0x50] sm:$0xff]  ;;  %v6610_v41 = vld [vmem:[#allocation7 + $0xb8] sm:$0xff]  }
  0x9e   : > { %v505_v9 = vrot.slane %v7324_v62, 6  ;;  %v577_v10 = vsel %vm540_vm0, %v502_v55, %v503_v56  ;;  %v578_v12 = vsel %vm540_vm0, %v501_v44, %v502_v55  ;;  %v420_v35 = vrot.slane %v7343_v16, 5  ;;  %v7382_v44 = vld [vmem:[%s7235_s26 + $0x60] sm:$0xff]  ;;  %v6612_v57 = vld [vmem:[#allocation7 + $0xc8] sm:$0xff]  }
  0x9f   : > { %1653 = vmatpush1.bf16.msra.mxu0 %v6590_v5  ;;  %v416_v5 = vrot.slane %v7306_v48, 5  ;;  %v947_v17 = vpack.c.bf16 %v577_v10, %v578_v12  ;;  %v509_v38 = vrot.slane %v7364_v32, 6  ;;  %v421_v39 = vrot.slane %v7361_v29, 5  ;;  %v7388_v48 = vld [vmem:[%s7235_s26 + $0x70] sm:$0xff]  ;;  %v6614_v10 = vld [vmem:[#allocation7 + $0xd8] sm:$0xff]   ;;  %v7675_v8 = vld [vmem:[%s7235_s26 + $0x140] sm:$0xff] }
  0xa0   : > { %1654 = vmatprep.subr.bf16.mxu0 %v10232_v0  ;;  %v422_v40 = vrot.slane %v7364_v32, 5  ;;  %v510_v50 = vrot.slane %v7382_v44, 6  ;;  %v423_v52 = vrot.slane %v7382_v44, 5  ;;  %vm795_vm4 = vcmp.lt.s32.totalorder %v7254_v6, 6 }
  0xa1   : > { %vm880_vm5 = vcmp.lt.s32.totalorder %v7254_v6, 5 }
  0xa3   : > { %1655 = vmatpush1.bf16.msra.mxu0 %v6591_v7  ;;  %v504_v7 = vrot.slane %v7321_v61, 6 }
  0xa4   : > { %1656 = vmatprep.subr.bf16.mxu0 %v10232_v0 }
  0xa5   : > { %v576_v28 = vsel %vm540_vm0, %v503_v56, %v504_v7  ;;  %v512_v56 = vrot.slane %v7388_v48, 6 }
  0xa7   : > { %1657 = vmatpush1.bf16.msra.mxu0 %v6592_v14  ;;  %v939_v14 = vpack.c.bf16 %v494_v1, %v495_v2 }
  0xa8   : > { %1658 = vmatprep.subr.bf16.mxu0 %v10232_v0 }
  0xab   : > { %1659 = vmatpush1.bf16.msra.mxu0 %v6593_v18  ;;  %v492_v18 = vsel %vm455_vm1, %v415_v4, %v416_v5 }
  0xac   : > { %1660 = vmatprep.subr.bf16.mxu0 %v10232_v0 }
  0xaf   : > { %1661 = vmatpush1.bf16.msra.mxu0 %v6594_v19  ;;  %v417_v19 = vrot.slane %v7321_v61, 5 }
  0xb0   : > { %1662 = vmatprep.subr.bf16.mxu0 %v10232_v0 }
  0xb1   : > { %v491_v37 = vsel %vm455_vm1, %v416_v5, %v417_v19  ;;  %v486_v5 = vsel %vm455_vm1, %v421_v39, %v422_v40 }
  0xb3   : > { %1663 = vmatpush1.bf16.msra.mxu0 %v6595_v20  ;;  %v418_v20 = vrot.slane %v7324_v62, 5 }
  0xb4   : > { %1664 = vmatprep.subr.bf16.mxu0 %v10232_v0 }
  0xb5   : > { %v490_v34 = vsel %vm455_vm1, %v417_v19, %v418_v20 }
  0xb6   : > { %v953_v47 = vpack.c.bf16 %v490_v34, %v491_v37  ;;  %v6617_v34 = vld [vmem:[#allocation7 + $0xf0] sm:$0xff]  }
  0xb7   : > { %1665 = vmatpush1.bf16.msra.mxu0 %v6596_v21  ;;  %v493_v21 = vsel %vm455_vm1, %v414_v54, %v415_v4  ;;  %v425_v4 = vrot.slane %v7388_v48, 5 }
  0xb8   : > { %1666 = vmatprep.subr.bf16.mxu0 %v10232_v0  ;;  %v946_v31 = vpack.c.bf16 %v492_v18, %v493_v21  ;;  %v6615_v18 = vld [vmem:[#allocation7 + $0xe0] sm:$0xff]  }
  0xbb   : > { %1667 = vmatpush1.bf16.msra.mxu0 %v6597_v22  ;;  %v506_v22 = vrot.slane %v7340_v15, 6 }
  0xbc   : > { %1668 = vmatprep.subr.bf16.mxu0 %v10232_v0 }
  0xbd   : > { %v574_v43 = vsel %vm540_vm0, %v505_v9, %v506_v22 }
  0xbf   : > { %1669 = vmatpush1.bf16.msra.mxu0 %v6598_v23  ;;  %v507_v23 = vrot.slane %v7343_v16, 6 }
  0xc0   : > { %1670 = vmatprep.subr.bf16.mxu0 %v10232_v0 }
  0xc1   : > { %v573_v42 = vsel %vm540_vm0, %v506_v22, %v507_v23 }
  0xc3   : > { %1671 = vmatpush1.bf16.msra.mxu0 %v6599_v24  ;;  %v419_v24 = vrot.slane %v7340_v15, 5 }
  0xc4   : > { %1672 = vmatprep.subr.bf16.mxu0 %v10232_v0 }
  0xc5   : > { %v488_v54 = vsel %vm455_vm1, %v419_v24, %v420_v35  ;;  %v489_v55 = vsel %vm455_vm1, %v418_v20, %v419_v24  ;;  %v6616_v24 = vld [vmem:[#allocation7 + $0xe8] sm:$0xff]  }
  0xc6   : > { %v960_v1 = vpack.c.bf16 %v488_v54, %v489_v55 }
  0xc7   : > { %1673 = vmatpush1.bf16.msra.mxu0 %v6600_v26  ;;  %v575_v26 = vsel %vm540_vm0, %v504_v7, %v505_v9  ;;  %v487_v7 = vsel %vm455_vm1, %v420_v35, %v421_v39 }
  0xc8   : > { %1674 = vmatprep.subr.bf16.mxu0 %v10232_v0  ;;  %v954_v33 = vpack.c.bf16 %v575_v26, %v576_v28  ;;  %v967_v19 = vpack.c.bf16 %v486_v5, %v487_v7  ;;  %v485_v26 = vsel %vm455_vm1, %v422_v40, %v423_v52  ;;  %v6618_v40 = vld [vmem:[#allocation7 + $0xf8] sm:$0xff]   ;;  %v7487_v7 = vld [vmem:[%s7235_s26 + $0xb0] sm:$0xff] }
  0xcb   : > { %1675 = vmatpush1.bf16.msra.mxu0 %v6601_v30  ;;  %v6609_v30 = vld [vmem:[#allocation7 + $0xb0] sm:$0xff]  }
  0xcc   : > { %1676 = vmatprep.subr.bf16.mxu0 %v10232_v0 }
  0xcf   : > { %1677 = vmatpush1.bf16.msra.mxu0 %v6602_v36  ;;  %v508_v36 = vrot.slane %v7361_v29, 6 }
  0xd0   : > { %1847 = vmatprep.subr.bf16.mxu0 %v10232_v0 }
  0xd1   : > { %v571_v58 = vsel %vm540_vm0, %v508_v36, %v509_v38 }
  0xd2   : > { %1679 = vmatmul.mubr.bf16.vlgmr.msra.gmra.mrb[0].mxu0 %v923_v46  ;;  %v6611_v46 = vld [vmem:[#allocation7 + $0xc0] sm:$0xff]  }
  0xd3   : > { %1848 = vmatpush1.bf16.msra.mxu0 %v6603_v45  ;;  %1686 = vmatprep.mubr.bf16.mxu0 %v933_v49  ;;  %v7385_v45 = vld [vmem:[%s7235_s26 + $0x68] sm:$0xff]  ;;  %v961_v49 = vpack.c.bf16 %v573_v42, %v574_v43 }
  0xd4   : > { %1849 = vmatprep.subr.bf16.mxu0 %v10232_v0  ;;  %v511_v51 = vrot.slane %v7385_v45, 6 }
  0xd6   : > { %v569_v12 = vsel %vm540_vm0, %v510_v50, %v511_v51 }
  0xd7   : > { %1850 = vmatpush1.bf16.msra.mxu0 %v6604_v53  ;;  %v424_v53 = vrot.slane %v7385_v45, 5 }
  0xd8   : > { %1851 = vmatprep.subr.bf16.mxu0 %v10232_v0 }
  0xd9   : > { %v483_v42 = vsel %vm455_vm1, %v424_v53, %v425_v4 }
  0xda   : > { %1687 = vmatmul.mubr.bf16.gmra.mrb[4].mxu0 %v932_v60  ;;  %v7406_v60 = vld [vmem:[%s7235_s26 + $0x78] sm:$0xff] }
  0xdb   : > { %1694 = vmatprep.mubr.bf16.mxu0 %v940_v63  ;;  %1852 = vmatpush1.bf16.msra.mxu0 %v6605_v59  ;;  %v572_v59 = vsel %vm540_vm0, %v507_v23, %v508_v36  ;;  %v6613_v63 = vld [vmem:[#allocation7 + $0xd0] sm:$0xff]   ;;  %v426_v9 = vrot.slane %v7406_v60, 5 }
  0xdc   : > { %1853 = vmatprep.subr.bf16.mxu0 %v10232_v0  ;;  %v968_v2 = vpack.c.bf16 %v571_v58, %v572_v59 }
  0xdf   : > { %1854 = vmatpush1.bf16.msra.mxu0 %v6606_v3  ;;  %v513_v3 = vrot.slane %v7406_v60, 6 }
  0xe0   : > { %1855 = vmatprep.subr.bf16.mxu0 %v10232_v0 }
  0xe1   : > { %v567_v28 = vsel %vm540_vm0, %v512_v56, %v513_v3 }
  0xe2   : > { %1695 = vmatmul.mubr.bf16.gmra.mrb[8].mxu0 %v939_v14  ;;  %v7422_v14 = vld [vmem:[%s7235_s26 + $0x80] sm:$0xff] }
  0xe3   : > { %1702 = vmatprep.mubr.bf16.mxu0 %v947_v17  ;;  %1856 = vmatpush1.bf16.msra.mxu0 %v6607_v13  ;;  %v570_v13 = vsel %vm540_vm0, %v509_v38, %v510_v50  ;;  %v7425_v17 = vld [vmem:[%s7235_s26 + $0x88] sm:$0xff]  ;;  %v514_v21 = vrot.slane %v7422_v14, 6  ;;  %v427_v23 = vrot.slane %v7422_v14, 5 }
  0xe4   : > { %1857 = vmatprep.subr.bf16.mxu0 %v10232_v0  ;;  %v975_v20 = vpack.c.bf16 %v569_v12, %v570_v13  ;;  %v515_v22 = vrot.slane %v7425_v17, 6  ;;  %v428_v37 = vrot.slane %v7425_v17, 5 }
  0xe6   : > { %v565_v43 = vsel %vm540_vm0, %v514_v21, %v515_v22  ;;  %v480_v50 = vsel %vm455_vm1, %v427_v23, %v428_v37 }
  0xe7   : > { %1858 = vmatpush1.bf16.msra.mxu0 %v6608_v25  ;;  %v484_v25 = vsel %vm455_vm1, %v423_v52, %v424_v53  ;;  %v7465_v52 = vld [vmem:[%s7235_s26 + $0xa0] sm:$0xff]  ;;  %v7468_v53 = vld [vmem:[%s7235_s26 + $0xa8] sm:$0xff] }
  0xe8   : > { %1859 = vmatprep.subr.bf16.mxu0 %v10232_v0  ;;  %v974_v35 = vpack.c.bf16 %v484_v25, %v485_v26  ;;  %v431_v13 = vrot.slane %v7465_v52, 5  ;;  %v7505_v25 = vld [vmem:[%s7235_s26 + $0xc0] sm:$0xff]  ;;  %v7508_v26 = vld [vmem:[%s7235_s26 + $0xc8] sm:$0xff] }
  0xea   : > { %1703 = vmatmul.mubr.bf16.gmra.mrb[12].mxu0 %v946_v31  ;;  %v7441_v31 = vld [vmem:[%s7235_s26 + $0x90] sm:$0xff] }
  0xeb   : > { %1710 = vmatprep.mubr.bf16.mxu0 %v954_v33  ;;  %1860 = vmatpush1.bf16.msra.mxu0 %v6609_v30  ;;  %v568_v30 = vsel %vm540_vm0, %v511_v51, %v512_v56  ;;  %v7444_v33 = vld [vmem:[%s7235_s26 + $0x98] sm:$0xff]  ;;  %v516_v38 = vrot.slane %v7441_v31, 6  ;;  %v481_v51 = vsel %vm455_vm1, %v426_v9, %v427_v23  ;;  %v429_v58 = vrot.slane %v7441_v31, 5 }
  0xec   : > { %1861 = vmatprep.subr.bf16.mxu0 %v10232_v0  ;;  %v982_v36 = vpack.c.bf16 %v567_v28, %v568_v30  ;;  %v517_v39 = vrot.slane %v7444_v33, 6  ;;  %v988_v56 = vpack.c.bf16 %v480_v50, %v481_v51  ;;  %v430_v59 = vrot.slane %v7444_v33, 5 }
  0xed   : > { %v564_v55 = vsel %vm540_vm0, %v515_v22, %v516_v38  ;;  %v436_v50 = vrot.slane %v7508_v26, 5 }
  0xee   : > { %v563_v54 = vsel %vm540_vm0, %v516_v38, %v517_v39  ;;  %v477_v22 = vsel %vm455_vm1, %v430_v59, %v431_v13 }
  0xef   : > { %1862 = vmatpush1.bf16.msra.mxu0 %v6610_v41  ;;  %v482_v41 = vsel %vm455_vm1, %v425_v4, %v426_v9  ;;  %v7490_v9 = vld [vmem:[%s7235_s26 + $0xb8] sm:$0xff] }
  0xf0   : > { %1863 = vmatprep.subr.bf16.mxu0 %v10232_v0 }
  0xf2   : > { %1711 = vmatmul.mubr.bf16.gmra.mrb[16].mxu0 %v953_v47  ;;  %v981_v47 = vpack.c.bf16 %v482_v41, %v483_v42  ;;  %v7523_v42 = vld [vmem:[%s7235_s26 + $0xd0] sm:$0xff] }
  0xf3   : > { %1718 = vmatprep.mubr.bf16.mxu0 %v961_v49  ;;  %1864 = vmatpush1.bf16.msra.mxu0 %v6611_v46  ;;  %v566_v46 = vsel %vm540_vm0, %v513_v3, %v514_v21  ;;  %v479_v3 = vsel %vm455_vm1, %v428_v37, %v429_v58  ;;  %v523_v37 = vrot.slane %v7508_v26, 6  ;;  %v524_v51 = vrot.slane %v7523_v42, 6 }
  0xf4   : > { %1865 = vmatprep.subr.bf16.mxu0 %v10232_v0  ;;  %v989_v49 = vpack.c.bf16 %v565_v43, %v566_v46  ;;  %v7526_v43 = vld [vmem:[%s7235_s26 + $0xd8] sm:$0xff] }
  0xf7   : > { %1866 = vmatpush1.bf16.msra.mxu0 %v6612_v57  ;;  %v996_v57 = vpack.c.bf16 %v563_v54, %v564_v55  ;;  %v525_v54 = vrot.slane %v7526_v43, 6 }
  0xf8   : > { %1867 = vmatprep.subr.bf16.mxu0 %v10232_v0 }
  0xfa   : > { %1719 = vmatmul.mubr.bf16.gmra.mrb[20].mxu0 %v960_v1  ;;  %v519_v1 = vrot.slane %v7468_v53, 6 }
  0xfb   : > { %1726 = vmatprep.mubr.bf16.mxu0 %v968_v2  ;;  %1868 = vmatpush1.bf16.msra.mxu0 %v6613_v63  ;;  %v518_v63 = vrot.slane %v7465_v52, 6  ;;  %v478_v2 = vsel %vm455_vm1, %v429_v58, %v430_v59  ;;  %v556_v58 = vsel %vm540_vm0, %v523_v37, %v524_v51  ;;  %v7541_v59 = vld [vmem:[%s7235_s26 + $0xe0] sm:$0xff] }
  0xfc   : > { %1869 = vmatprep.subr.bf16.mxu0 %v10232_v0 }
  0xfd   : > { %v561_v4 = vsel %vm540_vm0, %v518_v63, %v519_v1  ;;  %v562_v5 = vsel %vm540_vm0, %v517_v39, %v518_v63  ;;  %v7544_v63 = vld [vmem:[%s7235_s26 + $0xe8] sm:$0xff] }
  0xfe   : > { %v1003_v12 = vpack.c.bf16 %v561_v4, %v562_v5  ;;  %v438_v4 = vrot.slane %v7526_v43, 5  ;;  %v526_v5 = vrot.slane %v7541_v59, 6 }
  0xff   : > { %1870 = vmatpush1.bf16.msra.mxu0 %v6614_v10  ;;  %v995_v10 = vpack.c.bf16 %v478_v2, %v479_v3  ;;  %v437_v3 = vrot.slane %v7523_v42, 5 }
 0x100   : > { %1871 = vmatprep.subr.bf16.mxu0 %v10232_v0 }
 0x102   : > { %1727 = vmatmul.mubr.bf16.gmra.mrb[24].mxu0 %v967_v19  ;;  %v520_v19 = vrot.slane %v7487_v7, 6 }
 0x103   : > { %1734 = vmatprep.mubr.bf16.mxu0 %v975_v20  ;;  %1872 = vmatpush1.bf16.msra.mxu0 %v6615_v18  ;;  %v432_v18 = vrot.slane %v7468_v53, 5  ;;  %v521_v20 = vrot.slane %v7490_v9, 6 }
 0x104   : > { %1873 = vmatprep.subr.bf16.mxu0 %v10232_v0 }
 0x105   : > { %v476_v21 = vsel %vm455_vm1, %v431_v13, %v432_v18  ;;  %v559_v23 = vsel %vm540_vm0, %v520_v19, %v521_v20  ;;  %v471_v13 = vsel %vm455_vm1, %v436_v50, %v437_v3 }
 0x106   : > { %v1002_v28 = vpack.c.bf16 %v476_v21, %v477_v22  ;;  %v7562_v21 = vld [vmem:[%s7235_s26 + $0xf8] sm:$0xff] }
 0x107   : > { %1874 = vmatpush1.bf16.msra.mxu0 %v6616_v24  ;;  %v560_v24 = vsel %vm540_vm0, %v519_v1, %v520_v19  ;;  %v554_v19 = vsel %vm540_vm0, %v525_v54, %v526_v5 }
 0x108   : > { %1875 = vmatprep.subr.bf16.mxu0 %v10232_v0  ;;  %v1010_v30 = vpack.c.bf16 %v559_v23, %v560_v24  ;;  %v439_v24 = vrot.slane %v7541_v59, 5 }
 0x10a   : > { %1735 = vmatmul.mubr.bf16.gmra.mrb[28].mxu0 %v974_v35  ;;  %v434_v35 = vrot.slane %v7490_v9, 5 }
 0x10b   : > { %1742 = vmatprep.mubr.bf16.mxu0 %v982_v36  ;;  %1876 = vmatpush1.bf16.msra.mxu0 %v6617_v34  ;;  %v433_v34 = vrot.slane %v7487_v7, 5  ;;  %v522_v36 = vrot.slane %v7505_v25, 6 }
 0x10c   : > { %1877 = vmatprep.subr.bf16.mxu0 %v10232_v0 }
 0x10d   : > { %v474_v38 = vsel %vm455_vm1, %v433_v34, %v434_v35  ;;  %v475_v39 = vsel %vm455_vm1, %v432_v18, %v433_v34  ;;  %v558_v41 = vsel %vm540_vm0, %v521_v20, %v522_v36  ;;  %v7559_v20 = vld [vmem:[%s7235_s26 + $0xf0] sm:$0xff]  ;;  %v529_v34 = vrot.slane %v7562_v21, 6 }
 0x10e   : > { %v1009_v46 = vpack.c.bf16 %v474_v38, %v475_v39  ;;  %v7577_v39 = vld [vmem:[%s7235_s26 + $0x100] sm:$0xff] }
 0x10f   : > { %1878 = vmatpush1.bf16.msra.mxu0 %v6618_v40  ;;  %v557_v40 = vsel %vm540_vm0, %v522_v36, %v523_v37  ;;  %v469_v36 = vsel %vm455_vm1, %v438_v4, %v439_v24 }
 0x110   : > { %2048 = vmatprep.subr.bf16.mxu0 %v10232_v0 }
 0x112   : > { %1743 = vmatmul.mubr.bf16.gmra.mrb[32].mxu0 %v981_v47  ;;  %v1017_v47 = vpack.c.bf16 %v557_v40, %v558_v41  ;;  %v7580_v40 = vld [vmem:[%s7235_s26 + $0x108] sm:$0xff] }
 0x113   : > { %1750 = vmatprep.mubr.bf16.mxu0 %v989_v49  ;;  %v435_v49 = vrot.slane %v7505_v25, 5 }
 0x115   : > { %v472_v55 = vsel %vm455_vm1, %v435_v49, %v436_v50  ;;  %v530_v50 = vrot.slane %v7577_v39, 6 }
 0x11a   : > { %1751 = vmatmul.mubr.bf16.gmra.mrb[36].mxu0 %v988_v56  ;;  %v473_v56 = vsel %vm455_vm1, %v434_v35, %v435_v49  ;;  %v442_v49 = vrot.slane %v7562_v21, 5 }
 0x11b   : > { %1758 = vmatprep.mubr.bf16.mxu0 %v996_v57  ;;  %v555_v57 = vsel %vm540_vm0, %v524_v51, %v525_v54  ;;  %v1016_v1 = vpack.c.bf16 %v472_v55, %v473_v56  ;;  %v531_v51 = vrot.slane %v7580_v40, 6 }
 0x11c   : > { %v1024_v2 = vpack.c.bf16 %v555_v57, %v556_v58  ;;  %v550_v57 = vsel %vm540_vm0, %v529_v34, %v530_v50  ;;  %v7595_v58 = vld [vmem:[%s7235_s26 + $0x110] sm:$0xff] }
 0x11d   : > { %v549_v56 = vsel %vm540_vm0, %v530_v50, %v531_v51 }
 0x122   : > { %1759 = vmatmul.mubr.bf16.gmra.mrb[40].mxu0 %v995_v10  ;;  %v527_v10 = vrot.slane %v7544_v63, 6 }
 0x123   : > { %1766 = vmatprep.mubr.bf16.mxu0 %v1003_v12  ;;  %v470_v12 = vsel %vm455_vm1, %v437_v3, %v438_v4  ;;  %v1045_v3 = vpack.c.bf16 %v549_v56, %v550_v57  ;;  %v443_v4 = vrot.slane %v7577_v39, 5 }
 0x124   : > { %v553_v18 = vsel %vm540_vm0, %v526_v5, %v527_v10  ;;  %v1023_v22 = vpack.c.bf16 %v470_v12, %v471_v13  ;;  %v444_v5 = vrot.slane %v7580_v40, 5 }
 0x125   : > { %v1031_v23 = vpack.c.bf16 %v553_v18, %v554_v19  ;;  %v465_v18 = vsel %vm455_vm1, %v442_v49, %v443_v4 }
 0x126   : > { %v464_v13 = vsel %vm455_vm1, %v443_v4, %v444_v5 }
 0x12a   : > { %1767 = vmatmul.mubr.bf16.gmra.mrb[44].mxu0 %v1002_v28  ;;  %v440_v28 = vrot.slane %v7544_v63, 5 }
 0x12b   : > { %1774 = vmatprep.mubr.bf16.mxu0 %v1010_v30  ;;  %v528_v30 = vrot.slane %v7559_v20, 6 }
 0x12c   : > { %v468_v35 = vsel %vm455_vm1, %v439_v24, %v440_v28  ;;  %v7616_v24 = vld [vmem:[%s7235_s26 + $0x128] sm:$0xff] }
 0x12d   : > { %v551_v37 = vsel %vm540_vm0, %v528_v30, %v529_v34  ;;  %v552_v38 = vsel %vm540_vm0, %v527_v10, %v528_v30  ;;  %v1030_v41 = vpack.c.bf16 %v468_v35, %v469_v36  ;;  %v532_v10 = vrot.slane %v7595_v58, 6 }
 0x12e   : > { %v445_v34 = vrot.slane %v7595_v58, 5 }
 0x132   : > { %1775 = vmatmul.mubr.bf16.gmra.mrb[48].mxu0 %v1009_v46  ;;  %v1038_v46 = vpack.c.bf16 %v551_v37, %v552_v38  ;;  %v535_v37 = vrot.slane %v7616_v24, 6 }
 0x133   : > { %1782 = vmatprep.mubr.bf16.mxu0 %v1017_v47  ;;  %v441_v47 = vrot.slane %v7559_v20, 5 }
 0x135   : > { %v466_v54 = vsel %vm455_vm1, %v441_v47, %v442_v49  ;;  %v467_v55 = vsel %vm455_vm1, %v440_v28, %v441_v47  ;;  %v1044_v28 = vpack.c.bf16 %v464_v13, %v465_v18  ;;  %v7631_v49 = vld [vmem:[%s7235_s26 + $0x130] sm:$0xff]  ;;  %v7648_v13 = vld [vmem:[%s7235_s26] sm:$0xff] }
 0x136   : > { %v536_v56 = vrot.slane %v7631_v49, 6  ;;  %v583_v18 = vrot.slane %v7648_v13, 7 }
 0x138   : > { %v544_v4 = vsel %vm540_vm0, %v535_v37, %v536_v56 }
 0x13a   : > { %1783 = vmatmul.mubr.bf16.gmra.mrb[52].mxu0 %v1016_v1  ;;  %v7598_v1 = vld [vmem:[%s7235_s26 + $0x118] sm:$0xff] }
 0x13b   : > { %1790 = vmatprep.mubr.bf16.mxu0 %v1024_v2  ;;  %v1037_v2 = vpack.c.bf16 %v466_v54, %v467_v55  ;;  %v533_v12 = vrot.slane %v7598_v1, 6  ;;  %v446_v35 = vrot.slane %v7598_v1, 5  ;;  %v448_v55 = vrot.slane %v7616_v24, 5 }
 0x13d   : > { %v547_v19 = vsel %vm540_vm0, %v532_v10, %v533_v12  ;;  %v462_v38 = vsel %vm455_vm1, %v445_v34, %v446_v35 }
 0x142   : > { %1791 = vmatmul.mubr.bf16.gmra.mrb[56].mxu0 %v1023_v22  ;;  %v548_v22 = vsel %vm540_vm0, %v531_v51, %v532_v10 }
 0x143   : > { %1798 = vmatprep.mubr.bf16.mxu0 %v1031_v23  ;;  %v7613_v23 = vld [vmem:[%s7235_s26 + $0x120] sm:$0xff]  ;;  %v1052_v30 = vpack.c.bf16 %v547_v19, %v548_v22  ;;  %v7652_v19 = vld [vmem:[%s7235_s26 + $0x8] sm:$0xff] }
 0x144   : > { %v534_v36 = vrot.slane %v7613_v23, 6  ;;  %v447_v54 = vrot.slane %v7613_v23, 5  ;;  %v584_v22 = vrot.slane %v7652_v19, 7 }
 0x146   : > { %v546_v47 = vsel %vm540_vm0, %v533_v12, %v534_v36  ;;  %v460_v57 = vsel %vm455_vm1, %v447_v54, %v448_v55  ;;  %v449_v12 = vrot.slane %v7631_v49, 5 }
 0x14a   : > { %1799 = vmatmul.mubr.bf16.gmra.mrb[60].mxu0 %v1030_v41  ;;  %v463_v41 = vsel %vm455_vm1, %v444_v5, %v445_v34  ;;  %v459_v34 = vsel %vm455_vm1, %v448_v55, %v449_v12 }
 0x14b   : > { %1806 = vmatprep.mubr.bf16.mxu0 %v1038_v46  ;;  %v545_v46 = vsel %vm540_vm0, %v534_v36, %v535_v37  ;;  %v1051_v50 = vpack.c.bf16 %v462_v38, %v463_v41  ;;  %v7671_v41 = vld [vmem:[%s7235_s26 + $0x138] sm:$0xff] }
 0x14c   : > { %v1059_v51 = vpack.c.bf16 %v545_v46, %v546_v47  ;;  %v622_v46 = vrot.slane %v7671_v41, 7  ;;  %v7679_v47 = vld [vmem:[%s7235_s26 + $0x10] sm:$0xff] }
 0x152   : > { %1807 = vmatmul.mubr.bf16.gmra.mrb[64].mxu0 %v1037_v2  ;;  %v461_v2 = vsel %vm455_vm1, %v446_v35, %v447_v54  ;;  %v666_v35 = vsel %vm625_vm2, %v583_v18, %v584_v22 }
 0x153   : > { %1814 = vmatprep.mubr.bf16.mxu0 %v1045_v3  ;;  %v543_v3 = vsel %vm540_vm0, %v536_v56, %v537_v11  ;;  %v1058_v5 = vpack.c.bf16 %v460_v57, %v461_v2 }
 0x154   : > { %v1066_v10 = vpack.c.bf16 %v543_v3, %v544_v4  ;;  %v6619_v4 = vld [vmem:[#allocation7 + $0x100] sm:$0xff]  }
 0x15a   : > { %1815 = vmatmul.mubr.bf16.gmra.mrb[68].mxu0 %v1044_v28  ;;  %v7656_v28 = vld [vmem:[%s7235_s26 + $0x148] sm:$0xff] }
 0x15b   : > { %1822 = vmatprep.mubr.bf16.mxu0 %v1052_v30  ;;  %v624_v11 = vrot.slane %v7656_v28, 7  ;;  %v458_v30 = vsel %vm455_vm1, %v449_v12, %v450_v27  ;;  %v623_v27 = vrot.slane %v7675_v8, 7 }
 0x15c   : > { %v1065_v37 = vpack.c.bf16 %v458_v30, %v459_v34  ;;  %v6620_v30 = vld [vmem:[#allocation7 + $0x108] sm:$0xff]  }
 0x15d   : > { %v667_v36 = vsel %vm625_vm2, %v624_v11, %v583_v18  ;;  %v626_v55 = vsel %vm625_vm2, %v623_v27, %v624_v11  ;;  %v627_v56 = vsel %vm625_vm2, %v622_v46, %v623_v27  ;;  %v7703_v18 = vld [vmem:[%s7235_s26 + $0x28] sm:$0xff]  ;;  %v590_v27 = vrot.slane %v7324_v62, 7 }
 0x15e   : > { %v926_v38 = vpack.c.bf16 %v666_v35, %v667_v36  ;;  %v7696_v3 = vpack.c.bf16 %v626_v55, %v627_v56  ;;  %v588_v11 = vrot.slane %v7703_v18, 7  ;;  %v6621_v36 = vld [vmem:[#allocation7 + $0x110] sm:$0xff]   ;;  %v6624_v62 = vld [vmem:[#allocation7 + $0x128] sm:$0xff]  }
 0x162   : > { %1823 = vmatmul.mubr.bf16.gmra.mrb[72].mxu0 %v1051_v50  ;;  %v585_v50 = vrot.slane %v7679_v47, 7 }
 0x163   : > { %1830 = vmatprep.mubr.bf16.mxu0 %v1059_v51  ;;  %v7683_v51 = vld [vmem:[%s7235_s26 + $0x18] sm:$0xff] }
 0x164   : > { %v586_v54 = vrot.slane %v7683_v51, 7  ;;  %v665_v2 = vsel %vm625_vm2, %v584_v22, %v585_v50 }
 0x166   : > { %v664_v57 = vsel %vm625_vm2, %v585_v50, %v586_v54  ;;  %v6622_v50 = vld [vmem:[#allocation7 + $0x118] sm:$0xff]  }
 0x16a   : > { %1831 = vmatmul.mubr.bf16.gmra.mrb[76].mxu0 %v1058_v5  ;;  %v934_v5 = vpack.c.bf16 %v664_v57, %v665_v2  ;;  %v6623_v57 = vld [vmem:[#allocation7 + $0x120] sm:$0xff]   ;;  %v591_v2 = vrot.slane %v7340_v15, 7  ;;  %v593_v15 = vrot.slane %v7361_v29, 7  ;;  %v595_v29 = vrot.slane %v7382_v44, 7 }
 0x16b   : > { %1838 = vmatprep.mubr.bf16.mxu0 %v1066_v10  ;;  %v7699_v10 = vld [vmem:[%s7235_s26 + $0x20] sm:$0xff]  ;;  %v597_v44 = vrot.slane %v7388_v48, 7  ;;  %v599_v48 = vrot.slane %v7422_v14, 7  ;;  %v601_v14 = vrot.slane %v7441_v31, 7  ;;  %v603_v31 = vrot.slane %v7465_v52, 7 }
 0x16c   : > { %v587_v12 = vrot.slane %v7699_v10, 7 }
 0x16e   : > { %v662_v22 = vsel %vm625_vm2, %v587_v12, %v588_v11  ;;  %v663_v34 = vsel %vm625_vm2, %v586_v54, %v587_v12 }
 0x16f   : > { %v941_v35 = vpack.c.bf16 %v662_v22, %v663_v34 }
 0x172   : > { %1839 = vmatmul.mubr.bf16.gmra.mrb[80].mxu0 %v1065_v37  ;;  %v589_v37 = vrot.slane %v7321_v61, 7  ;;  %v592_v61 = vrot.slane %v7343_v16, 7  ;;  %v594_v16 = vrot.slane %v7364_v32, 7  ;;  %v596_v32 = vrot.slane %v7385_v45, 7 }
 0x173   : > { %1879 = vmatprep.mubr.bf16.mxu0 %v926_v38  ;;  %v598_v45 = vrot.slane %v7406_v60, 7  ;;  %v600_v60 = vrot.slane %v7425_v17, 7  ;;  %v602_v17 = vrot.slane %v7444_v33, 7  ;;  %v604_v33 = vrot.slane %v7468_v53, 7 }
 0x174   : > { %v660_v55 = vsel %vm625_vm2, %v589_v37, %v590_v27  ;;  %v661_v56 = vsel %vm625_vm2, %v588_v11, %v589_v37  ;;  %v6625_v11 = vld [vmem:[#allocation7 + $0x130] sm:$0xff]   ;;  %v657_v22 = vsel %vm625_vm2, %v592_v61, %v593_v15  ;;  %v654_v37 = vsel %vm625_vm2, %v595_v29, %v596_v32 }
 0x175   : > { %v948_v54 = vpack.c.bf16 %v660_v55, %v661_v56  ;;  %v6629_v55 = vld [vmem:[#allocation7 + $0x150] sm:$0xff]   ;;  %v6630_v56 = vld [vmem:[#allocation7 + $0x158] sm:$0xff]  }
 0x17a   : > { %1880 = vmatmul.mubr.bf16.vlgmr.msra.gmra.mrb[0].mxu0 %v7696_v3 }
 0x17b   : > { %2049 = vmatpush1.bf16.msra.mxu0 %v6619_v4  ;;  %1887 = vmatprep.mubr.bf16.mxu0 %v934_v5  ;;  %v659_v4 = vsel %vm625_vm2, %v590_v27, %v591_v2  ;;  %v655_v27 = vsel %vm625_vm2, %v594_v16, %v595_v29  ;;  %v605_v29 = vrot.slane %v7487_v7, 7 }
 0x17c   : > { %2050 = vmatprep.subr.bf16.mxu0 %v10232_v0 }
 0x17f   : > { %2051 = vmatpush1.bf16.msra.mxu0 %v6620_v30  ;;  %v656_v30 = vsel %vm625_vm2, %v593_v15, %v594_v16  ;;  %v6634_v15 = vld [vmem:[#allocation7 + $0x178] sm:$0xff]   ;;  %v648_v16 = vsel %vm625_vm2, %v601_v14, %v602_v17 }
 0x180   : > { %2052 = vmatprep.subr.bf16.mxu0 %v10232_v0  ;;  %v962_v34 = vpack.c.bf16 %v656_v30, %v657_v22  ;;  %v646_v22 = vsel %vm625_vm2, %v603_v31, %v604_v33 }
 0x182   : > { %1888 = vmatmul.mubr.bf16.gmra.mrb[4].mxu0 %v926_v38  ;;  %v658_v38 = vsel %vm625_vm2, %v591_v2, %v592_v61  ;;  %v6631_v61 = vld [vmem:[#allocation7 + $0x160] sm:$0xff]  }
 0x183   : > { %1895 = vmatprep.mubr.bf16.mxu0 %v941_v35  ;;  %2053 = vmatpush1.bf16.msra.mxu0 %v6621_v36  ;;  %v955_v12 = vpack.c.bf16 %v658_v38, %v659_v4  ;;  %v6627_v36 = vld [vmem:[#allocation7 + $0x140] sm:$0xff]   ;;  %v650_v38 = vsel %vm625_vm2, %v599_v48, %v600_v60  ;;  %v651_v4 = vsel %vm625_vm2, %v598_v45, %v599_v48 }
 0x184   : > { %2054 = vmatprep.subr.bf16.mxu0 %v10232_v0 }
 0x187   : > { %2055 = vmatpush1.bf16.msra.mxu0 %v6622_v50  ;;  %v969_v50 = vpack.c.bf16 %v654_v37, %v655_v27  ;;  %v645_v37 = vsel %vm625_vm2, %v604_v33, %v605_v29 }
 0x188   : > { %2056 = vmatprep.subr.bf16.mxu0 %v10232_v0 }
 0x18a   : > { %1896 = vmatmul.mubr.bf16.gmra.mrb[8].mxu0 %v934_v5  ;;  %v6626_v5 = vld [vmem:[#allocation7 + $0x138] sm:$0xff]  }
 0x18b   : > { %1903 = vmatprep.mubr.bf16.mxu0 %v948_v54  ;;  %2057 = vmatpush1.bf16.msra.mxu0 %v6623_v57  ;;  %v653_v57 = vsel %vm625_vm2, %v596_v32, %v597_v44  ;;  %v606_v32 = vrot.slane %v7490_v9, 7 }
 0x18c   : > { %2058 = vmatprep.subr.bf16.mxu0 %v10232_v0 }
 0x18f   : > { %2059 = vmatpush1.bf16.msra.mxu0 %v6624_v62  ;;  %v6632_v62 = vld [vmem:[#allocation7 + $0x168] sm:$0xff]  }
 0x190   : > { %2060 = vmatprep.subr.bf16.mxu0 %v10232_v0 }
 0x192   : > { %1904 = vmatmul.mubr.bf16.gmra.mrb[12].mxu0 %v941_v35  ;;  %v6628_v35 = vld [vmem:[#allocation7 + $0x148] sm:$0xff]  }
 0x193   : > { %1911 = vmatprep.mubr.bf16.mxu0 %v955_v12  ;;  %2061 = vmatpush1.bf16.msra.mxu0 %v6625_v11  ;;  %v6633_v11 = vld [vmem:[#allocation7 + $0x170] sm:$0xff]  }
 0x194   : > { %2062 = vmatprep.subr.bf16.mxu0 %v10232_v0 }
 0x197   : > { %2063 = vmatpush1.bf16.msra.mxu0 %v6626_v5  ;;  %v649_v5 = vsel %vm625_vm2, %v600_v60, %v601_v14  ;;  %v611_v60 = vrot.slane %v7541_v59, 7  ;;  %v614_v14 = vrot.slane %v7562_v21, 7 }
 0x198   : > { %2064 = vmatprep.subr.bf16.mxu0 %v10232_v0  ;;  %v990_v30 = vpack.c.bf16 %v648_v16, %v649_v5  ;;  %v615_v5 = vrot.slane %v7577_v39, 7 }
 0x19a   : > { %1912 = vmatmul.mubr.bf16.gmra.mrb[16].mxu0 %v948_v54  ;;  %v652_v54 = vsel %vm625_vm2, %v597_v44, %v598_v45  ;;  %v635_v33 = vsel %vm625_vm2, %v614_v14, %v615_v5 }
 0x19b   : > { %1919 = vmatprep.mubr.bf16.mxu0 %v962_v34  ;;  %2065 = vmatpush1.bf16.msra.mxu0 %v6627_v36  ;;  %v976_v2 = vpack.c.bf16 %v652_v54, %v653_v57  ;;  %v609_v54 = vrot.slane %v7523_v42, 7  ;;  %v610_v57 = vrot.slane %v7526_v43, 7 }
 0x19c   : > { %2066 = vmatprep.subr.bf16.mxu0 %v10232_v0 }
 0x19f   : > { %2067 = vmatpush1.bf16.msra.mxu0 %v6628_v35  ;;  %v644_v35 = vsel %vm625_vm2, %v605_v29, %v606_v32 }
 0x1a0   : > { %2068 = vmatprep.subr.bf16.mxu0 %v10232_v0  ;;  %v1004_v27 = vpack.c.bf16 %v644_v35, %v645_v37  ;;  %v619_v37 = vrot.slane %v7613_v23, 7 }
 0x1a2   : > { %1920 = vmatmul.mubr.bf16.gmra.mrb[20].mxu0 %v955_v12  ;;  %v983_v12 = vpack.c.bf16 %v650_v38, %v651_v4  ;;  %v639_v4 = vsel %vm625_vm2, %v610_v57, %v611_v60 }
 0x1a3   : > { %1927 = vmatprep.mubr.bf16.mxu0 %v969_v50  ;;  %2069 = vmatpush1.bf16.msra.mxu0 %v6629_v55  ;;  %v608_v55 = vrot.slane %v7508_v26, 7 }
 0x1a4   : > { %2070 = vmatprep.subr.bf16.mxu0 %v10232_v0 }
 0x1a7   : > { %2071 = vmatpush1.bf16.msra.mxu0 %v6630_v56 }
 0x1a8   : > { %2072 = vmatprep.subr.bf16.mxu0 %v10232_v0 }
 0x1aa   : > { %1928 = vmatmul.mubr.bf16.gmra.mrb[24].mxu0 %v962_v34  ;;  %v647_v34 = vsel %vm625_vm2, %v602_v17, %v603_v31 }
 0x1ab   : > { %1935 = vmatprep.mubr.bf16.mxu0 %v976_v2  ;;  %2073 = vmatpush1.bf16.msra.mxu0 %v6631_v61  ;;  %v997_v36 = vpack.c.bf16 %v646_v22, %v647_v34  ;;  %v641_v61 = vsel %vm625_vm2, %v608_v55, %v609_v54  ;;  %v617_v34 = vrot.slane %v7595_v58, 7 }
 0x1ac   : > { %2074 = vmatprep.subr.bf16.mxu0 %v10232_v0 }
 0x1af   : > { %2075 = vmatpush1.bf16.msra.mxu0 %v6632_v62  ;;  %v612_v62 = vrot.slane %v7544_v63, 7 }
 0x1b0   : > { %2076 = vmatprep.subr.bf16.mxu0 %v10232_v0 }
 0x1b1   : > { %v638_v38 = vsel %vm625_vm2, %v611_v60, %v612_v62 }
 0x1b2   : > { %1936 = vmatmul.mubr.bf16.gmra.mrb[28].mxu0 %v969_v50  ;;  %v607_v50 = vrot.slane %v7505_v25, 7 }
 0x1b3   : > { %1943 = vmatprep.mubr.bf16.mxu0 %v983_v12  ;;  %2077 = vmatpush1.bf16.msra.mxu0 %v6633_v11  ;;  %v613_v11 = vrot.slane %v7559_v20, 7 }
 0x1b4   : > { %2078 = vmatprep.subr.bf16.mxu0 %v10232_v0  ;;  %v642_v44 = vsel %vm625_vm2, %v607_v50, %v608_v55  ;;  %v643_v45 = vsel %vm625_vm2, %v606_v32, %v607_v50 }
 0x1b5   : > { %v1011_v56 = vpack.c.bf16 %v642_v44, %v643_v45  ;;  %v636_v17 = vsel %vm625_vm2, %v613_v11, %v614_v14  ;;  %v621_v45 = vrot.slane %v7631_v49, 7  ;;  %v6635_v14 = vld [vmem:[#allocation7 + $0x180] sm:$0xff]  }
 0x1b7   : > { %2079 = vmatpush1.bf16.msra.mxu0 %v6634_v15  ;;  %v637_v15 = vsel %vm625_vm2, %v612_v62, %v613_v11  ;;  %v927_v11 = vpack.c.bf16 %v7652_v19, %v7648_v13 }
 0x1b8   : > { %2249 = vmatprep.subr.bf16.mxu0 %v10232_v0  ;;  %v1032_v16 = vpack.c.bf16 %v636_v17, %v637_v15  ;;  %v673_v15 = vrot.slane %v7703_v18, 1 }
 0x1ba   : > { %1944 = vmatmul.mubr.bf16.gmra.mrb[32].mxu0 %v976_v2  ;;  %v640_v2 = vsel %vm625_vm2, %v609_v54, %v610_v57 }
 0x1bb   : > { %1951 = vmatprep.mubr.bf16.mxu0 %v990_v30  ;;  %v1018_v48 = vpack.c.bf16 %v640_v2, %v641_v61  ;;  %v10236_v2 = vrot.slane %v7648_v13, 1  ;;  %v669_v61 = vrot.slane %v7652_v19, 1 }
 0x1bd   : > { %v751_v60 = vsel %vm710_vm3, %v10236_v2, %v669_v61 }
 0x1c2   : > { %1952 = vmatmul.mubr.bf16.gmra.mrb[36].mxu0 %v983_v12  ;;  %v1025_v12 = vpack.c.bf16 %v638_v38, %v639_v4  ;;  %v671_v38 = vrot.slane %v7683_v51, 1  ;;  %v672_v4 = vrot.slane %v7699_v10, 1 }
 0x1c3   : > { %1959 = vmatprep.mubr.bf16.mxu0 %v997_v36 }
 0x1ca   : > { %1960 = vmatmul.mubr.bf16.gmra.mrb[40].mxu0 %v990_v30  ;;  %v616_v30 = vrot.slane %v7580_v40, 7 }
 0x1cb   : > { %1967 = vmatprep.mubr.bf16.mxu0 %v1004_v27 }
 0x1cc   : > { %v634_v31 = vsel %vm625_vm2, %v615_v5, %v616_v30  ;;  %v633_v32 = vsel %vm625_vm2, %v616_v30, %v617_v34  ;;  %v6636_v30 = vld [vmem:[#allocation7 + $0x188] sm:$0xff]  }
 0x1cd   : > { %v1039_v22 = vpack.c.bf16 %v634_v31, %v635_v33  ;;  %v747_v31 = vsel %vm710_vm3, %v672_v4, %v673_v15  ;;  %v935_v33 = vpack.c.bf16 %v7683_v51, %v7679_v47 }
 0x1d2   : > { %1968 = vmatmul.mubr.bf16.gmra.mrb[44].mxu0 %v997_v36  ;;  %v618_v36 = vrot.slane %v7598_v1, 7 }
 0x1d3   : > { %1975 = vmatprep.mubr.bf16.mxu0 %v1011_v56 }
 0x1d4   : > { %v632_v29 = vsel %vm625_vm2, %v617_v34, %v618_v36  ;;  %v631_v55 = vsel %vm625_vm2, %v618_v36, %v619_v37  ;;  %v6637_v34 = vld [vmem:[#allocation7 + $0x190] sm:$0xff]   ;;  %v7871_v36 = vld [vmem:[%s7235_s26 + $0x38] sm:$0xff] }
 0x1d5   : > { %v1046_v35 = vpack.c.bf16 %v632_v29, %v633_v32  ;;  %v675_v29 = vrot.slane %v7871_v36, 1  ;;  %v7875_v32 = vld [vmem:[%s7235_s26 + $0x40] sm:$0xff] }
 0x1da   : > { %1976 = vmatmul.mubr.bf16.gmra.mrb[48].mxu0 %v1004_v27  ;;  %v620_v27 = vrot.slane %v7616_v24, 7 }
 0x1db   : > { %1983 = vmatprep.mubr.bf16.mxu0 %v1018_v48 }
 0x1dc   : > { %v630_v50 = vsel %vm625_vm2, %v619_v37, %v620_v27  ;;  %v629_v54 = vsel %vm625_vm2, %v620_v27, %v621_v45  ;;  %v6638_v37 = vld [vmem:[#allocation7 + $0x198] sm:$0xff]  }
 0x1dd   : > { %v1053_v44 = vpack.c.bf16 %v630_v50, %v631_v55  ;;  %v942_v55 = vpack.c.bf16 %v7703_v18, %v7699_v10 }
 0x1e2   : > { %1984 = vmatmul.mubr.bf16.gmra.mrb[52].mxu0 %v1011_v56  ;;  %v628_v56 = vsel %vm625_vm2, %v621_v45, %v622_v46  ;;  %v6639_v45 = vld [vmem:[#allocation7 + $0x1a0] sm:$0xff]  }
 0x1e3   : > { %1991 = vmatprep.mubr.bf16.mxu0 %v1025_v12  ;;  %v1060_v57 = vpack.c.bf16 %v628_v56, %v629_v54  ;;  %v7889_v56 = vld [vmem:[%s7235_s26 + $0x48] sm:$0xff] }
 0x1e4   : > { %v677_v54 = vrot.slane %v7889_v56, 1 }
 0x1ea   : > { %1992 = vmatmul.mubr.bf16.gmra.mrb[56].mxu0 %v1018_v48  ;;  %v670_v48 = vrot.slane %v7679_v47, 1 }
 0x1eb   : > { %1999 = vmatprep.mubr.bf16.mxu0 %v1032_v16 }
 0x1ec   : > { %v750_v46 = vsel %vm710_vm3, %v669_v61, %v670_v48 }
 0x1ed   : > { %v7841_v62 = vpack.c.bf16 %v750_v46, %v751_v60 }
 0x1f2   : > { %2000 = vmatmul.mubr.bf16.gmra.mrb[60].mxu0 %v1025_v12  ;;  %v749_v12 = vsel %vm710_vm3, %v670_v48, %v671_v38  ;;  %v6640_v48 = vld [vmem:[#allocation7 + $0x1a8] sm:$0xff]  }
 0x1f3   : > { %2007 = vmatprep.mubr.bf16.mxu0 %v1039_v22 }
 0x1fa   : > { %2008 = vmatmul.mubr.bf16.gmra.mrb[64].mxu0 %v1032_v16  ;;  %v7856_v16 = vld [vmem:[%s7235_s26 + $0x30] sm:$0xff] }
 0x1fb   : > { %2015 = vmatprep.mubr.bf16.mxu0 %v1046_v35  ;;  %v674_v5 = vrot.slane %v7856_v16, 1 }
 0x1fd   : > { %v746_v19 = vsel %vm710_vm3, %v673_v15, %v674_v5  ;;  %v745_v50 = vsel %vm710_vm3, %v674_v5, %v675_v29  ;;  %v6642_v5 = vld [vmem:[#allocation7 + $0x1b8] sm:$0xff]  }
 0x202   : > { %2016 = vmatmul.mubr.bf16.gmra.mrb[68].mxu0 %v1039_v22  ;;  %v7867_v22 = vpack.c.bf16 %v746_v19, %v747_v31  ;;  %v956_v31 = vpack.c.bf16 %v7889_v56, %v7875_v32 }
 0x203   : > { %2023 = vmatprep.mubr.bf16.mxu0 %v1053_v44 }
 0x20a   : > { %2024 = vmatmul.mubr.bf16.gmra.mrb[72].mxu0 %v1046_v35  ;;  %v676_v35 = vrot.slane %v7875_v32, 1 }
 0x20b   : > { %2031 = vmatprep.mubr.bf16.mxu0 %v1060_v57 }
 0x20c   : > { %v744_v27 = vsel %vm710_vm3, %v675_v29, %v676_v35  ;;  %v743_v60 = vsel %vm710_vm3, %v676_v35, %v677_v54  ;;  %v7927_v29 = vld [vmem:[%s7235_s26 + $0x68] sm:$0xff] }
 0x20d   : > { %v681_v35 = vrot.slane %v7927_v29, 1 }
 0x212   : > { %2032 = vmatmul.mubr.bf16.gmra.mrb[76].mxu0 %v1053_v44  ;;  %v7886_v44 = vpack.c.bf16 %v744_v27, %v745_v50  ;;  %v6644_v50 = vld [vmem:[#allocation7 + $0x1c8] sm:$0xff]  }
 0x213   : > { %2039 = vmatprep.mubr.bf16.mxu0 %v7696_v3  ;;  %v748_v3 = vsel %vm710_vm3, %v671_v38, %v672_v4  ;;  %v949_v38 = vpack.c.bf16 %v7871_v36, %v7856_v16 }
 0x214   : > { %v7852_v17 = vpack.c.bf16 %v748_v3, %v749_v12  ;;  %v6641_v3 = vld [vmem:[#allocation7 + $0x1b0] sm:$0xff]   ;;  %v7908_v12 = vld [vmem:[%s7235_s26 + $0x58] sm:$0xff] }
 0x21a   : > { %2040 = vmatmul.mubr.bf16.gmra.mrb[80].mxu0 %v1060_v57  ;;  %v7893_v57 = vld [vmem:[%s7235_s26 + $0x50] sm:$0xff] }
 0x21b   : > { %2080 = vmatprep.mubr.bf16.mxu0 %v7841_v62  ;;  %v678_v61 = vrot.slane %v7893_v57, 1 }
 0x21d   : > { %v742_v46 = vsel %vm710_vm3, %v677_v54, %v678_v61  ;;  %v963_v54 = vpack.c.bf16 %v7908_v12, %v7893_v57 }
 0x21e   : > { %v7905_v4 = vpack.c.bf16 %v742_v46, %v743_v60  ;;  %v7946_v46 = vld [vmem:[%s7235_s26 + $0x78] sm:$0xff] }
 0x21f   : > { %v683_v60 = vrot.slane %v7946_v46, 1 }
 0x222   : > { %2081 = vmatmul.mubr.bf16.vlgmr.msra.gmra.mrb[0].mxu0 %v927_v11  ;;  %v679_v11 = vrot.slane %v7908_v12, 1 }
 0x223   : > { %2250 = vmatpush1.bf16.msra.mxu0 %v6635_v14  ;;  %2088 = vmatprep.mubr.bf16.mxu0 %v7852_v17  ;;  %v7912_v14 = vld [vmem:[%s7235_s26 + $0x60] sm:$0xff] }
 0x224   : > { %2251 = vmatprep.subr.bf16.mxu0 %v10232_v0  ;;  %v680_v15 = vrot.slane %v7912_v14, 1  ;;  %v741_v19 = vsel %vm710_vm3, %v678_v61, %v679_v11 }
 0x227   : > { %2252 = vmatpush1.bf16.msra.mxu0 %v6636_v30  ;;  %v740_v30 = vsel %vm710_vm3, %v679_v11, %v680_v15  ;;  %v6646_v11 = vld [vmem:[#allocation7 + $0x1d8] sm:$0xff]  }
 0x228   : > { %2253 = vmatprep.subr.bf16.mxu0 %v10232_v0 }
 0x22a   : > { %2089 = vmatmul.mubr.bf16.gmra.mrb[4].mxu0 %v935_v33  ;;  %v7924_v33 = vpack.c.bf16 %v740_v30, %v741_v19  ;;  %v970_v30 = vpack.c.bf16 %v7927_v29, %v7912_v14 }
 0x22b   : > { %2096 = vmatprep.mubr.bf16.mxu0 %v7867_v22  ;;  %2254 = vmatpush1.bf16.msra.mxu0 %v6637_v34  ;;  %v6643_v34 = vld [vmem:[#allocation7 + $0x1c0] sm:$0xff]  }
 0x22c   : > { %2255 = vmatprep.subr.bf16.mxu0 %v10232_v0 }
 0x22f   : > { %2256 = vmatpush1.bf16.msra.mxu0 %v6638_v37  ;;  %v7931_v37 = vld [vmem:[%s7235_s26 + $0x70] sm:$0xff] }
 0x230   : > { %2257 = vmatprep.subr.bf16.mxu0 %v10232_v0  ;;  %v682_v27 = vrot.slane %v7931_v37, 1 }
 0x232   : > { %2097 = vmatmul.mubr.bf16.gmra.mrb[8].mxu0 %v942_v55  ;;  %v738_v55 = vsel %vm710_vm3, %v681_v35, %v682_v27 }
 0x233   : > { %2104 = vmatprep.mubr.bf16.mxu0 %v7886_v44  ;;  %2258 = vmatpush1.bf16.msra.mxu0 %v6639_v45  ;;  %v739_v45 = vsel %vm710_vm3, %v680_v15, %v681_v35 }
 0x234   : > { %2259 = vmatprep.subr.bf16.mxu0 %v10232_v0  ;;  %v7943_v61 = vpack.c.bf16 %v738_v55, %v739_v45 }
 0x237   : > { %2260 = vmatpush1.bf16.msra.mxu0 %v6640_v48  ;;  %v6645_v48 = vld [vmem:[#allocation7 + $0x1d0] sm:$0xff]  }
 0x238   : > { %2261 = vmatprep.subr.bf16.mxu0 %v10232_v0 }
 0x23a   : > { %2105 = vmatmul.mubr.bf16.gmra.mrb[12].mxu0 %v949_v38  ;;  %v7950_v38 = vld [vmem:[%s7235_s26 + $0x80] sm:$0xff] }
 0x23b   : > { %2112 = vmatprep.mubr.bf16.mxu0 %v7905_v4  ;;  %2262 = vmatpush1.bf16.msra.mxu0 %v6641_v3  ;;  %v684_v3 = vrot.slane %v7950_v38, 1 }
 0x23c   : > { %2263 = vmatprep.subr.bf16.mxu0 %v10232_v0 }
 0x23d   : > { %v736_v15 = vsel %vm710_vm3, %v683_v60, %v684_v3 }
 0x23f   : > { %2264 = vmatpush1.bf16.msra.mxu0 %v6642_v5  ;;  %v737_v5 = vsel %vm710_vm3, %v682_v27, %v683_v60  ;;  %v6648_v27 = vld [vmem:[#allocation7 + $0x1e8] sm:$0xff]  }
 0x240   : > { %2265 = vmatprep.subr.bf16.mxu0 %v10232_v0  ;;  %v7962_v19 = vpack.c.bf16 %v736_v15, %v737_v5  ;;  %v7984_v15 = vld [vmem:[%s7235_s26 + $0x98] sm:$0xff] }
 0x241   : > { %v687_v5 = vrot.slane %v7984_v15, 1 }
 0x242   : > { %2113 = vmatmul.mubr.bf16.gmra.mrb[16].mxu0 %v956_v31  ;;  %v6647_v31 = vld [vmem:[#allocation7 + $0x1e0] sm:$0xff]  }
 0x243   : > { %2120 = vmatprep.mubr.bf16.mxu0 %v7924_v33  ;;  %2266 = vmatpush1.bf16.msra.mxu0 %v6643_v34  ;;  %v7965_v34 = vld [vmem:[%s7235_s26 + $0x88] sm:$0xff] }
 0x244   : > { %2267 = vmatprep.subr.bf16.mxu0 %v10232_v0  ;;  %v685_v35 = vrot.slane %v7965_v34, 1 }
 0x247   : > { %2268 = vmatpush1.bf16.msra.mxu0 %v6644_v50  ;;  %v7969_v50 = vld [vmem:[%s7235_s26 + $0x90] sm:$0xff] }
 0x248   : > { %2269 = vmatprep.subr.bf16.mxu0 %v10232_v0  ;;  %v686_v55 = vrot.slane %v7969_v50, 1 }
 0x24a   : > { %2121 = vmatmul.mubr.bf16.gmra.mrb[20].mxu0 %v963_v54  ;;  %v734_v45 = vsel %vm710_vm3, %v685_v35, %v686_v55  ;;  %v735_v54 = vsel %vm710_vm3, %v684_v3, %v685_v35  ;;  %v6650_v3 = vld [vmem:[#allocation7 + $0x1f8] sm:$0xff]   ;;  %v733_v35 = vsel %vm710_vm3, %v686_v55, %v687_v5 }
 0x24b   : > { %2128 = vmatprep.mubr.bf16.mxu0 %v7943_v61  ;;  %2270 = vmatpush1.bf16.msra.mxu0 %v6645_v48  ;;  %v977_v48 = vpack.c.bf16 %v7946_v46, %v7931_v37  ;;  %v7981_v60 = vpack.c.bf16 %v734_v45, %v735_v54  ;;  %v689_v54 = vrot.slane %v7468_v53, 1 }
 0x24c   : > { %2271 = vmatprep.subr.bf16.mxu0 %v10232_v0 }
 0x24f   : > { %2272 = vmatpush1.bf16.msra.mxu0 %v6646_v11  ;;  %v6649_v11 = vld [vmem:[#allocation7 + $0x1f0] sm:$0xff]  }
 0x250   : > { %2273 = vmatprep.subr.bf16.mxu0 %v10232_v0 }
 0x252   : > { %2129 = vmatmul.mubr.bf16.gmra.mrb[24].mxu0 %v970_v30  ;;  %v688_v30 = vrot.slane %v7465_v52, 1 }
 0x253   : > { %2136 = vmatprep.mubr.bf16.mxu0 %v7962_v19  ;;  %2274 = vmatpush1.bf16.msra.mxu0 %v6647_v31 }
 0x254   : > { %2275 = vmatprep.subr.bf16.mxu0 %v10232_v0  ;;  %v732_v31 = vsel %vm710_vm3, %v687_v5, %v688_v30  ;;  %v731_v5 = vsel %vm710_vm3, %v688_v30, %v689_v54  ;;  %v998_v30 = vpack.c.bf16 %v7468_v53, %v7465_v52  ;;  %v695_v52 = vrot.slane %v7526_v43, 1 }
 0x255   : > { %v7997_v45 = vpack.c.bf16 %v732_v31, %v733_v35  ;;  %v991_v31 = vpack.c.bf16 %v7984_v15, %v7969_v50  ;;  %v691_v35 = vrot.slane %v7490_v9, 1  ;;  %v696_v53 = vrot.slane %v7541_v59, 1 }
 0x257   : > { %2276 = vmatpush1.bf16.msra.mxu0 %v6648_v27  ;;  %v984_v27 = vpack.c.bf16 %v7965_v34, %v7950_v38 }
 0x258   : > { %2277 = vmatprep.subr.bf16.mxu0 %v10232_v0 }
 0x25a   : > { %2137 = vmatmul.mubr.bf16.gmra.mrb[28].mxu0 %v977_v48  ;;  %v690_v48 = vrot.slane %v7487_v7, 1 }
 0x25b   : > { %2144 = vmatprep.mubr.bf16.mxu0 %v7981_v60  ;;  %2278 = vmatpush1.bf16.msra.mxu0 %v6649_v11  ;;  %v10234_v11 = vmov 0.0  }
 0x25c   : > { %2279 = vmatprep.subr.bf16.mxu0 %v10232_v0  ;;  %v730_v55 = vsel %vm710_vm3, %v689_v54, %v690_v48  ;;  %v692_v0 = vrot.slane %v7505_v25, 1 }
 0x25f   : > { %2280 = vmatpush1.bf16.msra.mxu0 %v6650_v3  ;;  %v8009_v3 = vpack.c.bf16 %v730_v55, %v731_v5  ;;  %v693_v55 = vrot.slane %v7508_v26, 1  ;;  %v694_v5 = vrot.slane %v7523_v42, 1 }
 0x260   : > { %5625 = vmatprep.subr.bf16.mxu0 %v10234_v11  ;;  %v729_v11 = vsel %vm710_vm3, %v690_v48, %v691_v35  ;;  %v1005_v48 = vpack.c.bf16 %v7490_v9, %v7487_v7  ;;  %v697_v7 = vrot.slane %v7544_v63, 1  ;;  %v698_v9 = vrot.slane %v7559_v20, 1 }
 0x261   : > { %v727_v2 = vsel %vm710_vm3, %v692_v0, %v693_v55 }
 0x262   : > { %2145 = vmatmul.mubr.bf16.gmra.mrb[32].mxu0 %v984_v27  ;;  %v728_v27 = vsel %vm710_vm3, %v691_v35, %v692_v0  ;;  %v1012_v0 = vpack.c.bf16 %v7508_v26, %v7505_v25  ;;  %v699_v25 = vrot.slane %v7562_v21, 1  ;;  %v700_v26 = vrot.slane %v7577_v39, 1 }
 0x263   : > { %2152 = vmatprep.mubr.bf16.mxu0 %v7997_v45  ;;  %v8020_v54 = vpack.c.bf16 %v728_v27, %v729_v11  ;;  %v724_v11 = vsel %vm710_vm3, %v695_v52, %v696_v53  ;;  %v725_v27 = vsel %vm710_vm3, %v694_v5, %v695_v52 }
 0x264   : > { %v721_v52 = vsel %vm710_vm3, %v698_v9, %v699_v25 }
 0x26a   : > { %2153 = vmatmul.mubr.bf16.gmra.mrb[36].mxu0 %v991_v31  ;;  %v726_v31 = vsel %vm710_vm3, %v693_v55, %v694_v5  ;;  %v723_v55 = vsel %vm710_vm3, %v696_v53, %v697_v7  ;;  %v1019_v5 = vpack.c.bf16 %v7526_v43, %v7523_v42  ;;  %v1026_v53 = vpack.c.bf16 %v7544_v63, %v7541_v59 }
 0x26b   : > { %2160 = vmatprep.mubr.bf16.mxu0 %v8009_v3  ;;  %v8031_v35 = vpack.c.bf16 %v726_v31, %v727_v2  ;;  %v722_v2 = vsel %vm710_vm3, %v697_v7, %v698_v9  ;;  %v701_v42 = vrot.slane %v7580_v40, 1  ;;  %v702_v43 = vrot.slane %v7595_v58, 1 }
 0x26c   : > { %v8053_v31 = vpack.c.bf16 %v722_v2, %v723_v55  ;;  %v1033_v7 = vpack.c.bf16 %v7562_v21, %v7559_v20  ;;  %v703_v59 = vrot.slane %v7598_v1, 1  ;;  %v704_v63 = vrot.slane %v7613_v23, 1 }
 0x26d   : > { %v705_v20 = vrot.slane %v7616_v24, 1  ;;  %v706_v21 = vrot.slane %v7631_v49, 1 }
 0x26e   : > { %v716_v2 = vsel %vm710_vm3, %v703_v59, %v704_v63  ;;  %v717_v55 = vsel %vm710_vm3, %v702_v43, %v703_v59 }
 0x272   : > { %2161 = vmatmul.mubr.bf16.gmra.mrb[40].mxu0 %v998_v30  ;;  %v8042_v30 = vpack.c.bf16 %v724_v11, %v725_v27  ;;  %v718_v27 = vsel %vm710_vm3, %v701_v42, %v702_v43 }
 0x273   : > { %2168 = vmatprep.mubr.bf16.mxu0 %v8020_v54 }
 0x27a   : > { %2169 = vmatmul.mubr.bf16.gmra.mrb[44].mxu0 %v1005_v48  ;;  %v720_v48 = vsel %vm710_vm3, %v699_v25, %v700_v26  ;;  %v8086_v25 = vpack.c.bf16 %v716_v2, %v717_v55  ;;  %v757_v55 = vrot.slane %v7699_v10, 2  ;;  %v759_v10 = vrot.slane %v7856_v16, 2 }
 0x27b   : > { %2176 = vmatprep.mubr.bf16.mxu0 %v8031_v35  ;;  %v8064_v11 = vpack.c.bf16 %v720_v48, %v721_v52  ;;  %v715_v48 = vsel %vm710_vm3, %v704_v63, %v705_v20  ;;  %v1047_v52 = vpack.c.bf16 %v7598_v1, %v7595_v58  ;;  %v709_v58 = vrot.slane %v7656_v28, 1 }
 0x27c   : > { %v1061_v63 = vpack.c.bf16 %v7671_v41, %v7631_v49 }
 0x282   : > { %2177 = vmatmul.mubr.bf16.gmra.mrb[48].mxu0 %v1012_v0  ;;  %v719_v0 = vsel %vm710_vm3, %v700_v26, %v701_v42  ;;  %v714_v26 = vsel %vm710_vm3, %v705_v20, %v706_v21 }
 0x283   : > { %2184 = vmatprep.mubr.bf16.mxu0 %v8042_v30  ;;  %v8075_v9 = vpack.c.bf16 %v718_v27, %v719_v0  ;;  %v1054_v27 = vpack.c.bf16 %v7616_v24, %v7613_v23  ;;  %v755_v23 = vrot.slane %v7679_v47, 2  ;;  %v756_v24 = vrot.slane %v7683_v51, 2 }
 0x284   : > { %v758_v51 = vrot.slane %v7703_v18, 2 }
 0x285   : > { %v834_v49 = vsel %vm795_vm4, %v755_v23, %v756_v24 }
 0x286   : > { %v831_v20 = vsel %vm795_vm4, %v758_v51, %v759_v10 }
 0x28a   : > { %2185 = vmatmul.mubr.bf16.gmra.mrb[52].mxu0 %v1019_v5  ;;  %v1040_v5 = vpack.c.bf16 %v7580_v40, %v7577_v39  ;;  %v707_v39 = vrot.slane %v7671_v41, 1  ;;  %v708_v40 = vrot.slane %v7675_v8, 1  ;;  %v1067_v41 = vpack.c.bf16 %v7656_v28, %v7675_v8  ;;  %v6652_v28 = vld [vmem:[#allocation7 + $0x208] sm:$0xff]  }
 0x28b   : > { %2192 = vmatprep.mubr.bf16.mxu0 %v8053_v31 }
 0x28c   : > { %v712_v42 = vsel %vm710_vm3, %v707_v39, %v708_v40  ;;  %v713_v43 = vsel %vm710_vm3, %v706_v21, %v707_v39  ;;  %v711_v1 = vsel %vm710_vm3, %v708_v40, %v709_v58  ;;  %v832_v21 = vsel %vm795_vm4, %v757_v55, %v758_v51 }
 0x28d   : > { %v8108_v0 = vpack.c.bf16 %v712_v42, %v713_v43  ;;  %v761_v39 = vrot.slane %v7875_v32, 2  ;;  %v10316_v40 = vmov 0.0   ;;  %v6653_v43 = vld [vmem:[#allocation7 + $0x210] sm:$0xff]   ;;  %v766_v51 = vrot.slane %v7927_v29, 2 }
 0x292   : > { %2193 = vmatmul.mubr.bf16.gmra.mrb[56].mxu0 %v1026_v53  ;;  %v8097_v53 = vpack.c.bf16 %v714_v26, %v715_v48  ;;  %v6651_v26 = vld [vmem:[#allocation7 + $0x200] sm:$0xff]   ;;  %v937_v48 = vpack.c.bf16 %v831_v20, %v832_v21 }
 0x293   : > { %2200 = vmatprep.mubr.bf16.mxu0 %v8064_v11 }
 0x29a   : > { %2201 = vmatmul.mubr.bf16.gmra.mrb[60].mxu0 %v1033_v7  ;;  %v10315_v7 = vrot.slane %v7648_v13, 1  ;;  %v833_v13 = vsel %vm795_vm4, %v756_v24, %v757_v55  ;;  %v764_v24 = vrot.slane %v7908_v12, 2  ;;  %v765_v55 = vrot.slane %v7912_v14, 2 }
 0x29b   : > { %2208 = vmatprep.mubr.bf16.mxu0 %v8075_v9 }
 0x29c   : > { %v752_v59 = vsel %vm710_vm3, %v709_v58, %v10315_v7  ;;  %v763_v58 = vrot.slane %v7893_v57, 2  ;;  %v824_v21 = vsel %vm795_vm4, %v765_v55, %v766_v51 }
 0x29d   : > { %v8120_v2 = vpack.c.bf16 %v752_v59, %v711_v1 }
 0x2a2   : > { %2209 = vmatmul.mubr.bf16.gmra.mrb[64].mxu0 %v1040_v5  ;;  %v930_v5 = vpack.c.bf16 %v833_v13, %v834_v49  ;;  %v825_v13 = vsel %vm795_vm4, %v764_v24, %v765_v55  ;;  %v826_v49 = vsel %vm795_vm4, %v763_v58, %v764_v24  ;;  %v8205_v24 = vld [vmem:[%s7235_s26 + $0xb0] sm:$0xff] }
 0x2a3   : > { %2216 = vmatprep.mubr.bf16.mxu0 %v8086_v25  ;;  %v775_v55 = vrot.slane %v8205_v24, 2 }
 0x2aa   : > { %2217 = vmatmul.mubr.bf16.gmra.mrb[68].mxu0 %v1047_v52  ;;  %v760_v52 = vrot.slane %v7871_v36, 2 }
 0x2ab   : > { %2224 = vmatprep.mubr.bf16.mxu0 %v8097_v53 }
 0x2ac   : > { %v829_v8 = vsel %vm795_vm4, %v760_v52, %v761_v39  ;;  %v830_v18 = vsel %vm795_vm4, %v759_v10, %v760_v52  ;;  %v767_v10 = vrot.slane %v7931_v37, 2  ;;  %v769_v52 = vrot.slane %v7950_v38, 2 }
 0x2ad   : > { %v944_v42 = vpack.c.bf16 %v829_v8, %v830_v18  ;;  %v770_v8 = vrot.slane %v7965_v34, 2  ;;  %v771_v18 = vrot.slane %v7969_v50, 2 }
 0x2ae   : > { %v823_v20 = vsel %vm795_vm4, %v766_v51, %v767_v10 }
 0x2b2   : > { %2225 = vmatmul.mubr.bf16.gmra.mrb[72].mxu0 %v1054_v27  ;;  %v762_v27 = vrot.slane %v7889_v56, 2 }
 0x2b3   : > { %2232 = vmatprep.mubr.bf16.mxu0 %v8108_v0 }
 0x2b4   : > { %v827_v1 = vsel %vm795_vm4, %v762_v27, %v763_v58  ;;  %v828_v7 = vsel %vm795_vm4, %v761_v39, %v762_v27  ;;  %v772_v27 = vrot.slane %v7984_v15, 2  ;;  %v8192_v58 = vld [vmem:[%s7235_s26 + $0xa0] sm:$0xff] }
 0x2b5   : > { %v951_v59 = vpack.c.bf16 %v827_v1, %v828_v7 }
 0x2b6   : > { %v818_v1 = vsel %vm795_vm4, %v771_v18, %v772_v27 }
 0x2ba   : > { %2233 = vmatmul.mubr.bf16.gmra.mrb[76].mxu0 %v1061_v63  ;;  %v6655_v63 = vld [vmem:[#allocation7 + $0x220] sm:$0xff]  }
 0x2bb   : > { %2240 = vmatprep.mubr.bf16.mxu0 %v8120_v2 }
 0x2c2   : > { %2241 = vmatmul.mubr.bf16.gmra.mrb[80].mxu0 %v1067_v41  ;;  %v958_v41 = vpack.c.bf16 %v825_v13, %v826_v49  ;;  %v8214_v49 = vld [vmem:[%s7235_s26 + $0xb8] sm:$0xff] }
 0x2c3   : > { %2281 = vmatprep.mubr.bf16.mxu0 %v930_v5  ;;  %v6657_v5 = vld [vmem:[#allocation7 + $0x230] sm:$0xff]  }
 0x2ca   : > { %2282 = vmatmul.mubr.bf16.vlgmr.msra.gmra.mrb[0].mxu0 %v7852_v17  ;;  %v6654_v17 = vld [vmem:[#allocation7 + $0x218] sm:$0xff]  }
 0x2cb   : > { %5626 = vmatpush3.bf16.msra.mxu0 %v6651_v26  ;;  %2289 = vmatprep.mubr.bf16.mxu0 %v937_v48  ;;  %v965_v26 = vpack.c.bf16 %v823_v20, %v824_v21  ;;  %v768_v48 = vrot.slane %v7946_v46, 2  ;;  %v8227_v20 = vld [vmem:[%s7235_s26 + $0xc8] sm:$0xff] }
 0x2cc   : > { %5627 = vmatprep.subr.bf16.mxu0 %v10316_v40  ;;  %v778_v21 = vrot.slane %v8227_v20, 2 }
 0x2cd   : > { %v822_v39 = vsel %vm795_vm4, %v767_v10, %v768_v48 }
 0x2cf   : > { %5628 = vmatpush3.bf16.msra.mxu0 %v6652_v28 }
 0x2d0   : > { %5629 = vmatprep.subr.bf16.mxu0 %v10316_v40 }
 0x2d2   : > { %2290 = vmatmul.mubr.bf16.gmra.mrb[4].mxu0 %v7867_v22  ;;  %v6656_v22 = vld [vmem:[#allocation7 + $0x228] sm:$0xff]  }
 0x2d3   : > { %2297 = vmatprep.mubr.bf16.mxu0 %v944_v42  ;;  %5630 = vmatpush3.bf16.msra.mxu0 %v6653_v43  ;;  %v820_v42 = vsel %vm795_vm4, %v769_v52, %v770_v8 }
 0x2d4   : > { %5631 = vmatprep.subr.bf16.mxu0 %v10316_v40 }
 0x2d7   : > { %5632 = vmatpush3.bf16.msra.mxu0 %v6654_v17  ;;  %v773_v17 = vrot.slane %v8192_v58, 2 }
 0x2d8   : > { %5633 = vmatprep.subr.bf16.mxu0 %v10316_v40 }
 0x2da   : > { %2298 = vmatmul.mubr.bf16.gmra.mrb[8].mxu0 %v7886_v44  ;;  %v6658_v44 = vld [vmem:[#allocation7 + $0x238] sm:$0xff]  }
 0x2db   : > { %2305 = vmatprep.mubr.bf16.mxu0 %v951_v59  ;;  %5634 = vmatpush3.bf16.msra.mxu0 %v6655_v63  ;;  %v8201_v59 = vld [vmem:[%s7235_s26 + $0xa8] sm:$0xff] }
 0x2dc   : > { %5635 = vmatprep.subr.bf16.mxu0 %v10316_v40  ;;  %v774_v63 = vrot.slane %v8201_v59, 2 }
 0x2df   : > { %5636 = vmatpush3.bf16.msra.mxu0 %v6656_v22  ;;  %v816_v22 = vsel %vm795_vm4, %v773_v17, %v774_v63 }
 0x2e0   : > { %5637 = vmatprep.subr.bf16.mxu0 %v10316_v40 }
 0x2e2   : > { %2306 = vmatmul.mubr.bf16.gmra.mrb[12].mxu0 %v7905_v4  ;;  %v821_v4 = vsel %vm795_vm4, %v768_v48, %v769_v52 }
 0x2e3   : > { %2313 = vmatprep.mubr.bf16.mxu0 %v958_v41  ;;  %5638 = vmatpush3.bf16.msra.mxu0 %v6657_v5  ;;  %v972_v28 = vpack.c.bf16 %v821_v4, %v822_v39  ;;  %v776_v41 = vrot.slane %v8214_v49, 2  ;;  %v8218_v5 = vld [vmem:[%s7235_s26 + $0xc0] sm:$0xff]  ;;  %v8240_v39 = vld [vmem:[%s7235_s26 + $0xd8] sm:$0xff] }
 0x2e4   : > { %5639 = vmatprep.subr.bf16.mxu0 %v10316_v40  ;;  %v777_v51 = vrot.slane %v8218_v5, 2 }
 0x2e5   : > { %v814_v10 = vsel %vm795_vm4, %v775_v55, %v776_v41 }
 0x2e6   : > { %v812_v52 = vsel %vm795_vm4, %v777_v51, %v778_v21 }
 0x2e7   : > { %5640 = vmatpush3.bf16.msra.mxu0 %v6658_v44 }
 0x2ea   : > { %2314 = vmatmul.mubr.bf16.gmra.mrb[16].mxu0 %v7924_v33  ;;  %v819_v33 = vsel %vm795_vm4, %v770_v8, %v771_v18  ;;  %v8244_v8 = vld [vmem:[%s7235_s26 + $0xe0] sm:$0xff] }
 0x2eb   : > { %2321 = vmatprep.mubr.bf16.mxu0 %v965_v26  ;;  %v979_v43 = vpack.c.bf16 %v819_v33, %v820_v42  ;;  %v8231_v26 = vld [vmem:[%s7235_s26 + $0xd0] sm:$0xff]  ;;  %v781_v18 = vrot.slane %v8244_v8, 2 }
 0x2ec   : > { %v779_v48 = vrot.slane %v8231_v26, 2 }
 0x2f2   : > { %2322 = vmatmul.mubr.bf16.gmra.mrb[20].mxu0 %v7943_v61  ;;  %v817_v61 = vsel %vm795_vm4, %v772_v27, %v773_v17  ;;  %v8257_v17 = vld [vmem:[%s7235_s26 + $0xf0] sm:$0xff] }
 0x2f3   : > { %2329 = vmatprep.mubr.bf16.mxu0 %v972_v28  ;;  %v986_v7 = vpack.c.bf16 %v817_v61, %v818_v1  ;;  %v780_v28 = vrot.slane %v8240_v39, 2  ;;  %v783_v61 = vrot.slane %v8257_v17, 2 }
 0x2f5   : > { %v810_v33 = vsel %vm795_vm4, %v779_v48, %v780_v28 }
 0x2fa   : > { %2330 = vmatmul.mubr.bf16.gmra.mrb[24].mxu0 %v7962_v19  ;;  %v815_v19 = vsel %vm795_vm4, %v774_v63, %v775_v55  ;;  %v8266_v63 = vld [vmem:[%s7235_s26 + $0xf8] sm:$0xff] }
 0x2fb   : > { %2337 = vmatprep.mubr.bf16.mxu0 %v979_v43  ;;  %v993_v13 = vpack.c.bf16 %v815_v19, %v816_v22  ;;  %v8253_v43 = vld [vmem:[%s7235_s26 + $0xe8] sm:$0xff]  ;;  %v784_v55 = vrot.slane %v8266_v63, 2  ;;  %v8270_v19 = vld [vmem:[%s7235_s26 + $0x100] sm:$0xff] }
 0x2fc   : > { %v782_v27 = vrot.slane %v8253_v43, 2  ;;  %v785_v22 = vrot.slane %v8270_v19, 2 }
 0x2fe   : > { %v808_v1 = vsel %vm795_vm4, %v781_v18, %v782_v27 }
 0x302   : > { %2338 = vmatmul.mubr.bf16.gmra.mrb[28].mxu0 %v7981_v60  ;;  %v813_v60 = vsel %vm795_vm4, %v776_v41, %v777_v51  ;;  %v8279_v51 = vld [vmem:[%s7235_s26 + $0x108] sm:$0xff] }
 0x303   : > { %2345 = vmatprep.mubr.bf16.mxu0 %v986_v7  ;;  %v1000_v44 = vpack.c.bf16 %v813_v60, %v814_v10  ;;  %v786_v60 = vrot.slane %v8279_v51, 2  ;;  %v8283_v10 = vld [vmem:[%s7235_s26 + $0x110] sm:$0xff] }
 0x30a   : > { %2346 = vmatmul.mubr.bf16.gmra.mrb[32].mxu0 %v7997_v45  ;;  %v811_v45 = vsel %vm795_vm4, %v778_v21, %v779_v48  ;;  %v804_v21 = vsel %vm795_vm4, %v785_v22, %v786_v60 }
 0x30b   : > { %2353 = vmatprep.mubr.bf16.mxu0 %v993_v13  ;;  %v1007_v4 = vpack.c.bf16 %v811_v45, %v812_v52  ;;  %v806_v13 = vsel %vm795_vm4, %v783_v61, %v784_v55  ;;  %v8292_v45 = vld [vmem:[%s7235_s26 + $0x118] sm:$0xff] }
 0x30c   : > { %v788_v52 = vrot.slane %v8292_v45, 2 }
 0x312   : > { %2354 = vmatmul.mubr.bf16.gmra.mrb[36].mxu0 %v8009_v3  ;;  %v809_v3 = vsel %vm795_vm4, %v780_v28, %v781_v18 }
 0x313   : > { %2361 = vmatprep.mubr.bf16.mxu0 %v1000_v44  ;;  %v1014_v42 = vpack.c.bf16 %v809_v3, %v810_v33  ;;  %v787_v44 = vrot.slane %v8283_v10, 2  ;;  %v8305_v33 = vld [vmem:[%s7235_s26 + $0x128] sm:$0xff] }
 0x315   : > { %v802_v18 = vsel %vm795_vm4, %v787_v44, %v788_v52 }
 0x31a   : > { %2362 = vmatmul.mubr.bf16.gmra.mrb[40].mxu0 %v8020_v54  ;;  %v807_v54 = vsel %vm795_vm4, %v782_v27, %v783_v61  ;;  %v8309_v27 = vld [vmem:[%s7235_s26 + $0x130] sm:$0xff] }
 0x31b   : > { %2369 = vmatprep.mubr.bf16.mxu0 %v1007_v4  ;;  %v1021_v7 = vpack.c.bf16 %v807_v54, %v808_v1  ;;  %v8296_v4 = vld [vmem:[%s7235_s26 + $0x120] sm:$0xff]  ;;  %v791_v61 = vrot.slane %v8309_v27, 2 }
 0x31c   : > { %v789_v28 = vrot.slane %v8296_v4, 2 }
 0x322   : > { %2370 = vmatmul.mubr.bf16.gmra.mrb[44].mxu0 %v8031_v35  ;;  %v805_v35 = vsel %vm795_vm4, %v784_v55, %v785_v22  ;;  %v8322_v22 = vld [vmem:[%s7235_s26 + $0x140] sm:$0xff] }
 0x323   : > { %2377 = vmatprep.mubr.bf16.mxu0 %v1014_v42  ;;  %v1028_v41 = vpack.c.bf16 %v805_v35, %v806_v13  ;;  %v790_v42 = vrot.slane %v8305_v33, 2  ;;  %v793_v35 = vrot.slane %v8322_v22, 2 }
 0x325   : > { %v800_v54 = vsel %vm795_vm4, %v789_v28, %v790_v42 }
 0x32a   : > { %2378 = vmatmul.mubr.bf16.gmra.mrb[48].mxu0 %v8042_v30  ;;  %v803_v30 = vsel %vm795_vm4, %v786_v60, %v787_v44  ;;  %v8331_v60 = vld [vmem:[%s7235_s26] sm:$0xff] }
 0x32b   : > { %2385 = vmatprep.mubr.bf16.mxu0 %v1021_v7  ;;  %v1035_v48 = vpack.c.bf16 %v803_v30, %v804_v21  ;;  %v8318_v7 = vld [vmem:[%s7235_s26 + $0x138] sm:$0xff]  ;;  %v753_v44 = vrot.slane %v8331_v60, 2  ;;  %v8335_v30 = vld [vmem:[%s7235_s26 + $0x148] sm:$0xff] }
 0x32c   : > { %v792_v55 = vrot.slane %v8318_v7, 2  ;;  %v794_v21 = vrot.slane %v8335_v30, 2 }
 0x32e   : > { %v798_v13 = vsel %vm795_vm4, %v791_v61, %v792_v55 }
 0x332   : > { %2386 = vmatmul.mubr.bf16.gmra.mrb[52].mxu0 %v8053_v31  ;;  %v801_v31 = vsel %vm795_vm4, %v788_v52, %v789_v28  ;;  %v8344_v28 = vld [vmem:[%s7235_s26 + $0x8] sm:$0xff] }
 0x333   : > { %2393 = vmatprep.mubr.bf16.mxu0 %v1028_v41  ;;  %v1042_v3 = vpack.c.bf16 %v801_v31, %v802_v18  ;;  %v754_v31 = vrot.slane %v8344_v28, 2 }
 0x335   : > { %v836_v18 = vsel %vm795_vm4, %v753_v44, %v754_v31 }
 0x33a   : > { %2394 = vmatmul.mubr.bf16.gmra.mrb[56].mxu0 %v8064_v11  ;;  %v799_v11 = vsel %vm795_vm4, %v790_v42, %v791_v61  ;;  %v8356_v42 = vld [vmem:[%s7235_s26 + $0x10] sm:$0xff] }
 0x33b   : > { %2401 = vmatprep.mubr.bf16.mxu0 %v1035_v48  ;;  %v1049_v1 = vpack.c.bf16 %v799_v11, %v800_v54  ;;  %v837_v48 = vsel %vm795_vm4, %v794_v21, %v753_v44  ;;  %v840_v61 = vrot.slane %v8356_v42, 3  ;;  %v6779_v11 = vld [vmem:[%s7235_s26 + $0x18] sm:$0xff]  ;;  %v6780_v54 = vld [vmem:[%s7235_s26 + $0x20] sm:$0xff]  ;;  %v845_v44 = vrot.slane %v7871_v36, 3 }
 0x33c   : > { %v6662_v42 = vld [vmem:[#allocation8 + $0x18] sm:$0xff]  }
 0x342   : > { %2402 = vmatmul.mubr.bf16.gmra.mrb[60].mxu0 %v8075_v9  ;;  %v797_v9 = vsel %vm795_vm4, %v792_v55, %v793_v35  ;;  %v6781_v55 = vld [vmem:[%s7235_s26 + $0x28] sm:$0xff]  ;;  %s5303_s26 = sshll.u32 %s10041_s21, 4  ;;  %s10171_s26 = int_to_ptr.vmem [resolvable:$true] %s5303_s26 }
 0x343   : > { %2409 = vmatprep.mubr.bf16.mxu0 %v1042_v3  ;;  %v1056_v41 = vpack.c.bf16 %v797_v9, %v798_v13  ;;  %v844_v9 = vrot.slane %v7856_v16, 3  ;;  %s6898_s15 = scalar_lea.vmem %s10171_s26, 5376  ;;  %p6905_p12 = scmp.lt.s32.totalorder %s10171_s26, %s6903_s19 }
 0x344   : > { %p6899_p10 = scmp.ne.s32.totalorder %s10171_s26, %s6898_s15  ;;  %p6906_p1 = scmp.lt.s32.totalorder %s6904_s20, %s6898_s15 }
 0x346   : > { %p6900_p3 = pnand %p6899_p10, %p7178_p5  ;;  %p6907_p2 = por %p6906_p1, %p6905_p12 }
 0x348   : > { %p6901_p11 = pneg %p6900_p3 }
 0x34a   : > { %2410 = vmatmul.mubr.bf16.gmra.mrb[64].mxu0 %v8086_v25  ;;  %v796_v25 = vsel %vm795_vm4, %v793_v35, %v794_v21  ;;  %v843_v35 = vrot.slane %v6781_v55, 3  ;;  %v846_v21 = vrot.slane %v7875_v32, 3  ;;  %v855_v55 = vrot.slane %v7965_v34, 3  ;;  %p6908_p4 = pnand %p6907_p2, %p6901_p11 }
 0x34b   : > { %2417 = vmatprep.mubr.bf16.mxu0 %v1049_v1  ;;  %v1063_v52 = vpack.c.bf16 %v837_v48, %v796_v25  ;;  %v842_v1 = vrot.slane %v6780_v54, 3  ;;  %v915_v25 = vsel %vm880_vm5, %v844_v9, %v845_v44  ;;  %v852_v54 = vrot.slane %v7931_v37, 3 }
 0x34c   : > { %v914_v16 = vsel %vm880_vm5, %v845_v44, %v846_v21  ;;  %v859_v44 = vrot.slane %v8201_v59, 3 }
 0x34d   : > { %v917_v13 = vsel %vm880_vm5, %v842_v1, %v843_v35  ;;  %v945_v48 = vpack.c.bf16 %v914_v16, %v915_v25  ;;  %v861_v25 = vrot.slane %v8214_v49, 3 }
 0x352   : > { %2418 = vmatmul.mubr.bf16.gmra.mrb[68].mxu0 %v8097_v53  ;;  %v835_v53 = vsel %vm795_vm4, %v754_v31, %v755_v23  ;;  %v848_v31 = vrot.slane %v7893_v57, 3 }
 0x353   : > { %2425 = vmatprep.mubr.bf16.mxu0 %v1056_v41  ;;  %v1068_v3 = vpack.c.bf16 %v835_v53, %v836_v18  ;;  %v849_v18 = vrot.slane %v7908_v12, 3 }
 0x355   : > { %v911_v57 = vsel %vm880_vm5, %v848_v31, %v849_v18 }
 0x35a   : > { %2426 = vmatmul.mubr.bf16.gmra.mrb[72].mxu0 %v8108_v0  ;;  %v841_v0 = vrot.slane %v6779_v11, 3 }
 0x35b   : > { %2433 = vmatprep.mubr.bf16.mxu0 %v1063_v52  ;;  %v847_v52 = vrot.slane %v7889_v56, 3 }
 0x35c   : > { %v918_v47 = vsel %vm880_vm5, %v841_v0, %v842_v1 }
 0x35d   : > { %v912_v36 = vsel %vm880_vm5, %v847_v52, %v848_v31  ;;  %v913_v32 = vsel %vm880_vm5, %v846_v21, %v847_v52  ;;  %v860_v21 = vrot.slane %v8205_v24, 3  ;;  %v863_v31 = vrot.slane %v8227_v20, 3 }
 0x35e   : > { %v952_v53 = vpack.c.bf16 %v912_v36, %v913_v32  ;;  %v864_v36 = vrot.slane %v8231_v26, 3 }
 0x35f   : > { %v899_v24 = vsel %vm880_vm5, %v860_v21, %v861_v25 }
 0x360   : > { %v896_v49 = vsel %vm880_vm5, %v863_v31, %v864_v36 }
 0x362   : > { %2434 = vmatmul.mubr.bf16.gmra.mrb[76].mxu0 %v8120_v2  ;;  %v919_v2 = vsel %vm880_vm5, %v840_v61, %v841_v0  ;;  %v851_v0 = vrot.slane %v7927_v29, 3 }
 0x363   : > { %2441 = vmatprep.mubr.bf16.mxu0 %v1068_v3  ;;  %v931_v23 = vpack.c.bf16 %v918_v47, %v919_v2  ;;  %v850_v3 = vrot.slane %v7912_v14, 3  ;;  %v853_v47 = vrot.slane %v7946_v46, 3  ;;  %v854_v2 = vrot.slane %v7950_v38, 3 }
 0x364   : > { %v908_v12 = vsel %vm880_vm5, %v851_v0, %v852_v54 }
 0x365   : > { %v910_v56 = vsel %vm880_vm5, %v849_v18, %v850_v3  ;;  %v909_v14 = vsel %vm880_vm5, %v850_v3, %v851_v0  ;;  %v906_v29 = vsel %vm880_vm5, %v853_v47, %v854_v2  ;;  %v907_v37 = vsel %vm880_vm5, %v852_v54, %v853_v47 }
 0x366   : > { %v959_v11 = vpack.c.bf16 %v910_v56, %v911_v57  ;;  %v966_v1 = vpack.c.bf16 %v908_v12, %v909_v14  ;;  %v905_v38 = vsel %vm880_vm5, %v854_v2, %v855_v55  ;;  %v866_v18 = vrot.slane %v8244_v8, 3 }
 0x367   : > { %v867_v56 = vrot.slane %v8253_v43, 3  ;;  %v868_v57 = vrot.slane %v8257_v17, 3  ;;  %v869_v0 = vrot.slane %v8266_v63, 3  ;;  %v870_v54 = vrot.slane %v8270_v19, 3 }
 0x368   : > { %v871_v14 = vrot.slane %v8279_v51, 3  ;;  %v873_v2 = vrot.slane %v8292_v45, 3 }
 0x369   : > { %v893_v8 = vsel %vm880_vm5, %v866_v18, %v867_v56  ;;  %v890_v43 = vsel %vm880_vm5, %v869_v0, %v870_v54  ;;  %v891_v17 = vsel %vm880_vm5, %v868_v57, %v869_v0  ;;  %v6670_v0 = vld [vmem:[#allocation8 + $0x58] sm:$0xff]  }
 0x36a   : > { %2442 = vmatmul.mubr.bf16.gmra.mrb[80].mxu0 %v7841_v62  ;;  %v916_v62 = vsel %vm880_vm5, %v843_v35, %v844_v9  ;;  %v856_v35 = vrot.slane %v7969_v50, 3  ;;  %v1029_v12 = vpack.c.bf16 %v890_v43, %v891_v17  ;;  %v889_v19 = vsel %vm880_vm5, %v870_v54, %v871_v14  ;;  %v6671_v43 = vld [vmem:[#allocation8 + $0x60] sm:$0xff]  }
 0x36b   : > { %5641 = vmatprep.mubr.msk.bf16.mxu0 %vm6984_vm6, %v10316_v40  ;;  %v938_v41 = vpack.c.bf16 %v916_v62, %v917_v13  ;;  %v857_v62 = vrot.slane %v7984_v15, 3  ;;  %v858_v13 = vrot.slane %v8192_v58, 3  ;;  %v900_v15 = vsel %vm880_vm5, %v859_v44, %v860_v21 }
 0x36c   : > { %v904_v46 = vsel %vm880_vm5, %v855_v55, %v856_v35  ;;  %v876_v55 = vrot.slane %v8309_v27, 3  ;;  %v10317_v21 = vmov 0  }
 0x36d   : > { %v980_v9 = vpack.c.bf16 %v904_v46, %v905_v38  ;;  %v902_v34 = vsel %vm880_vm5, %v857_v62, %v858_v13  ;;  %v903_v50 = vsel %vm880_vm5, %v856_v35, %v857_v62  ;;  %v901_v58 = vsel %vm880_vm5, %v858_v13, %v859_v44  ;;  %v6659_v44 = vld [vmem:[#allocation8] sm:$0xff]  }
 0x36e   : > { %v994_v16 = vpack.c.bf16 %v900_v15, %v901_v58  ;;  %v877_v46 = vrot.slane %v8318_v7, 3  ;;  %v878_v38 = vrot.slane %v8322_v22, 3  ;;  %v838_v62 = vrot.slane %v8331_v60, 3  ;;  %4103 = vmatpush1.bf16.msra.mxu1 %v6659_v44  ;;  %v6660_v15 = vld [vmem:[#allocation8 + $0x8] sm:$0xff]   ;;  %v6663_v58 = vld [vmem:[#allocation8 + $0x20] sm:$0xff]  }
 0x36f   : > { %v879_v13 = vrot.slane %v8335_v30, 3  ;;  %4104 = vmatprep.subr.bf16.mxu1 %v10317_v21 }
 0x370   : > { %v883_v27 = vsel %vm880_vm5, %v876_v55, %v877_v46 }
 0x371   : > { %v881_v7 = vsel %vm880_vm5, %v878_v38, %v879_v13  ;;  %v922_v22 = vsel %vm880_vm5, %v879_v13, %v838_v62 }
 0x372   : > { %5642 = vmatmul.mubr.bf16.vlgmr.msra.gmra.mrb[0].mxu0 %v931_v23  ;;  %v973_v23 = vpack.c.bf16 %v906_v29, %v907_v37  ;;  %v874_v29 = vrot.slane %v8296_v4, 3  ;;  %4105 = vmatpush1.bf16.msra.mxu1 %v6660_v15 }
 0x373   : > { %5645 = vmatprep.mubr.msk.bf16.mxu0 %vm6984_vm6, %v10316_v40  ;;  %4106 = vmatprep.subr.bf16.mxu1 %v10317_v21 }
 0x374   : > { %v886_v51 = vsel %vm880_vm5, %v873_v2, %v874_v29 }
 0x37a   : > { %5646 = vmatmul.mubr.bf16.gmra.mrb[4].mxu0 %v938_v41  ;;  %v987_v41 = vpack.c.bf16 %v902_v34, %v903_v50  ;;  %v1064_v34 = vpack.c.bf16 %v922_v22, %v881_v7  ;;  %v839_v50 = vrot.slane %v8344_v28, 3  ;;  %v6661_v28 = vld [vmem:[#allocation8 + $0x10] sm:$0xff]  }
 0x37b   : > { %5649 = vmatprep.mubr.msk.bf16.mxu0 %vm6984_vm6, %v10316_v40  ;;  %4107 = vmatpush1.bf16.msra.mxu1 %v6661_v28 }
 0x37c   : > { %v920_v60 = vsel %vm880_vm5, %v839_v50, %v840_v61  ;;  %v921_v30 = vsel %vm880_vm5, %v838_v62, %v839_v50  ;;  %4108 = vmatprep.subr.bf16.mxu1 %v10317_v21 }
 0x37f   : > { %4109 = vmatpush1.bf16.msra.mxu1 %v6662_v42 }
 0x380   : > { %4110 = vmatprep.subr.bf16.mxu1 %v10317_v21 }
 0x382   : > { %5650 = vmatmul.mubr.bf16.gmra.mrb[8].mxu0 %v945_v48  ;;  %v862_v48 = vrot.slane %v8218_v5, 3 }
 0x383   : > { %5653 = vmatprep.mubr.msk.bf16.mxu0 %vm6984_vm6, %v10316_v40  ;;  %4111 = vmatpush1.bf16.msra.mxu1 %v6663_v58 }
 0x384   : > { %v898_v59 = vsel %vm880_vm5, %v861_v25, %v862_v48  ;;  %v897_v5 = vsel %vm880_vm5, %v862_v48, %v863_v31  ;;  %4112 = vmatprep.subr.bf16.mxu1 %v10317_v21 }
 0x385   : > { %v1001_v52 = vpack.c.bf16 %v898_v59, %v899_v24  ;;  %v1008_v32 = vpack.c.bf16 %v896_v49, %v897_v5  ;;  %v6664_v59 = vld [vmem:[#allocation8 + $0x28] sm:$0xff]   ;;  %v6666_v5 = vld [vmem:[#allocation8 + $0x38] sm:$0xff]  }
 0x387   : > { %4113 = vmatpush1.bf16.msra.mxu1 %v6664_v59 }
 0x388   : > { %4114 = vmatprep.subr.bf16.mxu1 %v10317_v21 }
 0x38a   : > { %5654 = vmatmul.mubr.bf16.gmra.mrb[12].mxu0 %v952_v53  ;;  %v865_v53 = vrot.slane %v8240_v39, 3  ;;  %v892_v39 = vsel %vm880_vm5, %v867_v56, %v868_v57  ;;  %v6669_v57 = vld [vmem:[#allocation8 + $0x50] sm:$0xff]  }
 0x38b   : > { %5657 = vmatprep.mubr.msk.bf16.mxu0 %vm6984_vm6, %v10316_v40 }
 0x38c   : > { %v894_v20 = vsel %vm880_vm5, %v865_v53, %v866_v18  ;;  %v895_v26 = vsel %vm880_vm5, %v864_v36, %v865_v53  ;;  %v6667_v53 = vld [vmem:[#allocation8 + $0x40] sm:$0xff]  }
 0x38d   : > { %v1015_v3 = vpack.c.bf16 %v894_v20, %v895_v26 }
 0x392   : > { %5658 = vmatmul.mubr.bf16.gmra.mrb[16].mxu0 %v959_v11  ;;  %v1022_v11 = vpack.c.bf16 %v892_v39, %v893_v8 }
 0x393   : > { %5661 = vmatprep.mubr.msk.bf16.mxu0 %vm6984_vm6, %v10316_v40 }
 0x39a   : > { %5662 = vmatmul.mubr.bf16.gmra.mrb[20].mxu0 %v966_v1  ;;  %v872_v1 = vrot.slane %v8283_v10, 3 }
 0x39b   : > { %5665 = vmatprep.mubr.msk.bf16.mxu0 %vm6984_vm6, %v10316_v40 }
 0x39c   : > { %v888_v63 = vsel %vm880_vm5, %v871_v14, %v872_v1  ;;  %v887_v10 = vsel %vm880_vm5, %v872_v1, %v873_v2  ;;  %v6672_v1 = vld [vmem:[#allocation8 + $0x68] sm:$0xff]  }
 0x39d   : > { %v1036_v47 = vpack.c.bf16 %v888_v63, %v889_v19  ;;  %v1043_v37 = vpack.c.bf16 %v886_v51, %v887_v10  ;;  %v6673_v19 = vld [vmem:[#allocation8 + $0x70] sm:$0xff]  }
 0x3a2   : > { %5666 = vmatmul.mubr.bf16.gmra.mrb[24].mxu0 %v973_v23  ;;  %v875_v23 = vrot.slane %v8305_v33, 3  ;;  %v882_v33 = vsel %vm880_vm5, %v877_v46, %v878_v38 }
 0x3a3   : > { %5669 = vmatprep.mubr.msk.bf16.mxu0 %vm6984_vm6, %v10316_v40 }
 0x3a4   : > { %v884_v45 = vsel %vm880_vm5, %v875_v23, %v876_v55  ;;  %v885_v4 = vsel %vm880_vm5, %v874_v29, %v875_v23  ;;  %v6674_v29 = vld [vmem:[#allocation8 + $0x78] sm:$0xff]  }
 0x3a5   : > { %v1050_v35 = vpack.c.bf16 %v884_v45, %v885_v4 }
 0x3aa   : > { %5670 = vmatmul.mubr.bf16.gmra.mrb[28].mxu0 %v980_v9  ;;  %v1057_v9 = vpack.c.bf16 %v882_v33, %v883_v27 }
 0x3ab   : > { %5673 = vmatprep.mubr.msk.bf16.mxu0 %vm6984_vm6, %v10316_v40 }
 0x3b2   : > { %5674 = vmatmul.mubr.bf16.gmra.mrb[32].mxu0 %v987_v41  ;;  %v1069_v41 = vpack.c.bf16 %v920_v60, %v921_v30 }
 0x3b3   : > { %5677 = vmatprep.mubr.msk.bf16.mxu0 %vm6984_vm6, %v10316_v40 }
 0x3ba   : > { %5678 = vmatmul.mubr.bf16.gmra.mrb[36].mxu0 %v994_v16 }
 0x3bb   : > { %5681 = vmatprep.mubr.msk.bf16.mxu0 %vm6984_vm6, %v10316_v40 }
 0x3c2   : > { %5682 = vmatmul.mubr.bf16.gmra.mrb[40].mxu0 %v1001_v52  ;;  %v6665_v52 = vld [vmem:[#allocation8 + $0x30] sm:$0xff]  }
 0x3c3   : > { %5685 = vmatprep.mubr.msk.bf16.mxu0 %vm6984_vm6, %v10316_v40  ;;  %4115 = vmatpush1.bf16.msra.mxu1 %v6665_v52 }
 0x3c4   : > { %4116 = vmatprep.subr.bf16.mxu1 %v10317_v21 }
 0x3c7   : > { %4117 = vmatpush1.bf16.msra.mxu1 %v6666_v5 }
 0x3c8   : > { %4118 = vmatprep.subr.bf16.mxu1 %v10317_v21 }
 0x3ca   : > { %5686 = vmatmul.mubr.bf16.gmra.mrb[44].mxu0 %v1008_v32 }
 0x3cb   : > { %5689 = vmatprep.mubr.msk.bf16.mxu0 %vm6984_vm6, %v10316_v40  ;;  %4119 = vmatpush1.bf16.msra.mxu1 %v6667_v53 }
 0x3cc   : > { %4120 = vmatprep.subr.bf16.mxu1 %v10317_v21 }
 0x3d2   : > { %5690 = vmatmul.mubr.bf16.gmra.mrb[48].mxu0 %v1015_v3  ;;  %v6668_v3 = vld [vmem:[#allocation8 + $0x48] sm:$0xff]  }
 0x3d3   : > { %5693 = vmatprep.mubr.msk.bf16.mxu0 %vm6984_vm6, %v10316_v40  ;;  %4121 = vmatpush1.bf16.msra.mxu1 %v6668_v3 }
 0x3d4   : > { %4122 = vmatprep.subr.bf16.mxu1 %v10317_v21 }
 0x3d7   : > { %4123 = vmatpush1.bf16.msra.mxu1 %v6669_v57 }
 0x3d8   : > { %4124 = vmatprep.subr.bf16.mxu1 %v10317_v21 }
 0x3da   : > { %5694 = vmatmul.mubr.bf16.gmra.mrb[52].mxu0 %v1022_v11 }
 0x3db   : > { %5697 = vmatprep.mubr.msk.bf16.mxu0 %vm6984_vm6, %v10316_v40  ;;  %4125 = vmatpush1.bf16.msra.mxu1 %v6670_v0  ;;  %v8615_v0 = vld [vmem:[%s10219_s3] ss:$0 sm:$0xff] }
 0x3dc   : > { %4126 = vmatprep.subr.bf16.mxu1 %v10317_v21 }
 0x3df   : > { %4127 = vmatpush1.bf16.msra.mxu1 %v6671_v43 }
 0x3e0   : > { %4128 = vmatprep.subr.bf16.mxu1 %v10317_v21 }
 0x3e2   : > { %5698 = vmatmul.mubr.bf16.gmra.mrb[56].mxu0 %v1029_v12 }
 0x3e3   : > { %5701 = vmatprep.mubr.msk.bf16.mxu0 %vm6984_vm6, %v10316_v40  ;;  %4129 = vmatpush1.bf16.msra.mxu1 %v6672_v1 }
 0x3e4   : > { %4130 = vmatprep.subr.bf16.mxu1 %v10317_v21 }
 0x3e7   : > { %4131 = vmatpush1.bf16.msra.mxu1 %v6673_v19 }
 0x3e8   : > { %4132 = vmatprep.subr.bf16.mxu1 %v10317_v21 }
 0x3ea   : > { %5702 = vmatmul.mubr.bf16.gmra.mrb[60].mxu0 %v1036_v47 }
 0x3eb   : > { %5705 = vmatprep.mubr.msk.bf16.mxu0 %vm6984_vm6, %v10316_v40  ;;  %4133 = vmatpush1.bf16.msra.mxu1 %v6674_v29 }
 0x3ec   : > { %4303 = vmatprep.subr.bf16.mxu1 %v10317_v21 }
 0x3f2   : > { %5706 = vmatmul.mubr.bf16.gmra.mrb[64].mxu0 %v1043_v37 }
 0x3f3   : > { %5709 = vmatprep.mubr.msk.bf16.mxu0 %vm6984_vm6, %v10316_v40 }
 0x3fa   : > { %5710 = vmatmul.mubr.bf16.gmra.mrb[68].mxu0 %v1050_v35 }
 0x3fb   : > { %5713 = vmatprep.mubr.msk.bf16.mxu0 %vm6984_vm6, %v10316_v40 }
 0x402   : > { %5714 = vmatmul.mubr.bf16.gmra.mrb[72].mxu0 %v1057_v9 }
 0x403   : > { %5717 = vmatprep.mubr.msk.bf16.mxu0 %vm6984_vm6, %v10316_v40 }
 0x40a   : > { %5718 = vmatmul.mubr.bf16.gmra.mrb[76].mxu0 %v1064_v34 }
 0x40b   : > { %5721 = vmatprep.mubr.msk.bf16.mxu0 %vm6984_vm6, %v10316_v40 }
 0x412   : > { %5722 = vmatmul.mubr.bf16.gmra.mrb[80].mxu0 %v1069_v41 }
 0x445   : > { %v8536_v61 = vpop.f32.mrb[0].mxu0 }
 0x446   : > { %v5643_v16 = vpop.f32.mrb[1].mxu0  ;;  %v2658_v43 = vmul.f32 %v8615_v0, %v8536_v61 }
 0x447   : > { %v8538_v25 = vpop.f32.mrb[2].mxu0 }
 0x448   : > { %v5644_v48 = vpop.f32.mrb[3].mxu0 }
 0x44d   : > { %v8542_v24 = vpop.f32.mrb[4].mxu0 }
 0x44e   : > { %v5647_v31 = vpop.f32.mrb[5].mxu0 }
 0x44f   : > { %v8544_v36 = vpop.f32.mrb[6].mxu0 }
 0x450   : > { %v5648_v49 = vpop.f32.mrb[7].mxu0 }
 0x455   : > { %v8548_v32 = vpop.f32.mrb[8].mxu0 }
 0x456   : > { %v5651_v18 = vpop.f32.mrb[9].mxu0 }
 0x457   : > { %v8550_v20 = vpop.f32.mrb[10].mxu0 }
 0x458   : > { %v5652_v26 = vpop.f32.mrb[11].mxu0 }
 0x45d   : > { %v8554_v56 = vpop.f32.mrb[12].mxu0 }
 0x45e   : > { %v5655_v39 = vpop.f32.mrb[13].mxu0 }
 0x45f   : > { %v8556_v8 = vpop.f32.mrb[14].mxu0 }
 0x460   : > { %v5656_v11 = vpop.f32.mrb[15].mxu0 }
 0x465   : > { %v8560_v54 = vpop.f32.mrb[16].mxu0 }
 0x466   : > { %v5659_v17 = vpop.f32.mrb[17].mxu0 }
 0x467   : > { %v8562_v12 = vpop.f32.mrb[18].mxu0 }
 0x468   : > { %v5660_v14 = vpop.f32.mrb[19].mxu0 }
 0x469   : > { %v8624_v14 = vld [vmem:[%s10220_s4] ss:$0 sm:$0xff] }
 0x46d   : > { %v8566_v63 = vpop.f32.mrb[20].mxu0 }
 0x46e   : > { %v5663_v47 = vpop.f32.mrb[21].mxu0 }
 0x46f   : > { %v8568_v2 = vpop.f32.mrb[22].mxu0 }
 0x470   : > { %v5664_v51 = vpop.f32.mrb[23].mxu0 }
 0x471   : > { %v2707_v51 = vadd.f32 %v8624_v14, %v2658_v43  ;;  %v2826_v43 = vld [vmem:[#allocation5 + $0x118] sm:$0xff] }
 0x473   : > { %v2749_v61 = vmax.f32 %v2707_v51, 0.0 }
 0x475   : > { %v8572_v10 = vpop.f32.mrb[24].mxu0 }
 0x476   : > { %v5667_v37 = vpop.f32.mrb[25].mxu0 }
 0x477   : > { %v8574_v23 = vpop.f32.mrb[26].mxu0  ;;  %v2659_v37 = vmul.f32 %v8615_v0, %v8538_v25 }
 0x478   : > { %v5668_v55 = vpop.f32.mrb[27].mxu0 }
 0x47d   : > { %v8576_v45 = vpop.f32.mrb[28].mxu0 }
 0x47e   : > { %v5671_v4 = vpop.f32.mrb[29].mxu0 }
 0x47f   : > { %v8578_v35 = vpop.f32.mrb[30].mxu0  ;;  %v2708_v4 = vadd.f32 %v8624_v14, %v2659_v37 }
 0x480   : > { %v5672_v46 = vpop.f32.mrb[31].mxu0 }
 0x481   : > { %v2750_v25 = vmax.f32 %v2708_v4, 0.0 }
 0x485   : > { %v8580_v38 = vpop.f32.mrb[32].mxu0 }
 0x486   : > { %v5675_v33 = vpop.f32.mrb[33].mxu0 }
 0x487   : > { %v8582_v27 = vpop.f32.mrb[34].mxu0  ;;  %v2791_v33 = vld [vmem:[#allocation5] sm:$0xff] }
 0x488   : > { %v5676_v9 = vpop.f32.mrb[35].mxu0 }
 0x48d   : > { %v8584_v62 = vpop.f32.mrb[36].mxu0 }
 0x48e   : > { %v5679_v13 = vpop.f32.mrb[37].mxu0 }
 0x48f   : > { %v8586_v7 = vpop.f32.mrb[38].mxu0 }
 0x490   : > { %v5680_v22 = vpop.f32.mrb[39].mxu0 }
 0x495   : > { %v8588_v34 = vpop.f32.mrb[40].mxu0 }
 0x496   : > { %v5683_v50 = vpop.f32.mrb[41].mxu0 }
 0x497   : > { %v8590_v60 = vpop.f32.mrb[42].mxu0 }
 0x498   : > { %v5684_v30 = vpop.f32.mrb[43].mxu0 }
 0x499   : > { %v2824_v30 = vld [vmem:[#allocation5 + $0x108] sm:$0xff] }
 0x49d   : > { %v8592_v41 = vpop.f32.mrb[44].mxu0 }
 0x49e   : > { %v5687_v44 = vpop.f32.mrb[45].mxu0 }
 0x49f   : > { %v8594_v15 = vpop.f32.mrb[46].mxu0 }
 0x4a0   : > { %v5688_v28 = vpop.f32.mrb[47].mxu0 }
 0x4a5   : > { %v8596_v42 = vpop.f32.mrb[48].mxu0 }
 0x4a6   : > { %v5691_v58 = vpop.f32.mrb[49].mxu0 }
 0x4a7   : > { %v8598_v16 = vpop.f32.mrb[50].mxu0 }
 0x4a8   : > { %v5692_v48 = vpop.f32.mrb[51].mxu0 }
 0x4a9   : > { %v8635_v48 = vmul.f32 %v2791_v33, %v2749_v61  ;;  %v2661_v33 = vmul.f32 %v8615_v0, %v8544_v36 }
 0x4ad   : > { %v8600_v59 = vpop.f32.mrb[52].mxu0 }
 0x4ae   : > { %10318 = vst [vmem:[#allocation17_spill] sm:$0xff] %v8600_v59  ;;  %v5695_v52 = vpop.f32.mrb[53].mxu0 }
 0x4af   : > { %v8602_v31 = vpop.f32.mrb[54].mxu0  ;;  %v2825_v52 = vld [vmem:[#allocation5 + $0x110] sm:$0xff] }
 0x4b0   : > { %v5696_v49 = vpop.f32.mrb[55].mxu0 }
 0x4b1   : > { %v2792_v49 = vld [vmem:[#allocation5 + $0x8] sm:$0xff] }
 0x4b5   : > { %v8604_v5 = vpop.f32.mrb[56].mxu0 }
 0x4b6   : > { %10319 = vst [vmem:[#allocation18_spill] sm:$0xff] %v8604_v5  ;;  %v5699_v53 = vpop.f32.mrb[57].mxu0 }
 0x4b7   : > { %v8606_v18 = vpop.f32.mrb[58].mxu0 }
 0x4b8   : > { %10320 = vst [vmem:[#allocation19_spill] sm:$0xff] %v8606_v18  ;;  %v5700_v26 = vpop.f32.mrb[59].mxu0 }
 0x4bd   : > { %v8608_v3 = vpop.f32.mrb[60].mxu0 }
 0x4be   : > { %10321 = vst [vmem:[#allocation20_spill] sm:$0xff] %v8608_v3  ;;  %v5703_v57 = vpop.f32.mrb[61].mxu0 }
 0x4bf   : > { %v8610_v39 = vpop.f32.mrb[62].mxu0  ;;  %v2660_v57 = vmul.f32 %v8615_v0, %v8542_v24 }
 0x4c0   : > { %10322 = vst [vmem:[#allocation21_spill] sm:$0xff] %v8610_v39  ;;  %v5704_v11 = vpop.f32.mrb[63].mxu0 }
 0x4c5   : > { %v8619_v17 = vpop.f32.mrb[64].mxu0 }
 0x4c6   : > { %10323 = vst [vmem:[#allocation22_spill] sm:$0xff] %v8619_v17  ;;  %v5707_v1 = vpop.f32.mrb[65].mxu0 }
 0x4c7   : > { %v2615_v19 = vpop.f32.mrb[66].mxu0 }
 0x4c8   : > { %v2691_v47 = vmul.f32 %v8615_v0, %v2615_v19  ;;  %v5708_v29 = vpop.f32.mrb[67].mxu0 }
 0x4ca   : > { %v2740_v55 = vadd.f32 %v8624_v14, %v2691_v47  ;;  %v8644_v47 = vmul.f32 %v2792_v49, %v2750_v25  ;;  %v2827_v25 = vld [vmem:[#allocation5 + $0x120] sm:$0xff] }
 0x4cc   : > { %v2782_v22 = vmax.f32 %v2740_v55, 0.0  ;;  %10325 = vst [vmem:[#allocation24_spill] sm:$0xff] %v8644_v47 }
 0x4cd   : > { %v2620_v46 = vpop.f32.mrb[68].mxu0 }
 0x4ce   : > { %v2692_v9 = vmul.f32 %v8615_v0, %v2620_v46  ;;  %v5711_v13 = vpop.f32.mrb[69].mxu0  ;;  %v8640_v11 = vmul.f32 %v2824_v30, %v2782_v22  ;;  %v8653_v46 = vadd.f32 %v8624_v14, %v2660_v57 }
 0x4cf   : > { %v2623_v50 = vpop.f32.mrb[70].mxu0 }
 0x4d0   : > { %v2741_v44 = vadd.f32 %v8624_v14, %v2692_v9  ;;  %v2693_v28 = vmul.f32 %v8615_v0, %v2623_v50  ;;  %v5712_v58 = vpop.f32.mrb[71].mxu0  ;;  %10324 = vst [vmem:[#allocation23_spill] sm:$0xff] %v8640_v11  ;;  %v10238_v13 = vrot.slane %v8640_v11, 6  ;;  %v10241_v49 = vrot.slane %v8640_v11, 7 }
 0x4d1   : > { %v2751_v3 = vmax.f32 %v8653_v46, 0.0  ;;  %v2663_v46 = vmul.f32 %v8615_v0, %v8550_v20 }
 0x4d2   : > { %v2783_v53 = vmax.f32 %v2741_v44, 0.0  ;;  %v2742_v26 = vadd.f32 %v8624_v14, %v2693_v28  ;;  %v10237_v28 = vrot.slane %v8640_v11, 5 }
 0x4d4   : > { %v8642_v1 = vmul.f32 %v2825_v52, %v2783_v53  ;;  %v2784_v19 = vmax.f32 %v2742_v26, 0.0 }
 0x4d5   : > { %v2628_v29 = vpop.f32.mrb[72].mxu0 }
 0x4d6   : > { %v8647_v37 = vmul.f32 %v2826_v43, %v2784_v19  ;;  %v2694_v55 = vmul.f32 %v8615_v0, %v2628_v29  ;;  %v5715_v61 = vpop.f32.mrb[73].mxu0  ;;  %v2993_v4 = vrot.slane %v8642_v1, 6  ;;  %v2909_v24 = vrot.slane %v8642_v1, 5  ;;  %v2828_v29 = vld [vmem:[#allocation5 + $0x128] sm:$0xff] }
 0x4d7   : > { %v2631_v9 = vpop.f32.mrb[74].mxu0  ;;  %v3077_v22 = vrot.slane %v8642_v1, 7 }
 0x4d8   : > { %v2743_v50 = vadd.f32 %v8624_v14, %v2694_v55  ;;  %v2695_v30 = vmul.f32 %v8615_v0, %v2631_v9  ;;  %v5716_v44 = vpop.f32.mrb[75].mxu0  ;;  %v2994_v58 = vrot.slane %v8647_v37, 6  ;;  %v8667_v36 = vsel %vm540_vm0, %v10238_v13, %v2993_v4 }
 0x4d9   : > { %10326 = vst [vmem:[#allocation25_spill] sm:$0xff] %v8667_v36  ;;  %v2910_v52 = vrot.slane %v8647_v37, 5  ;;  %v3078_v53 = vrot.slane %v8647_v37, 7  ;;  %v8681_v19 = vsel %vm455_vm1, %v10237_v28, %v2909_v24  ;;  %v10244_v13 = vrot.slane %v8642_v1, 1 }
 0x4da   : > { %v2785_v26 = vmax.f32 %v2743_v50, 0.0  ;;  %v2744_v57 = vadd.f32 %v8624_v14, %v2695_v30  ;;  %v8675_v43 = vsel %vm540_vm0, %v2993_v4, %v2994_v58  ;;  %10328 = vst [vmem:[#allocation27_spill] sm:$0xff] %v8681_v19  ;;  %v3092_v4 = vsel %vm625_vm2, %v10241_v49, %v3077_v22 }
 0x4db   : > { %10327 = vst [vmem:[#allocation26_spill] sm:$0xff] %v8675_v43  ;;  %v8687_v61 = vsel %vm455_vm1, %v2909_v24, %v2910_v52  ;;  %v3091_v9 = vsel %vm625_vm2, %v3077_v22, %v3078_v53  ;;  %v3162_v51 = vrot.slane %v8647_v37, 1  ;;  %v2829_v24 = vld [vmem:[#allocation5 + $0x130] sm:$0xff]  ;;  %v2830_v43 = vld [vmem:[#allocation5 + $0x138] sm:$0xff] }
 0x4dc   : > { %10329 = vst [vmem:[#allocation28_spill] sm:$0xff] %v8687_v61  ;;  %v8695_v50 = vmul.f32 %v2827_v25, %v2785_v26  ;;  %v2786_v30 = vmax.f32 %v2744_v57, 0.0  ;;  %v8699_v28 = vpack.c.bf16 %v3091_v9, %v3092_v4  ;;  %v8712_v9 = vadd.f32 %v8624_v14, %v2661_v33 }
 0x4dd   : > { %v2636_v55 = vpop.f32.mrb[76].mxu0 }
 0x4de   : > { %10330 = vst [vmem:[#allocation29_spill] sm:$0xff] %v8695_v50  ;;  %10331 = vst [vmem:[#allocation30_spill] sm:$0xff] %v8699_v28  ;;  %v8706_v36 = vmul.f32 %v2828_v29, %v2786_v30  ;;  %v2696_v22 = vmul.f32 %v8615_v0, %v2636_v55  ;;  %v5719_v25 = vpop.f32.mrb[77].mxu0  ;;  %v2995_v26 = vrot.slane %v8695_v50, 6  ;;  %v2911_v57 = vrot.slane %v8695_v50, 5 }
 0x4df   : > { %v2639_v4 = vpop.f32.mrb[78].mxu0  ;;  %v3079_v49 = vrot.slane %v8695_v50, 7  ;;  %v3163_v44 = vrot.slane %v8695_v50, 1  ;;  %v3175_v29 = vsel %vm710_vm3, %v10244_v13, %v3162_v51 }
 0x4e0   : > { %v2745_v55 = vadd.f32 %v8624_v14, %v2696_v22  ;;  %v2697_v30 = vmul.f32 %v8615_v0, %v2639_v4  ;;  %v5720_v25 = vpop.f32.mrb[79].mxu0  ;;  %v2996_v40 = vrot.slane %v8706_v36, 6  ;;  %v8725_v33 = vsel %vm540_vm0, %v2994_v58, %v2995_v26 }
 0x4e1   : > { %10332 = vst [vmem:[#allocation31_spill] sm:$0xff] %v8725_v33  ;;  %v2912_v28 = vrot.slane %v8706_v36, 5  ;;  %v8730_v19 = vsel %vm455_vm1, %v2910_v52, %v2911_v57  ;;  %v3080_v13 = vrot.slane %v8706_v36, 7  ;;  %v3090_v22 = vsel %vm625_vm2, %v3078_v53, %v3079_v49 }
 0x4e2   : > { %10333 = vst [vmem:[#allocation32_spill] sm:$0xff] %v8730_v19  ;;  %v2787_v4 = vmax.f32 %v2745_v55, 0.0  ;;  %v2746_v25 = vadd.f32 %v8624_v14, %v2697_v30  ;;  %v8738_v61 = vsel %vm540_vm0, %v2995_v26, %v2996_v40  ;;  %v3174_v58 = vsel %vm710_vm3, %v3162_v51, %v3163_v44 }
 0x4e3   : > { %10334 = vst [vmem:[#allocation33_spill] sm:$0xff] %v8738_v61  ;;  %v8746_v11 = vsel %vm455_vm1, %v2911_v57, %v2912_v28  ;;  %v3089_v53 = vsel %vm625_vm2, %v3079_v49, %v3080_v13  ;;  %v8750_v55 = vpack.c.bf16 %v3174_v58, %v3175_v29  ;;  %v2752_v52 = vmax.f32 %v8712_v9, 0.0  ;;  %v2832_v61 = vld [vmem:[#allocation5 + $0x148] sm:$0xff] }
 0x4e4   : > { %10335 = vst [vmem:[#allocation34_spill] sm:$0xff] %v8746_v11  ;;  %v8752_v30 = vmul.f32 %v2829_v24, %v2787_v4  ;;  %v2788_v26 = vmax.f32 %v2746_v25, 0.0  ;;  %v8756_v51 = vpack.c.bf16 %v3089_v53, %v3090_v22  ;;  %v3164_v57 = vrot.slane %v8706_v36, 1 }
 0x4e5   : > { %10336 = vst [vmem:[#allocation35_spill] sm:$0xff] %v8750_v55  ;;  %v2644_v33 = vpop.f32.mrb[80].mxu0  ;;  %v2831_v55 = vld [vmem:[#allocation5 + $0x140] sm:$0xff] }
 0x4e6   : > { %10337 = vst [vmem:[#allocation36_spill] sm:$0xff] %v8752_v30  ;;  %10338 = vst [vmem:[#allocation37_spill] sm:$0xff] %v8756_v51  ;;  %v8763_v29 = vmul.f32 %v2830_v43, %v2788_v26  ;;  %v2698_v24 = vmul.f32 %v8615_v0, %v2644_v33  ;;  %v5723_v4 = vpop.f32.mrb[81].mxu0  ;;  %v2997_v25 = vrot.slane %v8752_v30, 6  ;;  %v2913_v22 = vrot.slane %v8752_v30, 5 }
 0x4e7   : > { %v2647_v58 = vpop.f32.mrb[82].mxu0  ;;  %v3081_v9 = vrot.slane %v8752_v30, 7  ;;  %v3165_v53 = vrot.slane %v8752_v30, 1  ;;  %v3173_v49 = vsel %vm710_vm3, %v3163_v44, %v3164_v57 }
 0x4e8   : > { %10339 = vst [vmem:[#allocation38_spill] sm:$0xff] %v8763_v29  ;;  %v2747_v43 = vadd.f32 %v8624_v14, %v2698_v24  ;;  %v2699_v33 = vmul.f32 %v8615_v0, %v2647_v58  ;;  %v5724_v26 = vpop.f32.mrb[83].mxu0  ;;  %v2998_v4 = vrot.slane %v8763_v29, 6  ;;  %v2914_v17 = vrot.slane %v8763_v29, 5  ;;  %v2794_v58 = vld [vmem:[#allocation5 + $0x18] sm:$0xff] }
 0x4e9   : > { %v8780_v20 = vsel %vm540_vm0, %v2996_v40, %v2997_v25  ;;  %v8784_v51 = vsel %vm455_vm1, %v2912_v28, %v2913_v22  ;;  %v3082_v44 = vrot.slane %v8763_v29, 7  ;;  %v3088_v24 = vsel %vm625_vm2, %v3080_v13, %v3081_v9 }
 0x4ea   : > { %10340 = vst [vmem:[#allocation39_spill] sm:$0xff] %v8784_v51  ;;  %v2789_v26 = vmax.f32 %v2747_v43, 0.0  ;;  %v2748_v19 = vadd.f32 %v8624_v14, %v2699_v33  ;;  %v8792_v11 = vsel %vm540_vm0, %v2997_v25, %v2998_v4  ;;  %v8796_v40 = vsel %vm455_vm1, %v2913_v22, %v2914_v17  ;;  %v2793_v33 = vld [vmem:[#allocation5 + $0x10] sm:$0xff] }
 0x4eb   : > { %10341 = vst [vmem:[#allocation40_spill] sm:$0xff] %v8796_v40  ;;  %v3087_v13 = vsel %vm625_vm2, %v3081_v9, %v3082_v44  ;;  %v3172_v43 = vsel %vm710_vm3, %v3164_v57, %v3165_v53  ;;  %v8812_v59 = vmul.f32 %v2794_v58, %v2752_v52  ;;  %v2662_v28 = vmul.f32 %v8615_v0, %v8548_v32 }
 0x4ec   : > { %v8806_v25 = vmul.f32 %v2831_v55, %v2789_v26  ;;  %v2790_v5 = vmax.f32 %v2748_v19, 0.0  ;;  %v8808_v18 = vpack.c.bf16 %v3087_v13, %v3088_v24  ;;  %v8810_v22 = vpack.c.bf16 %v3172_v43, %v3173_v49 }
 0x4ed   : > { %10345 = vst [vmem:[#allocation44_spill] sm:$0xff] %v8812_v59  ;;  %v3166_v39 = vrot.slane %v8763_v29, 1  ;;  %v8824_v49 = vmul.f32 %v2793_v33, %v2751_v3  ;;  %v2712_v52 = vadd.f32 %v8624_v14, %v2663_v46  ;;  %v2711_v3 = vadd.f32 %v8624_v14, %v2662_v28 }
 0x4ee   : > { %10342 = vst [vmem:[#allocation41_spill] sm:$0xff] %v8806_v25  ;;  %10343 = vst [vmem:[#allocation42_spill] sm:$0xff] %v8808_v18  ;;  %v8819_v51 = vmul.f32 %v2832_v61, %v2790_v5  ;;  %v2999_v55 = vrot.slane %v8806_v25, 6  ;;  %v2915_v19 = vrot.slane %v8806_v25, 5  ;;  %v3083_v57 = vrot.slane %v8806_v25, 7 }
 0x4ef   : > { %10344 = vst [vmem:[#allocation43_spill] sm:$0xff] %v8810_v22  ;;  %v10257_v24 = vrot.slane %v8806_v25, 1  ;;  %v3171_v32 = vsel %vm710_vm3, %v3165_v53, %v3166_v39  ;;  %v10262_v33 = vrot.slane %v8812_v59, 6  ;;  %v2754_v9 = vmax.f32 %v2712_v52, 0.0 }
 0x4f0   : > { %v3000_v58 = vrot.slane %v8819_v51, 6  ;;  %v3002_v5 = vsel %vm540_vm0, %v2998_v4, %v2999_v55  ;;  %v2916_v61 = vrot.slane %v8819_v51, 5  ;;  %v2918_v26 = vsel %vm455_vm1, %v2914_v17, %v2915_v19 }
 0x4f1   : > { %v3086_v46 = vsel %vm625_vm2, %v3082_v44, %v3083_v57  ;;  %v3170_v53 = vsel %vm710_vm3, %v3166_v39, %v10257_v24  ;;  %v10346_v17 = vrot.slane %v8635_v48, 6  ;;  %v2665_v44 = vmul.f32 %v8615_v0, %v8556_v8  ;;  %v6675_v39 = vld [vmem:[#allocation8 + $0x80] sm:$0xff]   ;;  %v2796_v24 = vld [vmem:[#allocation5 + $0x28] sm:$0xff] }
 0x4f2   : > { %v3001_v4 = vsel %vm540_vm0, %v2999_v55, %v3000_v58  ;;  %v2917_v43 = vsel %vm455_vm1, %v2915_v19, %v2916_v61  ;;  %v10347_v55 = vrot.slane %v8644_v47, 6  ;;  %v10349_v40 = vrot.slane %v8819_v51, 7 }
 0x4f3   : > { %v3042_v28 = vsel %vm540_vm0, %v3000_v58, %v10346_v17  ;;  %v3380_v13 = vpack.c.bf16 %v3001_v4, %v3002_v5  ;;  %v3379_v22 = vpack.c.bf16 %v2917_v43, %v2918_v26  ;;  %v10348_v18 = vmov %v10346_v17 }
 0x4f4   : > { %v3041_v19 = vsel %vm540_vm0, %v10348_v18, %v10347_v55  ;;  %v3085_v58 = vsel %vm625_vm2, %v3083_v57, %v10349_v40  ;;  %v8865_v52 = vpack.c.bf16 %v3170_v53, %v3171_v32  ;;  %v2876_v5 = vrot.slane %v8644_v47, 5  ;;  %v2795_v18 = vld [vmem:[#allocation5 + $0x20] sm:$0xff] }
 0x4f5   : > { %4134 = vmatprep.mubr.bf16.mxu1 %v3380_v13  ;;  %v3389_v8 = vpack.c.bf16 %v3041_v19, %v3042_v28  ;;  %v2961_v26 = vrot.slane %v8824_v49, 6  ;;  %v8869_v4 = vpack.c.bf16 %v3085_v58, %v3086_v46  ;;  %v2753_v43 = vmax.f32 %v2711_v3, 0.0  ;;  %v6676_v13 = vld [vmem:[#allocation8 + $0x88] sm:$0xff]   ;;  %v6677_v19 = vld [vmem:[#allocation8 + $0x90] sm:$0xff]  }
 0x4f6   : > { %10350 = vst [vmem:[#allocation45_spill] sm:$0xff] %v8865_v52  ;;  %v2664_v17 = vmul.f32 %v8615_v0, %v8554_v56  ;;  %4135 = vmatmul.mubr.bf16.vlgmr.msra.gmra.mrb[0].mxu1 %v3379_v22  ;;  %v8873_v55 = vmul.f32 %v2796_v24, %v2754_v9  ;;  %v2714_v40 = vadd.f32 %v8624_v14, %v2665_v44  ;;  %v2875_v57 = vrot.slane %v8635_v48, 5 }
 0x4f7   : > { %4142 = vmatprep.mubr.bf16.mxu1 %v3389_v8  ;;  %4304 = vmatpush1.bf16.msra.mxu1 %v6675_v39  ;;  %v3039_v32 = vsel %vm540_vm0, %v2961_v26, %v10262_v33  ;;  %v10351_v9 = vrot.slane %v8644_v47, 6  ;;  %v8890_v3 = vmul.f32 %v2795_v18, %v2753_v43  ;;  %v10264_v28 = vrot.slane %v8812_v59, 5 }
 0x4f8   : > { %4305 = vmatprep.subr.bf16.mxu1 %v10317_v21  ;;  %v2957_v56 = vsel %vm455_vm1, %v2875_v57, %v2876_v5  ;;  %v2958_v22 = vsel %vm455_vm1, %v2916_v61, %v2875_v57  ;;  %v2713_v46 = vadd.f32 %v8624_v14, %v2664_v17  ;;  %v2756_v44 = vmax.f32 %v2714_v40, 0.0 }
 0x4f9   : > { %v3040_v24 = vsel %vm540_vm0, %v10351_v9, %v2961_v26  ;;  %10352 = vst [vmem:[#allocation46_spill] sm:$0xff] %v8890_v3  ;;  %v10265_v39 = vrot.slane %v8873_v55, 6  ;;  %v10260_v58 = vrot.slane %v8642_v1, 2  ;;  %v3246_v61 = vrot.slane %v8647_v37, 2  ;;  %v2798_v9 = vld [vmem:[#allocation5 + $0x38] sm:$0xff] }
 0x4fa   : > { %v3396_v53 = vpack.c.bf16 %v3039_v32, %v3040_v24  ;;  %v3388_v8 = vpack.c.bf16 %v2957_v56, %v2958_v22  ;;  %v3247_v26 = vrot.slane %v8695_v50, 2  ;;  %v3248_v43 = vrot.slane %v8706_v36, 2 }
 0x4fb   : > { %4306 = vmatpush1.bf16.msra.mxu1 %v6676_v13  ;;  %v3249_v17 = vrot.slane %v8752_v30, 2  ;;  %v2667_v18 = vmul.f32 %v8615_v0, %v8562_v12  ;;  %v8907_v40 = vsel %vm795_vm4, %v10260_v58, %v3246_v61  ;;  %v3250_v57 = vrot.slane %v8763_v29, 2  ;;  %v6678_v58 = vld [vmem:[#allocation8 + $0x98] sm:$0xff]  }
 0x4fc   : > { %4307 = vmatprep.subr.bf16.mxu1 %v10317_v21  ;;  %10353 = vst [vmem:[#allocation47_spill] sm:$0xff] %v8907_v40  ;;  %v10261_v32 = vrot.slane %v8806_v25, 2  ;;  %v2666_v13 = vmul.f32 %v8615_v0, %v8560_v54  ;;  %v8915_v56 = vsel %vm795_vm4, %v3246_v61, %v3247_v26  ;;  %v8923_v22 = vsel %vm795_vm4, %v3247_v26, %v3248_v43 }
 0x4fd   : > { %10354 = vst [vmem:[#allocation48_spill] sm:$0xff] %v8915_v56  ;;  %v8919_v12 = vsel %vm795_vm4, %v3248_v43, %v3249_v17  ;;  %10356 = vst [vmem:[#allocation50_spill] sm:$0xff] %v8923_v22  ;;  %v2877_v24 = vrot.slane %v8824_v49, 5  ;;  %v2755_v26 = vmax.f32 %v2713_v46, 0.0  ;;  %v2963_v43 = vrot.slane %v8890_v3, 6 }
 0x4fe   : > { %4143 = vmatmul.mubr.bf16.gmra.mrb[4].mxu1 %v3388_v8  ;;  %10355 = vst [vmem:[#allocation49_spill] sm:$0xff] %v8919_v12  ;;  %v8934_v8 = vsel %vm795_vm4, %v3250_v57, %v10261_v32  ;;  %v2716_v54 = vadd.f32 %v8624_v14, %v2667_v18  ;;  %v8949_v46 = vmul.f32 %v2798_v9, %v2756_v44  ;;  %v10359_v44 = vrot.slane %v8812_v59, 6 }
 0x4ff   : > { %4150 = vmatprep.mubr.bf16.mxu1 %v3396_v53  ;;  %4308 = vmatpush1.bf16.msra.mxu1 %v6677_v19  ;;  %10357 = vst [vmem:[#allocation51_spill] sm:$0xff] %v8934_v8  ;;  %v8940_v53 = vsel %vm795_vm4, %v3249_v17, %v3250_v57  ;;  %v2797_v19 = vld [vmem:[#allocation5 + $0x30] sm:$0xff]  ;;  %v2955_v61 = vsel %vm455_vm1, %v2877_v24, %v10264_v28  ;;  %v10368_v40 = vrot.slane %v8806_v25, 3 }
 0x500   : > { %4309 = vmatprep.subr.bf16.mxu1 %v10317_v21  ;;  %10358 = vst [vmem:[#allocation52_spill] sm:$0xff] %v8940_v53  ;;  %v3037_v33 = vsel %vm540_vm0, %v2963_v43, %v10265_v39  ;;  %v2715_v17 = vadd.f32 %v8624_v14, %v2666_v13  ;;  %v2956_v18 = vsel %vm455_vm1, %v2876_v5, %v2877_v24  ;;  %v6679_v57 = vld [vmem:[#allocation8 + $0xa0] sm:$0xff]   ;;  %v2758_v39 = vmax.f32 %v2716_v54, 0.0  ;;  %v2800_v5 = vld [vmem:[#allocation5 + $0x48] sm:$0xff] }
 0x501   : > { %v8958_v22 = vmul.f32 %v2797_v19, %v2755_v26  ;;  %v2668_v28 = vmul.f32 %v8615_v0, %v8566_v63  ;;  %v3395_v32 = vpack.c.bf16 %v2955_v61, %v2956_v18  ;;  %v3038_v9 = vsel %vm540_vm0, %v10359_v44, %v2963_v43  ;;  %v6680_v26 = vld [vmem:[#allocation8 + $0xa8] sm:$0xff]   ;;  %v2799_v43 = vld [vmem:[#allocation5 + $0x40] sm:$0xff] }
 0x502   : > { %v3403_v13 = vpack.c.bf16 %v3037_v33, %v3038_v9  ;;  %v2880_v53 = vrot.slane %v8873_v55, 5  ;;  %v2966_v24 = vrot.slane %v8949_v46, 6  ;;  %v2757_v63 = vmax.f32 %v2715_v17, 0.0 }
 0x503   : > { %4310 = vmatpush1.bf16.msra.mxu1 %v6678_v58  ;;  %v2669_v58 = vmul.f32 %v8615_v0, %v8568_v2  ;;  %v2879_v61 = vrot.slane %v8890_v3, 5  ;;  %v2717_v19 = vadd.f32 %v8624_v14, %v2668_v28  ;;  %v2965_v33 = vrot.slane %v8958_v22, 6 }
 0x504   : > { %4311 = vmatprep.subr.bf16.mxu1 %v10317_v21  ;;  %v8975_v54 = vmul.f32 %v2800_v5, %v2758_v39  ;;  %v8982_v18 = vmul.f32 %v2799_v43, %v2757_v63  ;;  %v10270_v44 = vrot.slane %v8949_v46, 5  ;;  %v6681_v39 = vld [vmem:[#allocation8 + $0xb0] sm:$0xff]   ;;  %v10361_v5 = vrot.slane %v8873_v55, 6  ;;  %v2801_v63 = vld [vmem:[#allocation5 + $0x50] sm:$0xff] }
 0x505   : > { %v2953_v2 = vsel %vm455_vm1, %v2879_v61, %v2880_v53  ;;  %v3035_v17 = vsel %vm540_vm0, %v2965_v33, %v2966_v24  ;;  %v2759_v9 = vmax.f32 %v2717_v19, 0.0  ;;  %v2881_v8 = vrot.slane %v8958_v22, 5  ;;  %v2802_v19 = vld [vmem:[#allocation5 + $0x58] sm:$0xff] }
 0x506   : > { %4151 = vmatmul.mubr.bf16.gmra.mrb[8].mxu1 %v3395_v32  ;;  %v2718_v32 = vadd.f32 %v8624_v14, %v2669_v58  ;;  %v3036_v58 = vsel %vm540_vm0, %v10361_v5, %v2965_v33  ;;  %v10269_v12 = vrot.slane %v8975_v54, 6 }
 0x507   : > { %4158 = vmatprep.mubr.bf16.mxu1 %v3403_v13  ;;  %4312 = vmatpush1.bf16.msra.mxu1 %v6679_v57  ;;  %v10360_v57 = vrot.slane %v8812_v59, 5  ;;  %v3410_v43 = vpack.c.bf16 %v3035_v17, %v3036_v58  ;;  %v2951_v33 = vsel %vm455_vm1, %v2881_v8, %v10270_v44  ;;  %v2967_v17 = vrot.slane %v8982_v18, 6  ;;  %v6684_v44 = vld [vmem:[#allocation8 + $0xc8] sm:$0xff]  }
 0x508   : > { %4313 = vmatprep.subr.bf16.mxu1 %v10317_v21  ;;  %v2883_v58 = vrot.slane %v8982_v18, 5 }
 0x509   : > { %v2954_v28 = vsel %vm455_vm1, %v10360_v57, %v2879_v61  ;;  %v2760_v61 = vmax.f32 %v2718_v32, 0.0  ;;  %v6682_v57 = vld [vmem:[#allocation8 + $0xb8] sm:$0xff]  }
 0x50a   : > { %v3402_v13 = vpack.c.bf16 %v2953_v2, %v2954_v28  ;;  %v2670_v2 = vmul.f32 %v8615_v0, %v8572_v10  ;;  %v9005_v28 = vmul.f32 %v2801_v63, %v2759_v9  ;;  %v3033_v10 = vsel %vm540_vm0, %v2967_v17, %v10269_v12  ;;  %v2804_v12 = vld [vmem:[#allocation5 + $0x68] sm:$0xff] }
 0x50b   : > { %4314 = vmatpush1.bf16.msra.mxu1 %v6680_v26  ;;  %v2671_v26 = vmul.f32 %v8615_v0, %v8574_v23  ;;  %v2952_v23 = vsel %vm455_vm1, %v2880_v53, %v2881_v8  ;;  %v9014_v32 = vmul.f32 %v2802_v19, %v2760_v61  ;;  %v3034_v9 = vsel %vm540_vm0, %v2966_v24, %v2967_v17  ;;  %v6683_v8 = vld [vmem:[#allocation8 + $0xc0] sm:$0xff]  }
 0x50c   : > { %4315 = vmatprep.subr.bf16.mxu1 %v10317_v21  ;;  %v3409_v5 = vpack.c.bf16 %v2951_v33, %v2952_v23  ;;  %v3417_v53 = vpack.c.bf16 %v3033_v10, %v3034_v9  ;;  %v10271_v61 = vrot.slane %v8642_v1, 3  ;;  %v3331_v19 = vrot.slane %v8695_v50, 3 }
 0x50d   : > { %v3333_v24 = vrot.slane %v8752_v30, 3  ;;  %v3334_v33 = vrot.slane %v8763_v29, 3  ;;  %v2970_v23 = vrot.slane %v9014_v32, 6  ;;  %v2672_v63 = vmul.f32 %v8615_v0, %v8576_v45  ;;  %v2818_v30 = vld [vmem:[#allocation5 + $0xd8] sm:$0xff] }
 0x50e   : > { %4159 = vmatmul.mubr.bf16.gmra.mrb[12].mxu1 %v3402_v13  ;;  %v2720_v13 = vadd.f32 %v8624_v14, %v2671_v26  ;;  %v3330_v26 = vrot.slane %v8647_v37, 3 }
 0x50f   : > { %4166 = vmatprep.mubr.bf16.mxu1 %v3410_v43  ;;  %4316 = vmatpush1.bf16.msra.mxu1 %v6681_v39  ;;  %v2719_v39 = vadd.f32 %v8624_v14, %v2670_v2  ;;  %v2969_v43 = vrot.slane %v9005_v28, 6  ;;  %v3332_v2 = vrot.slane %v8706_v36, 3 }
 0x510   : > { %4317 = vmatprep.subr.bf16.mxu1 %v10317_v21  ;;  %v2762_v17 = vmax.f32 %v2720_v13, 0.0  ;;  %v9037_v10 = vsel %vm880_vm5, %v10271_v61, %v3330_v26  ;;  %v9041_v13 = vsel %vm880_vm5, %v3330_v26, %v3331_v19  ;;  %v2803_v26 = vld [vmem:[#allocation5 + $0x60] sm:$0xff]  ;;  %v10367_v61 = vrot.slane %v8975_v54, 5 }
 0x511   : > { %10362 = vst [vmem:[#allocation53_spill] sm:$0xff] %v9037_v10  ;;  %v2761_v9 = vmax.f32 %v2719_v39, 0.0  ;;  %10363 = vst [vmem:[#allocation54_spill] sm:$0xff] %v9041_v13  ;;  %v9071_v39 = vsel %vm880_vm5, %v3334_v33, %v10368_v40  ;;  %v2721_v40 = vadd.f32 %v8624_v14, %v2672_v63  ;;  %v2886_v10 = vrot.slane %v9014_v32, 5 }
 0x512   : > { %10369 = vst [vmem:[#allocation58_spill] sm:$0xff] %v9071_v39  ;;  %v2885_v63 = vrot.slane %v9005_v28, 5  ;;  %v2677_v13 = vmul.f32 %v8615_v0, %v8586_v7 }
 0x513   : > { %4318 = vmatpush1.bf16.msra.mxu1 %v6682_v57  ;;  %v2673_v57 = vmul.f32 %v8615_v0, %v8578_v35  ;;  %v9045_v35 = vsel %vm880_vm5, %v3332_v2, %v3333_v24 }
 0x514   : > { %4319 = vmatprep.subr.bf16.mxu1 %v10317_v21  ;;  %10364 = vst [vmem:[#allocation55_spill] sm:$0xff] %v9045_v35  ;;  %v9084_v35 = vmul.f32 %v2803_v26, %v2761_v9  ;;  %v2806_v9 = vld [vmem:[#allocation5 + $0x78] sm:$0xff]  ;;  %v2763_v26 = vmax.f32 %v2721_v40, 0.0  ;;  %v10372_v40 = vrot.slane %v8975_v54, 5 }
 0x516   : > { %4167 = vmatmul.mubr.bf16.gmra.mrb[16].mxu1 %v3409_v5  ;;  %v2949_v5 = vsel %vm455_vm1, %v2883_v58, %v10367_v61  ;;  %v10370_v61 = vrot.slane %v8949_v46, 5 }
 0x517   : > { %4174 = vmatprep.mubr.bf16.mxu1 %v3417_v53  ;;  %4320 = vmatpush1.bf16.msra.mxu1 %v6683_v8  ;;  %v9055_v8 = vsel %vm880_vm5, %v3331_v19, %v3332_v2  ;;  %v9059_v53 = vsel %vm880_vm5, %v3333_v24, %v3334_v33  ;;  %v9073_v19 = vmul.f32 %v2804_v12, %v2762_v17  ;;  %v10371_v33 = vrot.slane %v8975_v54, 6 }
 0x518   : > { %4321 = vmatprep.subr.bf16.mxu1 %v10317_v21  ;;  %10365 = vst [vmem:[#allocation56_spill] sm:$0xff] %v9055_v8  ;;  %10366 = vst [vmem:[#allocation57_spill] sm:$0xff] %v9059_v53  ;;  %v2722_v2 = vadd.f32 %v8624_v14, %v2673_v57  ;;  %v3031_v24 = vsel %vm540_vm0, %v2969_v43, %v2970_v23  ;;  %v2950_v45 = vsel %vm455_vm1, %v10370_v61, %v2883_v58  ;;  %v6685_v8 = vld [vmem:[#allocation8 + $0xd0] sm:$0xff]  }
 0x519   : > { %v3416_v12 = vpack.c.bf16 %v2949_v5, %v2950_v45  ;;  %v3032_v17 = vsel %vm540_vm0, %v10371_v33, %v2969_v43  ;;  %v2972_v58 = vrot.slane %v9073_v19, 6  ;;  %v6686_v5 = vld [vmem:[#allocation8 + $0xd8] sm:$0xff]   ;;  %v2674_v43 = vmul.f32 %v8615_v0, %v8580_v38 }
 0x51a   : > { %v3424_v57 = vpack.c.bf16 %v3031_v24, %v3032_v17  ;;  %v2764_v53 = vmax.f32 %v2722_v2, 0.0  ;;  %v2971_v45 = vrot.slane %v9084_v35, 6  ;;  %v2805_v2 = vld [vmem:[#allocation5 + $0x70] sm:$0xff]  ;;  %v2948_v38 = vsel %vm455_vm1, %v10372_v40, %v2885_v63 }
 0x51b   : > { %4322 = vmatpush1.bf16.msra.mxu1 %v6684_v44  ;;  %v2675_v44 = vmul.f32 %v8615_v0, %v8582_v27  ;;  %v2947_v27 = vsel %vm455_vm1, %v2885_v63, %v2886_v10  ;;  %v9112_v33 = vmul.f32 %v2805_v2, %v2763_v26  ;;  %v2723_v17 = vadd.f32 %v8624_v14, %v2674_v43  ;;  %v6688_v43 = vld [vmem:[#allocation8 + $0xe8] sm:$0xff]  }
 0x51c   : > { %4323 = vmatprep.subr.bf16.mxu1 %v10317_v21  ;;  %v9103_v24 = vmul.f32 %v2806_v9, %v2764_v53  ;;  %v3030_v53 = vsel %vm540_vm0, %v2970_v23, %v2971_v45  ;;  %v2888_v9 = vrot.slane %v9073_v19, 5  ;;  %v2887_v26 = vrot.slane %v9084_v35, 5 }
 0x51d   : > { %v2724_v61 = vadd.f32 %v8624_v14, %v2675_v44  ;;  %v2765_v2 = vmax.f32 %v2723_v17, 0.0  ;;  %v2676_v23 = vmul.f32 %v8615_v0, %v8584_v62  ;;  %v6689_v62 = vld [vmem:[#allocation8 + $0xf0] sm:$0xff]  }
 0x51e   : > { %4175 = vmatmul.mubr.bf16.gmra.mrb[20].mxu1 %v3416_v12  ;;  %v6687_v12 = vld [vmem:[#allocation8 + $0xe0] sm:$0xff]   ;;  %v2974_v63 = vrot.slane %v9103_v24, 6  ;;  %v2945_v7 = vsel %vm455_vm1, %v2887_v26, %v2888_v9 }
 0x51f   : > { %4182 = vmatprep.mubr.bf16.mxu1 %v3424_v57  ;;  %4324 = vmatpush1.bf16.msra.mxu1 %v6685_v8  ;;  %v3029_v8 = vsel %vm540_vm0, %v2971_v45, %v2972_v58  ;;  %v3423_v57 = vpack.c.bf16 %v2947_v27, %v2948_v38  ;;  %v2766_v39 = vmax.f32 %v2724_v61, 0.0  ;;  %v2973_v45 = vrot.slane %v9112_v33, 6  ;;  %v2807_v27 = vld [vmem:[#allocation5 + $0x80] sm:$0xff] }
 0x520   : > { %4325 = vmatprep.subr.bf16.mxu1 %v10317_v21  ;;  %v3431_v44 = vpack.c.bf16 %v3029_v8, %v3030_v53  ;;  %v2726_v8 = vadd.f32 %v8624_v14, %v2677_v13  ;;  %v2946_v38 = vsel %vm455_vm1, %v2886_v10, %v2887_v26  ;;  %v2725_v17 = vadd.f32 %v8624_v14, %v2676_v23  ;;  %v2810_v26 = vld [vmem:[#allocation5 + $0x98] sm:$0xff] }
 0x521   : > { %v3027_v40 = vsel %vm540_vm0, %v2973_v45, %v2974_v63  ;;  %v3028_v53 = vsel %vm540_vm0, %v2972_v58, %v2973_v45  ;;  %v2890_v13 = vrot.slane %v9103_v24, 5  ;;  %v2678_v58 = vmul.f32 %v8615_v0, %v8588_v34 }
 0x522   : > { %v2767_v23 = vmax.f32 %v2725_v17, 0.0 }
 0x523   : > { %4326 = vmatpush1.bf16.msra.mxu1 %v6686_v5  ;;  %v2808_v5 = vld [vmem:[#allocation5 + $0x88] sm:$0xff] }
 0x524   : > { %4327 = vmatprep.subr.bf16.mxu1 %v10317_v21  ;;  %v9129_v61 = vmul.f32 %v2808_v5, %v2766_v39  ;;  %v3438_v39 = vpack.c.bf16 %v3027_v40, %v3028_v53  ;;  %v2679_v5 = vmul.f32 %v8615_v0, %v8590_v60 }
 0x526   : > { %4183 = vmatmul.mubr.bf16.gmra.mrb[24].mxu1 %v3423_v57  ;;  %v3430_v57 = vpack.c.bf16 %v2945_v7, %v2946_v38  ;;  %v2976_v10 = vrot.slane %v9129_v61, 6 }
 0x527   : > { %4190 = vmatprep.mubr.bf16.mxu1 %v3431_v44  ;;  %4328 = vmatpush1.bf16.msra.mxu1 %v6687_v12  ;;  %v9136_v12 = vmul.f32 %v2807_v27, %v2765_v2  ;;  %v2768_v44 = vmax.f32 %v2726_v8, 0.0  ;;  %v6690_v2 = vld [vmem:[#allocation8 + $0xf8] sm:$0xff]   ;;  %v2809_v27 = vld [vmem:[#allocation5 + $0x90] sm:$0xff]  ;;  %v2728_v8 = vadd.f32 %v8624_v14, %v2679_v5  ;;  %v2681_v5 = vmul.f32 %v8615_v0, %v8594_v15 }
 0x528   : > { %4329 = vmatprep.subr.bf16.mxu1 %v10317_v21  ;;  %v9160_v34 = vmul.f32 %v2809_v27, %v2767_v23 }
 0x529   : > { %v2975_v45 = vrot.slane %v9136_v12, 6  ;;  %v9153_v7 = vmul.f32 %v2810_v26, %v2768_v44  ;;  %v2770_v44 = vmax.f32 %v2728_v8, 0.0  ;;  %v2812_v26 = vld [vmem:[#allocation5 + $0xa8] sm:$0xff]  ;;  %v2730_v15 = vadd.f32 %v8624_v14, %v2681_v5 }
 0x52a   : > { %v2977_v23 = vrot.slane %v9160_v34, 6 }
 0x52b   : > { %4330 = vmatpush1.bf16.msra.mxu1 %v6688_v43  ;;  %v2889_v43 = vrot.slane %v9112_v33, 5  ;;  %v3025_v40 = vsel %vm540_vm0, %v2975_v45, %v2976_v10  ;;  %v9176_v27 = vmul.f32 %v2812_v26, %v2770_v44  ;;  %v2683_v44 = vmul.f32 %v8615_v0, %v8598_v16  ;;  %v2814_v26 = vld [vmem:[#allocation5 + $0xb8] sm:$0xff] }
 0x52c   : > { %4331 = vmatprep.subr.bf16.mxu1 %v10317_v21 }
 0x52d   : > { %v2943_v60 = vsel %vm455_vm1, %v2889_v43, %v2890_v13  ;;  %v2944_v38 = vsel %vm455_vm1, %v2888_v9, %v2889_v43  ;;  %v2978_v9 = vrot.slane %v9153_v7, 6  ;;  %v2891_v43 = vrot.slane %v9136_v12, 5 }
 0x52e   : > { %4191 = vmatmul.mubr.bf16.gmra.mrb[28].mxu1 %v3430_v57  ;;  %v3437_v17 = vpack.c.bf16 %v2943_v60, %v2944_v38  ;;  %v3026_v57 = vsel %vm540_vm0, %v2974_v63, %v2975_v45  ;;  %v2680_v63 = vmul.f32 %v8615_v0, %v8592_v41  ;;  %v2980_v5 = vrot.slane %v9176_v27, 6 }
 0x52f   : > { %4198 = vmatprep.mubr.bf16.mxu1 %v3438_v39  ;;  %4332 = vmatpush1.bf16.msra.mxu1 %v6689_v62  ;;  %v2727_v62 = vadd.f32 %v8624_v14, %v2678_v58  ;;  %v3445_v53 = vpack.c.bf16 %v3025_v40, %v3026_v57  ;;  %v2892_v39 = vrot.slane %v9129_v61, 5  ;;  %v2811_v58 = vld [vmem:[#allocation5 + $0xa0] sm:$0xff]  ;;  %v3023_v60 = vsel %vm540_vm0, %v2977_v23, %v2978_v9 }
 0x530   : > { %4333 = vmatprep.subr.bf16.mxu1 %v10317_v21  ;;  %v2942_v8 = vsel %vm455_vm1, %v2890_v13, %v2891_v43  ;;  %v2729_v41 = vadd.f32 %v8624_v14, %v2680_v63  ;;  %v2894_v57 = vrot.slane %v9153_v7, 5  ;;  %v2893_v13 = vrot.slane %v9160_v34, 5  ;;  %v2813_v63 = vld [vmem:[#allocation5 + $0xb0] sm:$0xff] }
 0x531   : > { %v2941_v45 = vsel %vm455_vm1, %v2891_v43, %v2892_v39  ;;  %v2732_v16 = vadd.f32 %v8624_v14, %v2683_v44 }
 0x532   : > { %v3444_v38 = vpack.c.bf16 %v2941_v45, %v2942_v8  ;;  %v2771_v43 = vmax.f32 %v2729_v41, 0.0 }
 0x533   : > { %4334 = vmatpush1.bf16.msra.mxu1 %v6690_v2  ;;  %v2769_v2 = vmax.f32 %v2727_v62, 0.0  ;;  %v3024_v62 = vsel %vm540_vm0, %v2976_v10, %v2977_v23  ;;  %v2939_v23 = vsel %vm455_vm1, %v2893_v13, %v2894_v57 }
 0x534   : > { %4504 = vmatprep.subr.bf16.mxu1 %v10317_v21 }
 0x535   : > { %v9183_v40 = vmul.f32 %v2811_v58, %v2769_v2  ;;  %v2682_v2 = vmul.f32 %v8615_v0, %v8596_v42 }
 0x536   : > { %4199 = vmatmul.mubr.bf16.gmra.mrb[32].mxu1 %v3437_v17  ;;  %v3452_v17 = vpack.c.bf16 %v3023_v60, %v3024_v62  ;;  %v9205_v60 = vmul.f32 %v2813_v63, %v2771_v43  ;;  %v2896_v62 = vrot.slane %v9176_v27, 5  ;;  %v10373_v43 = vld [vmem:[#allocation17_spill] sm:$0xff] }
 0x537   : > { %4206 = vmatprep.mubr.bf16.mxu1 %v3445_v53  ;;  %v2772_v53 = vmax.f32 %v2730_v15, 0.0  ;;  %v2979_v10 = vrot.slane %v9183_v40, 6  ;;  %v2940_v15 = vsel %vm455_vm1, %v2892_v39, %v2893_v13  ;;  %v2731_v42 = vadd.f32 %v8624_v14, %v2682_v2 }
 0x538   : > { %v3451_v8 = vpack.c.bf16 %v2939_v23, %v2940_v15  ;;  %v2895_v39 = vrot.slane %v9183_v40, 5  ;;  %v2684_v2 = vmul.f32 %v8615_v0, %v10373_v43  ;;  %v10374_v43 = vld [vmem:[#allocation19_spill] sm:$0xff] }
 0x539   : > { %v9198_v58 = vmul.f32 %v2814_v26, %v2772_v53  ;;  %v3021_v45 = vsel %vm540_vm0, %v2979_v10, %v2980_v5  ;;  %v3022_v41 = vsel %vm540_vm0, %v2978_v9, %v2979_v10  ;;  %v2685_v53 = vmul.f32 %v8615_v0, %v8602_v31  ;;  %v2816_v26 = vld [vmem:[#allocation5 + $0xc8] sm:$0xff]  ;;  %v2815_v10 = vld [vmem:[#allocation5 + $0xc0] sm:$0xff] }
 0x53a   : > { %v2773_v13 = vmax.f32 %v2731_v42, 0.0  ;;  %v2981_v9 = vrot.slane %v9205_v60, 6  ;;  %v2937_v63 = vsel %vm455_vm1, %v2895_v39, %v2896_v62  ;;  %v2733_v42 = vadd.f32 %v8624_v14, %v2684_v2  ;;  %v2817_v2 = vld [vmem:[#allocation5 + $0xd0] sm:$0xff] }
 0x53b   : > { %v2982_v44 = vrot.slane %v9198_v58, 6  ;;  %v2734_v31 = vadd.f32 %v8624_v14, %v2685_v53  ;;  %v2687_v53 = vmul.f32 %v8615_v0, %v10374_v43  ;;  %v10375_v14 = vld [vmem:[#allocation18_spill] sm:$0xff]  ;;  %v6783_v43 = vld [vmem:[%s10219_s3] ss:$0 sm:$0xff] }
 0x53c   : > { %v9227_v15 = vmul.f32 %v2815_v10, %v2773_v13  ;;  %v2686_v13 = vmul.f32 %v8615_v0, %v10375_v14 }
 0x53e   : > { %4207 = vmatmul.mubr.bf16.gmra.mrb[36].mxu1 %v3444_v38  ;;  %v3459_v38 = vpack.c.bf16 %v3021_v45, %v3022_v41  ;;  %v2938_v45 = vsel %vm455_vm1, %v2894_v57, %v2895_v39  ;;  %v3020_v41 = vsel %vm540_vm0, %v2980_v5, %v2981_v9  ;;  %v2897_v57 = vrot.slane %v9205_v60, 5 }
 0x53f   : > { %4214 = vmatprep.mubr.bf16.mxu1 %v3452_v17  ;;  %v2774_v17 = vmax.f32 %v2732_v16, 0.0  ;;  %v3019_v16 = vsel %vm540_vm0, %v2981_v9, %v2982_v44  ;;  %v2775_v39 = vmax.f32 %v2733_v42, 0.0  ;;  %v2983_v5 = vrot.slane %v9227_v15, 6 }
 0x541   : > { %v9220_v23 = vmul.f32 %v2816_v26, %v2774_v17  ;;  %v2898_v17 = vrot.slane %v9198_v58, 5  ;;  %v2776_v26 = vmax.f32 %v2734_v31, 0.0  ;;  %v9251_v0 = vmul.f32 %v2817_v2, %v2775_v39  ;;  %v10377_v2 = vld [vmem:[#allocation20_spill] sm:$0xff] }
 0x542   : > { %v2899_v39 = vrot.slane %v9227_v15, 5 }
 0x543   : > { %v2984_v56 = vrot.slane %v9220_v23, 6  ;;  %v2935_v9 = vsel %vm455_vm1, %v2897_v57, %v2898_v17  ;;  %v9242_v10 = vmul.f32 %v2818_v30, %v2776_v26 }
 0x545   : > { %v2902_v25 = vrot.slane %v9242_v10, 5 }
 0x546   : > { %4215 = vmatmul.mubr.bf16.gmra.mrb[40].mxu1 %v3451_v8  ;;  %v3458_v8 = vpack.c.bf16 %v2937_v63, %v2938_v45  ;;  %v6782_v63 = vld [vmem:[%s10220_s4] ss:$0 sm:$0xff]  ;;  %v2936_v45 = vsel %vm455_vm1, %v2896_v62, %v2897_v57  ;;  %v2986_v62 = vrot.slane %v9242_v10, 6  ;;  %v2820_v57 = vld [vmem:[#allocation5 + $0xe8] sm:$0xff] }
 0x547   : > { %4222 = vmatprep.mubr.bf16.mxu1 %v3459_v38  ;;  %v3466_v38 = vpack.c.bf16 %v3019_v16, %v3020_v41  ;;  %v2736_v31 = vadd.f32 %v6782_v63, %v2687_v53  ;;  %v3017_v16 = vsel %vm540_vm0, %v2983_v5, %v2984_v56  ;;  %v2735_v42 = vadd.f32 %v6782_v63, %v2686_v13  ;;  %v10376_v53 = vld [vmem:[#allocation21_spill] sm:$0xff] }
 0x548   : > { %v3018_v41 = vsel %vm540_vm0, %v2982_v44, %v2983_v5  ;;  %v2689_v14 = vmul.f32 %v6783_v43, %v10376_v53  ;;  %v2688_v44 = vmul.f32 %v6783_v43, %v10377_v2  ;;  %v2985_v5 = vrot.slane %v9251_v0, 6 }
 0x549   : > { %v3473_v30 = vpack.c.bf16 %v3017_v16, %v3018_v41  ;;  %v2778_v26 = vmax.f32 %v2736_v31, 0.0  ;;  %v2777_v13 = vmax.f32 %v2735_v42, 0.0  ;;  %v2934_v41 = vsel %vm455_vm1, %v2898_v17, %v2899_v39  ;;  %v10378_v17 = vld [vmem:[#allocation22_spill] sm:$0xff] }
 0x54a   : > { %v2737_v42 = vadd.f32 %v6782_v63, %v2688_v44  ;;  %v3016_v2 = vsel %vm540_vm0, %v2984_v56, %v2985_v5  ;;  %v2821_v44 = vld [vmem:[#allocation5 + $0xf0] sm:$0xff] }
 0x54b   : > { %v9266_v16 = vmul.f32 %v2820_v57, %v2778_v26  ;;  %v2901_v57 = vrot.slane %v9251_v0, 5 }
 0x54c   : > { %v2779_v50 = vmax.f32 %v2737_v42, 0.0 }
 0x54d   : > { %v2988_v26 = vrot.slane %v9266_v16, 6  ;;  %v2931_v56 = vsel %vm455_vm1, %v2901_v57, %v2902_v25  ;;  %v2904_v42 = vrot.slane %v9266_v16, 5 }
 0x54e   : > { %4223 = vmatmul.mubr.bf16.gmra.mrb[44].mxu1 %v3458_v8  ;;  %v3465_v8 = vpack.c.bf16 %v2935_v9, %v2936_v45  ;;  %v2819_v9 = vld [vmem:[#allocation5 + $0xe0] sm:$0xff]  ;;  %v2738_v45 = vadd.f32 %v6782_v63, %v2689_v14  ;;  %v2822_v14 = vld [vmem:[#allocation5 + $0xf8] sm:$0xff] }
 0x54f   : > { %4230 = vmatprep.mubr.bf16.mxu1 %v3466_v38  ;;  %v2900_v38 = vrot.slane %v9220_v23, 5 }
 0x550   : > { %v2780_v52 = vmax.f32 %v2738_v45, 0.0 }
 0x551   : > { %v2933_v31 = vsel %vm455_vm1, %v2899_v39, %v2900_v38  ;;  %v2690_v39 = vmul.f32 %v6783_v43, %v10378_v17 }
 0x552   : > { %v3472_v53 = vpack.c.bf16 %v2933_v31, %v2934_v41  ;;  %v2932_v31 = vsel %vm455_vm1, %v2900_v38, %v2901_v57  ;;  %v2823_v38 = vld [vmem:[#allocation5 + $0x100] sm:$0xff] }
 0x553   : > { %v2739_v45 = vadd.f32 %v6782_v63, %v2690_v39 }
 0x556   : > { %4231 = vmatmul.mubr.bf16.gmra.mrb[48].mxu1 %v3465_v8  ;;  %v3015_v8 = vsel %vm540_vm0, %v2985_v5, %v2986_v62  ;;  %v9283_v5 = vmul.f32 %v2822_v14, %v2780_v52 }
 0x557   : > { %4238 = vmatprep.mubr.bf16.mxu1 %v3473_v30  ;;  %v9272_v30 = vmul.f32 %v2819_v9, %v2777_v13  ;;  %v3480_v29 = vpack.c.bf16 %v3015_v8, %v3016_v2  ;;  %v3479_v8 = vpack.c.bf16 %v2931_v56, %v2932_v31  ;;  %v2781_v2 = vmax.f32 %v2739_v45, 0.0  ;;  %v10379_v45 = vld [vmem:[#allocation23_spill] sm:$0xff] }
 0x558   : > { %v2990_v52 = vrot.slane %v9283_v5, 6 }
 0x559   : > { %v2987_v13 = vrot.slane %v9272_v30, 6  ;;  %v9303_v57 = vmul.f32 %v2823_v38, %v2781_v2 }
 0x55b   : > { %v3013_v9 = vsel %vm540_vm0, %v2987_v13, %v2988_v26  ;;  %v3014_v43 = vsel %vm540_vm0, %v2986_v62, %v2987_v13  ;;  %v2907_v2 = vrot.slane %v9303_v57, 5 }
 0x55c   : > { %v3487_v41 = vpack.c.bf16 %v3013_v9, %v3014_v43  ;;  %v2991_v9 = vrot.slane %v9303_v57, 6 }
 0x55e   : > { %4239 = vmatmul.mubr.bf16.gmra.mrb[52].mxu1 %v3472_v53  ;;  %v2903_v53 = vrot.slane %v9272_v30, 5 }
 0x55f   : > { %4246 = vmatprep.mubr.bf16.mxu1 %v3480_v29  ;;  %v9289_v29 = vmul.f32 %v2821_v44, %v2779_v50  ;;  %v2906_v44 = vrot.slane %v9283_v5, 5 }
 0x560   : > { %v2929_v50 = vsel %vm455_vm1, %v2903_v53, %v2904_v42  ;;  %v2930_v62 = vsel %vm455_vm1, %v2902_v25, %v2903_v53  ;;  %v10380_v25 = vrot.slane %v10379_v45, 6 }
 0x561   : > { %v2989_v14 = vrot.slane %v9289_v29, 6  ;;  %v3486_v17 = vpack.c.bf16 %v2929_v50, %v2930_v62  ;;  %v2905_v56 = vrot.slane %v9289_v29, 5  ;;  %v2926_v50 = vsel %vm455_vm1, %v2906_v44, %v2907_v2  ;;  %v10383_v62 = vld [vmem:[#allocation25_spill] sm:$0xff] }
 0x563   : > { %v3011_v63 = vsel %vm540_vm0, %v2989_v14, %v2990_v52  ;;  %v3012_v39 = vsel %vm540_vm0, %v2988_v26, %v2989_v14  ;;  %v2927_v31 = vsel %vm455_vm1, %v2905_v56, %v2906_v44  ;;  %v2928_v26 = vsel %vm455_vm1, %v2904_v42, %v2905_v56  ;;  %v10382_v42 = vld [vmem:[#allocation26_spill] sm:$0xff]  ;;  %v10388_v56 = vld [vmem:[#allocation33_spill] sm:$0xff] }
 0x564   : > { %v3494_v13 = vpack.c.bf16 %v3011_v63, %v3012_v39  ;;  %v3493_v43 = vpack.c.bf16 %v2927_v31, %v2928_v26  ;;  %v10381_v14 = vrot.slane %v10379_v45, 5  ;;  %v10386_v39 = vld [vmem:[#allocation27_spill] sm:$0xff]  ;;  %v10394_v44 = vpack.c.bf16 %v8792_v11, %v8780_v20 }
 0x565   : > { %v3046_v11 = vrot.slane %v8812_v59, 7  ;;  %v3045_v20 = vrot.slane %v8824_v49, 7 }
 0x566   : > { %4247 = vmatmul.mubr.bf16.gmra.mrb[56].mxu1 %v3479_v8  ;;  %v3009_v8 = vsel %vm540_vm0, %v2991_v9, %v10380_v25  ;;  %v2925_v38 = vsel %vm455_vm1, %v2907_v2, %v10381_v14  ;;  %v10391_v25 = vld [vmem:[#allocation34_spill] sm:$0xff] }
 0x567   : > { %4254 = vmatprep.mubr.bf16.mxu1 %v3487_v41  ;;  %v3010_v41 = vsel %vm540_vm0, %v2990_v52, %v2991_v9  ;;  %v3500_v63 = vpack.c.bf16 %v2925_v38, %v2926_v50  ;;  %v10385_v52 = vld [vmem:[#allocation28_spill] sm:$0xff]  ;;  %v10389_v9 = vld [vmem:[#allocation31_spill] sm:$0xff] }
 0x568   : > { %v3501_v53 = vpack.c.bf16 %v3009_v8, %v3010_v41  ;;  %v10390_v31 = vpack.c.bf16 %v10388_v56, %v10389_v9  ;;  %v10392_v8 = vld [vmem:[#allocation32_spill] sm:$0xff]  ;;  %v3044_v41 = vrot.slane %v8644_v47, 7  ;;  %v6692_v56 = vld [vmem:[#allocation8 + $0x108] sm:$0xff]   ;;  %v3047_v9 = vrot.slane %v8890_v3, 7 }
 0x569   : > { %v10393_v26 = vpack.c.bf16 %v10391_v25, %v10392_v8  ;;  %v10396_v50 = vld [vmem:[#allocation40_spill] sm:$0xff]  ;;  %v6693_v25 = vld [vmem:[#allocation8 + $0x110] sm:$0xff]  }
 0x56a   : > { %v3122_v8 = vsel %vm625_vm2, %v3046_v11, %v3047_v9 }
 0x56e   : > { %4255 = vmatmul.mubr.bf16.gmra.mrb[60].mxu1 %v3486_v17  ;;  %v10384_v17 = vpack.c.bf16 %v10382_v42, %v10383_v62  ;;  %v3123_v62 = vsel %vm625_vm2, %v3045_v20, %v3046_v11 }
 0x56f   : > { %4262 = vmatprep.mubr.bf16.mxu1 %v3494_v13  ;;  %v10387_v13 = vpack.c.bf16 %v10385_v52, %v10386_v39  ;;  %v3124_v52 = vsel %vm625_vm2, %v3044_v41, %v3045_v20  ;;  %v6697_v20 = vld [vmem:[#allocation8 + $0x130] sm:$0xff]  }
 0x570   : > { %v3390_v39 = vpack.c.bf16 %v3123_v62, %v3124_v52  ;;  %v3054_v52 = vrot.slane %v9014_v32, 7 }
 0x576   : > { %4263 = vmatmul.mubr.bf16.gmra.mrb[64].mxu1 %v3493_v43  ;;  %v3043_v43 = vrot.slane %v8635_v48, 7 }
 0x577   : > { %4270 = vmatprep.mubr.bf16.mxu1 %v3501_v53  ;;  %v10395_v53 = vrot.slane %v8819_v51, 7 }
 0x578   : > { %v3125_v14 = vsel %vm625_vm2, %v3043_v43, %v3044_v41  ;;  %v3049_v41 = vrot.slane %v8958_v22, 7 }
 0x579   : > { %v3126_v2 = vsel %vm625_vm2, %v10395_v53, %v3043_v43  ;;  %v6694_v43 = vld [vmem:[#allocation8 + $0x118] sm:$0xff]  }
 0x57a   : > { %v3382_v38 = vpack.c.bf16 %v3125_v14, %v3126_v2  ;;  %v6695_v2 = vld [vmem:[#allocation8 + $0x120] sm:$0xff]  }
 0x57e   : > { %4271 = vmatmul.mubr.bf16.gmra.mrb[68].mxu1 %v3500_v63  ;;  %v10397_v63 = vld [vmem:[#allocation39_spill] sm:$0xff] }
 0x57f   : > { %4278 = vmatprep.mubr.bf16.mxu1 %v10384_v17  ;;  %v10398_v42 = vpack.c.bf16 %v10396_v50, %v10397_v63  ;;  %v6691_v17 = vld [vmem:[#allocation8 + $0x100] sm:$0xff]   ;;  %v3052_v50 = vrot.slane %v8975_v54, 7  ;;  %v6696_v63 = vld [vmem:[#allocation8 + $0x128] sm:$0xff]  }
 0x586   : > { %4279 = vmatmul.mubr.bf16.gmra.mrb[72].mxu1 %v10387_v13  ;;  %v3048_v13 = vrot.slane %v8873_v55, 7 }
 0x587   : > { %4286 = vmatprep.mubr.bf16.mxu1 %v10390_v31 }
 0x588   : > { %v3121_v31 = vsel %vm625_vm2, %v3047_v9, %v3048_v13  ;;  %v3120_v14 = vsel %vm625_vm2, %v3048_v13, %v3049_v41  ;;  %v3053_v13 = vrot.slane %v9005_v28, 7  ;;  %v6699_v9 = vld [vmem:[#allocation8 + $0x140] sm:$0xff]  }
 0x58e   : > { %4287 = vmatmul.mubr.bf16.gmra.mrb[76].mxu1 %v10393_v26  ;;  %v3397_v26 = vpack.c.bf16 %v3121_v31, %v3122_v8  ;;  %v3116_v31 = vsel %vm625_vm2, %v3052_v50, %v3053_v13  ;;  %v3056_v8 = vrot.slane %v9073_v19, 7 }
 0x58f   : > { %4294 = vmatprep.mubr.bf16.mxu1 %v10394_v44  ;;  %v3050_v44 = vrot.slane %v8949_v46, 7 }
 0x591   : > { %v3119_v53 = vsel %vm625_vm2, %v3049_v41, %v3050_v44  ;;  %v6701_v41 = vld [vmem:[#allocation8 + $0x150] sm:$0xff]  }
 0x596   : > { %4295 = vmatmul.mubr.bf16.gmra.mrb[80].mxu1 %v10398_v42  ;;  %v3051_v42 = vrot.slane %v8982_v18, 7 }
 0x597   : > { %4335 = vmatprep.mubr.bf16.mxu1 %v3382_v38 }
 0x598   : > { %v3117_v11 = vsel %vm625_vm2, %v3051_v42, %v3052_v50  ;;  %v3118_v62 = vsel %vm625_vm2, %v3050_v44, %v3051_v42  ;;  %v3055_v44 = vrot.slane %v9084_v35, 7  ;;  %v3057_v50 = vrot.slane %v9112_v33, 7  ;;  %v6703_v42 = vld [vmem:[#allocation8 + $0x160] sm:$0xff]  }
 0x59e   : > { %4336 = vmatmul.mubr.bf16.vlgmr.msra.gmra.mrb[0].mxu1 %v8869_v4 }
 0x59f   : > { %4343 = vmatprep.mubr.bf16.mxu1 %v3390_v39  ;;  %4505 = vmatpush1.bf16.msra.mxu1 %v6691_v17  ;;  %v3411_v17 = vpack.c.bf16 %v3117_v11, %v3118_v62  ;;  %v3112_v11 = vsel %vm625_vm2, %v3056_v8, %v3057_v50  ;;  %v3060_v62 = vrot.slane %v9129_v61, 7 }
 0x5a0   : > { %4506 = vmatprep.subr.bf16.mxu1 %v10317_v21 }
 0x5a3   : > { %4507 = vmatpush1.bf16.msra.mxu1 %v6692_v56  ;;  %v3115_v56 = vsel %vm625_vm2, %v3053_v13, %v3054_v52  ;;  %v6705_v13 = vld [vmem:[#allocation8 + $0x170] sm:$0xff]  }
 0x5a4   : > { %4508 = vmatprep.subr.bf16.mxu1 %v10317_v21 }
 0x5a6   : > { %4344 = vmatmul.mubr.bf16.gmra.mrb[4].mxu1 %v3382_v38  ;;  %v3404_v38 = vpack.c.bf16 %v3119_v53, %v3120_v14  ;;  %v3114_v53 = vsel %vm625_vm2, %v3054_v52, %v3055_v44  ;;  %v3058_v14 = vrot.slane %v9103_v24, 7  ;;  %v3059_v52 = vrot.slane %v9136_v12, 7 }
 0x5a7   : > { %4351 = vmatprep.mubr.bf16.mxu1 %v3397_v26  ;;  %4509 = vmatpush1.bf16.msra.mxu1 %v6693_v25  ;;  %v3418_v25 = vpack.c.bf16 %v3115_v56, %v3116_v31  ;;  %v3062_v31 = vrot.slane %v9153_v7, 7 }
 0x5a8   : > { %4510 = vmatprep.subr.bf16.mxu1 %v10317_v21  ;;  %v3110_v56 = vsel %vm625_vm2, %v3058_v14, %v3059_v52 }
 0x5ab   : > { %4511 = vmatpush1.bf16.msra.mxu1 %v6694_v43  ;;  %v3113_v43 = vsel %vm625_vm2, %v3055_v44, %v3056_v8  ;;  %v3061_v8 = vrot.slane %v9160_v34, 7 }
 0x5ac   : > { %4512 = vmatprep.subr.bf16.mxu1 %v10317_v21 }
 0x5ad   : > { %v3108_v44 = vsel %vm625_vm2, %v3060_v62, %v3061_v8 }
 0x5ae   : > { %4352 = vmatmul.mubr.bf16.gmra.mrb[8].mxu1 %v3390_v39  ;;  %v6698_v39 = vld [vmem:[#allocation8 + $0x138] sm:$0xff]  }
 0x5af   : > { %4359 = vmatprep.mubr.bf16.mxu1 %v3404_v38  ;;  %4513 = vmatpush1.bf16.msra.mxu1 %v6695_v2  ;;  %v3425_v2 = vpack.c.bf16 %v3113_v43, %v3114_v53  ;;  %v3063_v53 = vrot.slane %v9183_v40, 7 }
 0x5b0   : > { %4514 = vmatprep.subr.bf16.mxu1 %v10317_v21 }
 0x5b3   : > { %4515 = vmatpush1.bf16.msra.mxu1 %v6696_v63  ;;  %v3111_v63 = vsel %vm625_vm2, %v3057_v50, %v3058_v14  ;;  %v3106_v14 = vsel %vm625_vm2, %v3062_v31, %v3063_v53  ;;  %v3066_v50 = vrot.slane %v9198_v58, 7 }
 0x5b4   : > { %4516 = vmatprep.subr.bf16.mxu1 %v10317_v21 }
 0x5b6   : > { %4360 = vmatmul.mubr.bf16.gmra.mrb[12].mxu1 %v3397_v26  ;;  %v6700_v26 = vld [vmem:[#allocation8 + $0x148] sm:$0xff]  }
 0x5b7   : > { %4367 = vmatprep.mubr.bf16.mxu1 %v3411_v17  ;;  %4517 = vmatpush1.bf16.msra.mxu1 %v6697_v20  ;;  %v3432_v20 = vpack.c.bf16 %v3111_v63, %v3112_v11  ;;  %v3065_v63 = vrot.slane %v9205_v60, 7 }
 0x5b8   : > { %4518 = vmatprep.subr.bf16.mxu1 %v10317_v21 }
 0x5bb   : > { %4519 = vmatpush1.bf16.msra.mxu1 %v6698_v39  ;;  %v3109_v39 = vsel %vm625_vm2, %v3059_v52, %v3060_v62  ;;  %v3068_v62 = vrot.slane %v9220_v23, 7 }
 0x5bc   : > { %4520 = vmatprep.subr.bf16.mxu1 %v10317_v21 }
 0x5be   : > { %4368 = vmatmul.mubr.bf16.gmra.mrb[16].mxu1 %v3404_v38  ;;  %v6702_v38 = vld [vmem:[#allocation8 + $0x158] sm:$0xff]  }
 0x5bf   : > { %4375 = vmatprep.mubr.bf16.mxu1 %v3418_v25  ;;  %4521 = vmatpush1.bf16.msra.mxu1 %v6699_v9  ;;  %v3439_v9 = vpack.c.bf16 %v3109_v39, %v3110_v56  ;;  %v3070_v56 = vrot.slane %v9242_v10, 7 }
 0x5c0   : > { %4522 = vmatprep.subr.bf16.mxu1 %v10317_v21 }
 0x5c3   : > { %4523 = vmatpush1.bf16.msra.mxu1 %v6700_v26  ;;  %v3107_v26 = vsel %vm625_vm2, %v3061_v8, %v3062_v31 }
 0x5c4   : > { %4524 = vmatprep.subr.bf16.mxu1 %v10317_v21  ;;  %v3446_v43 = vpack.c.bf16 %v3107_v26, %v3108_v44  ;;  %v3072_v26 = vrot.slane %v9266_v16, 7  ;;  %v3071_v44 = vrot.slane %v9272_v30, 7 }
 0x5c6   : > { %4376 = vmatmul.mubr.bf16.gmra.mrb[20].mxu1 %v3411_v17  ;;  %v6704_v17 = vld [vmem:[#allocation8 + $0x168] sm:$0xff]  }
 0x5c7   : > { %4383 = vmatprep.mubr.bf16.mxu1 %v3425_v2  ;;  %4525 = vmatpush1.bf16.msra.mxu1 %v6701_v41  ;;  %v3064_v41 = vrot.slane %v9176_v27, 7 }
 0x5c8   : > { %4526 = vmatprep.subr.bf16.mxu1 %v10317_v21 }
 0x5c9   : > { %v3104_v11 = vsel %vm625_vm2, %v3064_v41, %v3065_v63 }
 0x5cb   : > { %4527 = vmatpush1.bf16.msra.mxu1 %v6702_v38 }
 0x5cc   : > { %4528 = vmatprep.subr.bf16.mxu1 %v10317_v21 }
 0x5ce   : > { %4384 = vmatmul.mubr.bf16.gmra.mrb[24].mxu1 %v3418_v25  ;;  %v6706_v25 = vld [vmem:[#allocation8 + $0x178] sm:$0xff]  }
 0x5cf   : > { %4391 = vmatprep.mubr.bf16.mxu1 %v3432_v20  ;;  %4529 = vmatpush1.bf16.msra.mxu1 %v6703_v42  ;;  %v3103_v42 = vsel %vm625_vm2, %v3065_v63, %v3066_v50 }
 0x5d0   : > { %4530 = vmatprep.subr.bf16.mxu1 %v10317_v21 }
 0x5d3   : > { %4531 = vmatpush1.bf16.msra.mxu1 %v6704_v17  ;;  %v3067_v17 = vrot.slane %v9227_v15, 7 }
 0x5d4   : > { %4532 = vmatprep.subr.bf16.mxu1 %v10317_v21 }
 0x5d5   : > { %v3101_v52 = vsel %vm625_vm2, %v3067_v17, %v3068_v62  ;;  %v3102_v39 = vsel %vm625_vm2, %v3066_v50, %v3067_v17 }
 0x5d6   : > { %4392 = vmatmul.mubr.bf16.gmra.mrb[28].mxu1 %v3425_v2  ;;  %v3105_v2 = vsel %vm625_vm2, %v3063_v53, %v3064_v41  ;;  %v3098_v41 = vsel %vm625_vm2, %v3070_v56, %v3071_v44 }
 0x5d7   : > { %4399 = vmatprep.mubr.bf16.mxu1 %v3439_v9  ;;  %4533 = vmatpush1.bf16.msra.mxu1 %v6705_v13  ;;  %v3453_v38 = vpack.c.bf16 %v3105_v2, %v3106_v14  ;;  %v3467_v13 = vpack.c.bf16 %v3101_v52, %v3102_v39  ;;  %v3074_v2 = vrot.slane %v9283_v5, 7  ;;  %v3073_v14 = vrot.slane %v9289_v29, 7  ;;  %v10400_v52 = vld [vmem:[#allocation30_spill] sm:$0xff]  ;;  %v10401_v39 = vld [vmem:[#allocation37_spill] sm:$0xff] }
 0x5d8   : > { %4534 = vmatprep.subr.bf16.mxu1 %v10317_v21 }
 0x5d9   : > { %v3096_v50 = vsel %vm625_vm2, %v3072_v26, %v3073_v14 }
 0x5db   : > { %4535 = vmatpush1.bf16.msra.mxu1 %v6706_v25 }
 0x5dc   : > { %4705 = vmatprep.subr.bf16.mxu1 %v10317_v21 }
 0x5de   : > { %4400 = vmatmul.mubr.bf16.gmra.mrb[32].mxu1 %v3432_v20  ;;  %v3460_v20 = vpack.c.bf16 %v3103_v42, %v3104_v11  ;;  %v3075_v42 = vrot.slane %v9303_v57, 7  ;;  %v10399_v11 = vrot.slane %v10379_v45, 7 }
 0x5df   : > { %4407 = vmatprep.mubr.bf16.mxu1 %v3446_v43 }
 0x5e6   : > { %4408 = vmatmul.mubr.bf16.gmra.mrb[36].mxu1 %v3439_v9  ;;  %v3069_v9 = vrot.slane %v9251_v0, 7 }
 0x5e7   : > { %4415 = vmatprep.mubr.bf16.mxu1 %v3453_v38 }
 0x5e8   : > { %v3099_v31 = vsel %vm625_vm2, %v3069_v9, %v3070_v56  ;;  %v3100_v25 = vsel %vm625_vm2, %v3068_v62, %v3069_v9  ;;  %v3094_v62 = vsel %vm625_vm2, %v3074_v2, %v3075_v42  ;;  %v3129_v56 = vrot.slane %v8824_v49, 1 }
 0x5e9   : > { %v3474_v8 = vpack.c.bf16 %v3099_v31, %v3100_v25  ;;  %v3128_v9 = vrot.slane %v8644_v47, 1  ;;  %v10286_v31 = vrot.slane %v8635_v48, 1 }
 0x5eb   : > { %v3208_v25 = vsel %vm710_vm3, %v3128_v9, %v3129_v56 }
 0x5ee   : > { %4416 = vmatmul.mubr.bf16.gmra.mrb[40].mxu1 %v3446_v43  ;;  %v3097_v43 = vsel %vm625_vm2, %v3071_v44, %v3072_v26  ;;  %v3131_v44 = vrot.slane %v8890_v3, 1 }
 0x5ef   : > { %4423 = vmatprep.mubr.bf16.mxu1 %v3460_v20  ;;  %v3481_v53 = vpack.c.bf16 %v3097_v43, %v3098_v41  ;;  %v6707_v41 = vld [vmem:[#allocation8 + $0x180] sm:$0xff]  }
 0x5f6   : > { %4424 = vmatmul.mubr.bf16.gmra.mrb[44].mxu1 %v3453_v38  ;;  %v3095_v38 = vsel %vm625_vm2, %v3073_v14, %v3074_v2 }
 0x5f7   : > { %4431 = vmatprep.mubr.bf16.mxu1 %v3467_v13  ;;  %v3488_v63 = vpack.c.bf16 %v3095_v38, %v3096_v50  ;;  %v3133_v38 = vrot.slane %v8958_v22, 1  ;;  %v6708_v50 = vld [vmem:[#allocation8 + $0x188] sm:$0xff]  }
 0x5fe   : > { %4432 = vmatmul.mubr.bf16.gmra.mrb[48].mxu1 %v3460_v20  ;;  %v3093_v20 = vsel %vm625_vm2, %v3075_v42, %v10399_v11  ;;  %v6709_v11 = vld [vmem:[#allocation8 + $0x190] sm:$0xff]  }
 0x5ff   : > { %4439 = vmatprep.mubr.bf16.mxu1 %v3474_v8  ;;  %v3495_v17 = vpack.c.bf16 %v3093_v20, %v3094_v62  ;;  %v3391_v20 = vpack.c.bf16 %v8812_v59, %v8824_v49 }
 0x606   : > { %4440 = vmatmul.mubr.bf16.gmra.mrb[52].mxu1 %v3467_v13  ;;  %v10402_v13 = vld [vmem:[#allocation42_spill] sm:$0xff] }
 0x607   : > { %4447 = vmatprep.mubr.bf16.mxu1 %v3481_v53 }
 0x60e   : > { %4448 = vmatmul.mubr.bf16.gmra.mrb[56].mxu1 %v3474_v8  ;;  %v3209_v8 = vsel %vm710_vm3, %v10286_v31, %v3128_v9  ;;  %v6711_v9 = vld [vmem:[#allocation8 + $0x1a0] sm:$0xff]  }
 0x60f   : > { %4455 = vmatprep.mubr.bf16.mxu1 %v3488_v63  ;;  %v9482_v26 = vpack.c.bf16 %v3208_v25, %v3209_v8  ;;  %v3398_v25 = vpack.c.bf16 %v8873_v55, %v8890_v3 }
 0x611   : > { %10403 = vst [vmem:[#allocation17_spill] sm:$0xff] %v9482_v26 }
 0x616   : > { %4456 = vmatmul.mubr.bf16.gmra.mrb[60].mxu1 %v3481_v53  ;;  %v3383_v53 = vpack.c.bf16 %v8644_v47, %v8635_v48 }
 0x617   : > { %4463 = vmatprep.mubr.bf16.mxu1 %v3495_v17 }
 0x61e   : > { %4464 = vmatmul.mubr.bf16.gmra.mrb[64].mxu1 %v3488_v63  ;;  %v3132_v63 = vrot.slane %v8873_v55, 1 }
 0x61f   : > { %4471 = vmatprep.mubr.bf16.mxu1 %v10400_v52 }
 0x620   : > { %v3204_v42 = vsel %vm710_vm3, %v3132_v63, %v3133_v38  ;;  %v3205_v62 = vsel %vm710_vm3, %v3131_v44, %v3132_v63 }
 0x626   : > { %4472 = vmatmul.mubr.bf16.gmra.mrb[68].mxu1 %v3495_v17  ;;  %v9507_v17 = vpack.c.bf16 %v3204_v42, %v3205_v62  ;;  %v3139_v42 = vrot.slane %v9084_v35, 1 }
 0x627   : > { %4479 = vmatprep.mubr.bf16.mxu1 %v10401_v39 }
 0x62e   : > { %4480 = vmatmul.mubr.bf16.gmra.mrb[72].mxu1 %v10400_v52  ;;  %v3135_v52 = vrot.slane %v8982_v18, 1 }
 0x62f   : > { %4487 = vmatprep.mubr.bf16.mxu1 %v10402_v13 }
 0x636   : > { %4488 = vmatmul.mubr.bf16.gmra.mrb[76].mxu1 %v10401_v39  ;;  %v6710_v39 = vld [vmem:[#allocation8 + $0x198] sm:$0xff]  }
 0x637   : > { %4495 = vmatprep.mubr.bf16.mxu1 %v8869_v4  ;;  %v3130_v4 = vrot.slane %v8812_v59, 1 }
 0x639   : > { %v3206_v43 = vsel %vm710_vm3, %v3130_v4, %v3131_v44  ;;  %v3207_v2 = vsel %vm710_vm3, %v3129_v56, %v3130_v4  ;;  %v3137_v4 = vrot.slane %v9005_v28, 1 }
 0x63a   : > { %v9494_v14 = vpack.c.bf16 %v3206_v43, %v3207_v2  ;;  %v6712_v43 = vld [vmem:[#allocation8 + $0x1a8] sm:$0xff]   ;;  %v6713_v2 = vld [vmem:[#allocation8 + $0x1b0] sm:$0xff]  }
 0x63e   : > { %4496 = vmatmul.mubr.bf16.gmra.mrb[80].mxu1 %v10402_v13  ;;  %v3134_v13 = vrot.slane %v8949_v46, 1 }
 0x63f   : > { %4536 = vmatprep.mubr.bf16.mxu1 %v9482_v26 }
 0x640   : > { %v3202_v56 = vsel %vm710_vm3, %v3134_v13, %v3135_v52  ;;  %v3203_v8 = vsel %vm710_vm3, %v3133_v38, %v3134_v13  ;;  %v3405_v38 = vpack.c.bf16 %v8949_v46, %v8958_v22 }
 0x641   : > { %v9520_v44 = vpack.c.bf16 %v3202_v56, %v3203_v8  ;;  %v3140_v8 = vrot.slane %v9073_v19, 1 }
 0x646   : > { %4537 = vmatmul.mubr.bf16.vlgmr.msra.gmra.mrb[0].mxu1 %v3383_v53 }
 0x647   : > { %4544 = vmatprep.mubr.bf16.mxu1 %v9494_v14  ;;  %4706 = vmatpush1.bf16.msra.mxu1 %v6707_v41  ;;  %v3136_v41 = vrot.slane %v8975_v54, 1 }
 0x648   : > { %4707 = vmatprep.subr.bf16.mxu1 %v10317_v21 }
 0x649   : > { %v3200_v53 = vsel %vm710_vm3, %v3136_v41, %v3137_v4 }
 0x64b   : > { %4708 = vmatpush1.bf16.msra.mxu1 %v6708_v50  ;;  %v3201_v50 = vsel %vm710_vm3, %v3135_v52, %v3136_v41  ;;  %v6715_v52 = vld [vmem:[#allocation8 + $0x1c0] sm:$0xff]   ;;  %v3419_v41 = vpack.c.bf16 %v9014_v32, %v9005_v28 }
 0x64c   : > { %4709 = vmatprep.subr.bf16.mxu1 %v10317_v21  ;;  %v9533_v63 = vpack.c.bf16 %v3200_v53, %v3201_v50  ;;  %v3197_v53 = vsel %vm710_vm3, %v3139_v42, %v3140_v8  ;;  %v6718_v50 = vld [vmem:[#allocation8 + $0x1d8] sm:$0xff]  }
 0x64e   : > { %4545 = vmatmul.mubr.bf16.gmra.mrb[4].mxu1 %v3391_v20  ;;  %v3138_v20 = vrot.slane %v9014_v32, 1 }
 0x64f   : > { %4552 = vmatprep.mubr.bf16.mxu1 %v9507_v17  ;;  %4710 = vmatpush1.bf16.msra.mxu1 %v6709_v11  ;;  %v6714_v11 = vld [vmem:[#allocation8 + $0x1b8] sm:$0xff]  }
 0x650   : > { %4711 = vmatprep.subr.bf16.mxu1 %v10317_v21  ;;  %v3198_v62 = vsel %vm710_vm3, %v3138_v20, %v3139_v42  ;;  %v3199_v13 = vsel %vm710_vm3, %v3137_v4, %v3138_v20  ;;  %v6717_v4 = vld [vmem:[#allocation8 + $0x1d0] sm:$0xff]   ;;  %v6719_v42 = vld [vmem:[#allocation8 + $0x1e0] sm:$0xff]  }
 0x651   : > { %v9546_v56 = vpack.c.bf16 %v3198_v62, %v3199_v13  ;;  %v3426_v62 = vpack.c.bf16 %v9073_v19, %v9084_v35  ;;  %v3145_v13 = vrot.slane %v9160_v34, 1 }
 0x653   : > { %4712 = vmatpush1.bf16.msra.mxu1 %v6710_v39  ;;  %v3412_v39 = vpack.c.bf16 %v8975_v54, %v8982_v18 }
 0x654   : > { %4713 = vmatprep.subr.bf16.mxu1 %v10317_v21 }
 0x656   : > { %4553 = vmatmul.mubr.bf16.gmra.mrb[8].mxu1 %v3398_v25  ;;  %v6716_v25 = vld [vmem:[#allocation8 + $0x1c8] sm:$0xff]  }
 0x657   : > { %4560 = vmatprep.mubr.bf16.mxu1 %v9520_v44  ;;  %4714 = vmatpush1.bf16.msra.mxu1 %v6711_v9  ;;  %v3141_v9 = vrot.slane %v9112_v33, 1 }
 0x658   : > { %4715 = vmatprep.subr.bf16.mxu1 %v10317_v21 }
 0x65b   : > { %4716 = vmatpush1.bf16.msra.mxu1 %v6712_v43  ;;  %v3196_v43 = vsel %vm710_vm3, %v3140_v8, %v3141_v9  ;;  %v3144_v8 = vrot.slane %v9129_v61, 1 }
 0x65c   : > { %4717 = vmatprep.subr.bf16.mxu1 %v10317_v21 }
 0x65e   : > { %4561 = vmatmul.mubr.bf16.gmra.mrb[12].mxu1 %v3405_v38  ;;  %v3143_v38 = vrot.slane %v9136_v12, 1 }
 0x65f   : > { %4568 = vmatprep.mubr.bf16.mxu1 %v9533_v63  ;;  %4718 = vmatpush1.bf16.msra.mxu1 %v6713_v2  ;;  %v9559_v2 = vpack.c.bf16 %v3196_v43, %v3197_v53  ;;  %v3192_v43 = vsel %vm710_vm3, %v3144_v8, %v3145_v13 }
 0x660   : > { %4719 = vmatprep.subr.bf16.mxu1 %v10317_v21 }
 0x663   : > { %4720 = vmatpush1.bf16.msra.mxu1 %v6714_v11  ;;  %v3142_v11 = vrot.slane %v9103_v24, 1 }
 0x664   : > { %4721 = vmatprep.subr.bf16.mxu1 %v10317_v21 }
 0x665   : > { %v3194_v20 = vsel %vm710_vm3, %v3142_v11, %v3143_v38 }
 0x666   : > { %4569 = vmatmul.mubr.bf16.gmra.mrb[16].mxu1 %v3412_v39 }
 0x667   : > { %4576 = vmatprep.mubr.bf16.mxu1 %v9546_v56  ;;  %4722 = vmatpush1.bf16.msra.mxu1 %v6715_v52  ;;  %v3195_v52 = vsel %vm710_vm3, %v3141_v9, %v3142_v11  ;;  %v6721_v9 = vld [vmem:[#allocation8 + $0x1f0] sm:$0xff]   ;;  %v6722_v11 = vld [vmem:[#allocation8 + $0x1f8] sm:$0xff]  }
 0x668   : > { %4723 = vmatprep.subr.bf16.mxu1 %v10317_v21  ;;  %v9572_v39 = vpack.c.bf16 %v3194_v20, %v3195_v52  ;;  %v3146_v20 = vrot.slane %v9153_v7, 1  ;;  %v10404_v52 = vmov 0.0  }
 0x66b   : > { %4724 = vmatpush1.bf16.msra.mxu1 %v6716_v25  ;;  %v6720_v25 = vld [vmem:[#allocation8 + $0x1e8] sm:$0xff]  }
 0x66c   : > { %4725 = vmatprep.subr.bf16.mxu1 %v10317_v21 }
 0x66e   : > { %4577 = vmatmul.mubr.bf16.gmra.mrb[20].mxu1 %v3419_v41  ;;  %v3193_v41 = vsel %vm710_vm3, %v3143_v38, %v3144_v8  ;;  %v3440_v38 = vpack.c.bf16 %v9129_v61, %v9136_v12  ;;  %v3149_v8 = vrot.slane %v9205_v60, 1 }
 0x66f   : > { %4584 = vmatprep.mubr.bf16.mxu1 %v9559_v2  ;;  %4726 = vmatpush1.bf16.msra.mxu1 %v6717_v4  ;;  %v3433_v4 = vpack.c.bf16 %v9103_v24, %v9112_v33  ;;  %v9585_v53 = vpack.c.bf16 %v3192_v43, %v3193_v41  ;;  %v3151_v41 = vrot.slane %v9227_v15, 1 }
 0x670   : > { %4727 = vmatprep.subr.bf16.mxu1 %v10317_v21 }
 0x673   : > { %4728 = vmatpush1.bf16.msra.mxu1 %v6718_v50  ;;  %v3147_v50 = vrot.slane %v9183_v40, 1 }
 0x674   : > { %4729 = vmatprep.subr.bf16.mxu1 %v10317_v21 }
 0x676   : > { %4585 = vmatmul.mubr.bf16.gmra.mrb[24].mxu1 %v3426_v62  ;;  %v3191_v62 = vsel %vm710_vm3, %v3145_v13, %v3146_v20 }
 0x677   : > { %4592 = vmatprep.mubr.bf16.mxu1 %v9572_v39  ;;  %4730 = vmatpush1.bf16.msra.mxu1 %v6719_v42  ;;  %v3190_v42 = vsel %vm710_vm3, %v3146_v20, %v3147_v50 }
 0x678   : > { %4731 = vmatprep.subr.bf16.mxu1 %v10317_v21 }
 0x67b   : > { %4732 = vmatpush1.bf16.msra.mxu1 %v6720_v25  ;;  %v9598_v25 = vpack.c.bf16 %v3190_v42, %v3191_v62  ;;  %v3454_v42 = vpack.c.bf16 %v9176_v27, %v9183_v40 }
 0x67c   : > { %4733 = vmatprep.subr.bf16.mxu1 %v10317_v21 }
 0x67e   : > { %4593 = vmatmul.mubr.bf16.gmra.mrb[28].mxu1 %v3433_v4 }
 0x67f   : > { %4600 = vmatprep.mubr.bf16.mxu1 %v9585_v53  ;;  %4734 = vmatpush1.bf16.msra.mxu1 %v6721_v9  ;;  %v3447_v9 = vpack.c.bf16 %v9153_v7, %v9160_v34 }
 0x680   : > { %4735 = vmatprep.subr.bf16.mxu1 %v10317_v21  ;;  %v3148_v21 = vrot.slane %v9176_v27, 1 }
 0x682   : > { %v3188_v43 = vsel %vm710_vm3, %v3148_v21, %v3149_v8  ;;  %v3189_v13 = vsel %vm710_vm3, %v3147_v50, %v3148_v21  ;;  %v3153_v50 = vrot.slane %v9251_v0, 1  ;;  %v3152_v21 = vrot.slane %v9220_v23, 1 }
 0x683   : > { %4736 = vmatpush1.bf16.msra.mxu1 %v6722_v11  ;;  %v9609_v4 = vpack.c.bf16 %v3188_v43, %v3189_v13  ;;  %v3150_v11 = vrot.slane %v9198_v58, 1 }
 0x684   : > { %5725 = vmatprep.subr.bf16.mxu1 %v10404_v52  ;;  %v3184_v43 = vsel %vm710_vm3, %v3152_v21, %v3153_v50  ;;  %v3185_v13 = vsel %vm710_vm3, %v3151_v41, %v3152_v21  ;;  %v3156_v21 = vrot.slane %v9266_v16, 1 }
 0x685   : > { %v3186_v20 = vsel %vm710_vm3, %v3150_v11, %v3151_v41  ;;  %v9631_v31 = vpack.c.bf16 %v3184_v43, %v3185_v13  ;;  %v3157_v41 = vrot.slane %v9289_v29, 1 }
 0x686   : > { %4601 = vmatmul.mubr.bf16.gmra.mrb[32].mxu1 %v3440_v38  ;;  %v3187_v38 = vsel %vm710_vm3, %v3149_v8, %v3150_v11  ;;  %v3155_v8 = vrot.slane %v9272_v30, 1  ;;  %v3154_v11 = vrot.slane %v9242_v10, 1 }
 0x687   : > { %4608 = vmatprep.mubr.bf16.mxu1 %v9598_v25  ;;  %v9620_v62 = vpack.c.bf16 %v3186_v20, %v3187_v38  ;;  %v3180_v43 = vsel %vm710_vm3, %v3156_v21, %v3157_v41 }
 0x688   : > { %v3182_v20 = vsel %vm710_vm3, %v3154_v11, %v3155_v8  ;;  %v3183_v38 = vsel %vm710_vm3, %v3153_v50, %v3154_v11  ;;  %v3181_v13 = vsel %vm710_vm3, %v3155_v8, %v3156_v21  ;;  %v3159_v50 = vrot.slane %v9303_v57, 1 }
 0x689   : > { %v9642_v26 = vpack.c.bf16 %v3182_v20, %v3183_v38  ;;  %v9653_v47 = vpack.c.bf16 %v3180_v43, %v3181_v13  ;;  %v3158_v11 = vrot.slane %v9283_v5, 1  ;;  %v3160_v8 = vrot.slane %v10379_v45, 1 }
 0x68a   : > { %v10407_v21 = vrot.slane %v8642_v1, 1 }
 0x68b   : > { %10405 = vst [vmem:[#allocation19_spill] sm:$0xff] %v9642_v26  ;;  %10406 = vst [vmem:[#allocation18_spill] sm:$0xff] %v9653_v47  ;;  %v3178_v20 = vsel %vm710_vm3, %v3158_v11, %v3159_v50  ;;  %v3179_v38 = vsel %vm710_vm3, %v3157_v41, %v3158_v11  ;;  %v3177_v13 = vsel %vm710_vm3, %v3159_v50, %v3160_v8  ;;  %v10408_v11 = vld [vmem:[#allocation35_spill] sm:$0xff] }
 0x68c   : > { %v3176_v43 = vsel %vm710_vm3, %v3160_v8, %v10407_v21  ;;  %v3496_v41 = vpack.c.bf16 %v10379_v45, %v9303_v57  ;;  %v3168_v8 = vrot.slane %v8819_v51, 1  ;;  %v10413_v21 = vld [vmem:[#allocation45_spill] sm:$0xff] }
 0x68e   : > { %4609 = vmatmul.mubr.bf16.gmra.mrb[36].mxu1 %v3447_v9  ;;  %v3461_v9 = vpack.c.bf16 %v9198_v58, %v9205_v60 }
 0x68f   : > { %4616 = vmatprep.mubr.bf16.mxu1 %v9609_v4 }
 0x696   : > { %4617 = vmatmul.mubr.bf16.gmra.mrb[40].mxu1 %v3454_v42  ;;  %v3468_v42 = vpack.c.bf16 %v9220_v23, %v9227_v15 }
 0x697   : > { %4624 = vmatprep.mubr.bf16.mxu1 %v9620_v62 }
 0x69e   : > { %4625 = vmatmul.mubr.bf16.gmra.mrb[44].mxu1 %v3461_v9  ;;  %v3475_v9 = vpack.c.bf16 %v9242_v10, %v9251_v0 }
 0x69f   : > { %4632 = vmatprep.mubr.bf16.mxu1 %v9631_v31 }
 0x6a6   : > { %4633 = vmatmul.mubr.bf16.gmra.mrb[48].mxu1 %v3468_v42  ;;  %v3482_v42 = vpack.c.bf16 %v9266_v16, %v9272_v30 }
 0x6a7   : > { %4640 = vmatprep.mubr.bf16.mxu1 %v9642_v26  ;;  %v9664_v26 = vpack.c.bf16 %v3178_v20, %v3179_v38  ;;  %v10409_v20 = vpack.c.bf16 %v8647_v37, %v8642_v1  ;;  %v10411_v38 = vld [vmem:[#allocation29_spill] sm:$0xff] }
 0x6a8   : > { %v10412_v50 = vpack.c.bf16 %v8706_v36, %v10411_v38  ;;  %v3215_v38 = vrot.slane %v8890_v3, 2 }
 0x6ae   : > { %4641 = vmatmul.mubr.bf16.gmra.mrb[52].mxu1 %v3475_v9  ;;  %v3489_v9 = vpack.c.bf16 %v9283_v5, %v9289_v29 }
 0x6af   : > { %4648 = vmatprep.mubr.bf16.mxu1 %v9653_v47  ;;  %v9676_v47 = vpack.c.bf16 %v3176_v43, %v3177_v13  ;;  %v10414_v43 = vld [vmem:[#allocation41_spill] sm:$0xff] }
 0x6b6   : > { %4649 = vmatmul.mubr.bf16.gmra.mrb[56].mxu1 %v3482_v42  ;;  %v10410_v42 = vld [vmem:[#allocation43_spill] sm:$0xff] }
 0x6b7   : > { %4656 = vmatprep.mubr.bf16.mxu1 %v9664_v26 }
 0x6be   : > { %4657 = vmatmul.mubr.bf16.gmra.mrb[60].mxu1 %v3489_v9  ;;  %v10415_v9 = vrot.slane %v10414_v43, 1 }
 0x6bf   : > { %4664 = vmatprep.mubr.bf16.mxu1 %v9676_v47 }
 0x6c0   : > { %v3169_v13 = vsel %vm710_vm3, %v10415_v9, %v3168_v8 }
 0x6c6   : > { %4665 = vmatmul.mubr.bf16.gmra.mrb[64].mxu1 %v3496_v41  ;;  %v10416_v41 = vrot.slane %v8635_v48, 1 }
 0x6c7   : > { %4672 = vmatprep.mubr.bf16.mxu1 %v10408_v11  ;;  %v10419_v11 = vld [vmem:[#allocation36_spill] sm:$0xff] }
 0x6c8   : > { %v3210_v37 = vsel %vm710_vm3, %v3168_v8, %v10416_v41  ;;  %v3523_v8 = vpack.c.bf16 %v8819_v51, %v10414_v43  ;;  %v3216_v41 = vrot.slane %v8873_v55, 2 }
 0x6ce   : > { %4673 = vmatmul.mubr.bf16.gmra.mrb[68].mxu1 %v10409_v20  ;;  %v9699_v20 = vpack.c.bf16 %v3210_v37, %v3169_v13  ;;  %v3217_v13 = vrot.slane %v8958_v22, 2 }
 0x6cf   : > { %4680 = vmatprep.mubr.bf16.mxu1 %v10410_v42  ;;  %v10418_v42 = vld [vmem:[#allocation38_spill] sm:$0xff] }
 0x6d0   : > { %10417 = vst [vmem:[#allocation21_spill] sm:$0xff] %v9699_v20  ;;  %v10420_v36 = vpack.c.bf16 %v10418_v42, %v10419_v11  ;;  %v3288_v37 = vsel %vm795_vm4, %v3216_v41, %v3217_v13 }
 0x6d6   : > { %4681 = vmatmul.mubr.bf16.gmra.mrb[72].mxu1 %v10412_v50  ;;  %v3214_v50 = vrot.slane %v8812_v59, 2  ;;  %v3289_v59 = vsel %vm795_vm4, %v3215_v38, %v3216_v41 }
 0x6d7   : > { %4688 = vmatprep.mubr.bf16.mxu1 %v10413_v21  ;;  %v3213_v21 = vrot.slane %v8824_v49, 2  ;;  %v3393_v3 = vpack.c.bf16 %v3288_v37, %v3289_v59  ;;  %v6727_v37 = vld [vmem:[#allocation8 + $0x220] sm:$0xff]  }
 0x6d8   : > { %v3290_v9 = vsel %vm795_vm4, %v3214_v50, %v3215_v38 }
 0x6d9   : > { %v3291_v11 = vsel %vm795_vm4, %v3213_v21, %v3214_v50  ;;  %v6724_v50 = vld [vmem:[#allocation8 + $0x208] sm:$0xff]  }
 0x6da   : > { %v3386_v42 = vpack.c.bf16 %v3290_v9, %v3291_v11  ;;  %v3218_v9 = vrot.slane %v8949_v46, 2  ;;  %v6725_v11 = vld [vmem:[#allocation8 + $0x210] sm:$0xff]  }
 0x6dc   : > { %v3287_v38 = vsel %vm795_vm4, %v3217_v13, %v3218_v9 }
 0x6de   : > { %4689 = vmatmul.mubr.bf16.gmra.mrb[76].mxu1 %v10420_v36  ;;  %v6723_v36 = vld [vmem:[#allocation8 + $0x200] sm:$0xff]  }
 0x6df   : > { %4696 = vmatprep.mubr.bf16.mxu1 %v9699_v20  ;;  %v3219_v20 = vrot.slane %v8982_v18, 2 }
 0x6e6   : > { %4697 = vmatmul.mubr.bf16.gmra.mrb[80].mxu1 %v3523_v8  ;;  %v3286_v8 = vsel %vm795_vm4, %v3218_v9, %v3219_v20  ;;  %v3222_v9 = vrot.slane %v9014_v32, 2 }
 0x6e7   : > { %4737 = vmatprep.mubr.bf16.mxu1 %v3386_v42  ;;  %v3400_v59 = vpack.c.bf16 %v3286_v8, %v3287_v38  ;;  %v3220_v42 = vrot.slane %v8975_v54, 2  ;;  %v3225_v38 = vrot.slane %v9112_v33, 2 }
 0x6e9   : > { %v3285_v13 = vsel %vm795_vm4, %v3219_v20, %v3220_v42 }
 0x6ee   : > { %4738 = vmatmul.mubr.bf16.vlgmr.msra.gmra.mrb[0].mxu1 %v9494_v14  ;;  %v6726_v14 = vld [vmem:[#allocation8 + $0x218] sm:$0xff]  }
 0x6ef   : > { %4745 = vmatprep.mubr.bf16.mxu1 %v3393_v3  ;;  %5726 = vmatpush3.bf16.msra.mxu1 %v6723_v36  ;;  %v3221_v3 = vrot.slane %v9005_v28, 2  ;;  %v3223_v36 = vrot.slane %v9084_v35, 2 }
 0x6f0   : > { %5727 = vmatprep.subr.bf16.mxu1 %v10404_v52 }
 0x6f1   : > { %v3284_v41 = vsel %vm795_vm4, %v3220_v42, %v3221_v3  ;;  %v3282_v8 = vsel %vm795_vm4, %v3222_v9, %v3223_v36  ;;  %v3283_v20 = vsel %vm795_vm4, %v3221_v3, %v3222_v9  ;;  %v3229_v9 = vrot.slane %v9160_v34, 2 }
 0x6f3   : > { %5728 = vmatpush3.bf16.msra.mxu1 %v6724_v50  ;;  %v6728_v50 = vld [vmem:[#allocation8 + $0x228] sm:$0xff]  }
 0x6f4   : > { %5729 = vmatprep.subr.bf16.mxu1 %v10404_v52 }
 0x6f6   : > { %4746 = vmatmul.mubr.bf16.gmra.mrb[4].mxu1 %v9507_v17  ;;  %v3407_v17 = vpack.c.bf16 %v3284_v41, %v3285_v13 }
 0x6f7   : > { %4753 = vmatprep.mubr.bf16.mxu1 %v3400_v59  ;;  %5730 = vmatpush3.bf16.msra.mxu1 %v6725_v11  ;;  %v6729_v11 = vld [vmem:[#allocation8 + $0x230] sm:$0xff]   ;;  %v6730_v59 = vld [vmem:[#allocation8 + $0x238] sm:$0xff]  }
 0x6f8   : > { %5731 = vmatprep.subr.bf16.mxu1 %v10404_v52 }
 0x6fb   : > { %5732 = vmatpush3.bf16.msra.mxu1 %v6726_v14  ;;  %v3224_v14 = vrot.slane %v9073_v19, 2 }
 0x6fc   : > { %5733 = vmatprep.subr.bf16.mxu1 %v10404_v52 }
 0x6fd   : > { %v3280_v42 = vsel %vm795_vm4, %v3224_v14, %v3225_v38  ;;  %v3281_v3 = vsel %vm795_vm4, %v3223_v36, %v3224_v14  ;;  %v3228_v36 = vrot.slane %v9129_v61, 2  ;;  %v3233_v14 = vrot.slane %v9205_v60, 2 }
 0x6fe   : > { %4754 = vmatmul.mubr.bf16.gmra.mrb[8].mxu1 %v9520_v44  ;;  %v3414_v44 = vpack.c.bf16 %v3282_v8, %v3283_v20  ;;  %v3421_v41 = vpack.c.bf16 %v3280_v42, %v3281_v3  ;;  %v3231_v20 = vrot.slane %v9183_v40, 2  ;;  %v3232_v42 = vrot.slane %v9176_v27, 2 }
 0x6ff   : > { %4761 = vmatprep.mubr.bf16.mxu1 %v3407_v17  ;;  %5734 = vmatpush3.bf16.msra.mxu1 %v6727_v37  ;;  %v3226_v37 = vrot.slane %v9103_v24, 2 }
 0x700   : > { %5735 = vmatprep.subr.bf16.mxu1 %v10404_v52  ;;  %v3273_v3 = vsel %vm795_vm4, %v3231_v20, %v3232_v42 }
 0x701   : > { %v3279_v17 = vsel %vm795_vm4, %v3225_v38, %v3226_v37 }
 0x703   : > { %5736 = vmatpush3.bf16.msra.mxu1 %v6728_v50 }
 0x704   : > { %5737 = vmatprep.subr.bf16.mxu1 %v10404_v52 }
 0x706   : > { %4762 = vmatmul.mubr.bf16.gmra.mrb[12].mxu1 %v9533_v63  ;;  %v3227_v63 = vrot.slane %v9136_v12, 2 }
 0x707   : > { %4769 = vmatprep.mubr.bf16.mxu1 %v3414_v44  ;;  %5738 = vmatpush3.bf16.msra.mxu1 %v6729_v11  ;;  %v3230_v44 = vrot.slane %v9153_v7, 2 }
 0x708   : > { %5739 = vmatprep.subr.bf16.mxu1 %v10404_v52  ;;  %v3278_v13 = vsel %vm795_vm4, %v3226_v37, %v3227_v63  ;;  %v3277_v8 = vsel %vm795_vm4, %v3227_v63, %v3228_v36  ;;  %v3235_v63 = vrot.slane %v9227_v15, 2  ;;  %v3234_v37 = vrot.slane %v9198_v58, 2 }
 0x709   : > { %v3428_v50 = vpack.c.bf16 %v3278_v13, %v3279_v17  ;;  %v3275_v38 = vsel %vm795_vm4, %v3229_v9, %v3230_v44 }
 0x70a   : > { %v3271_v13 = vsel %vm795_vm4, %v3233_v14, %v3234_v37 }
 0x70b   : > { %5740 = vmatpush3.bf16.msra.mxu1 %v6730_v59 }
 0x70e   : > { %4770 = vmatmul.mubr.bf16.gmra.mrb[16].mxu1 %v9546_v56  ;;  %v3276_v56 = vsel %vm795_vm4, %v3228_v36, %v3229_v9  ;;  %v3236_v9 = vrot.slane %v9220_v23, 2 }
 0x70f   : > { %4777 = vmatprep.mubr.bf16.mxu1 %v3421_v41  ;;  %v3435_v11 = vpack.c.bf16 %v3276_v56, %v3277_v8  ;;  %v3239_v8 = vrot.slane %v9272_v30, 2 }
 0x710   : > { %v3269_v36 = vsel %vm795_vm4, %v3235_v63, %v3236_v9 }
 0x716   : > { %4778 = vmatmul.mubr.bf16.gmra.mrb[20].mxu1 %v9559_v2  ;;  %v3274_v2 = vsel %vm795_vm4, %v3230_v44, %v3231_v20 }
 0x717   : > { %4785 = vmatprep.mubr.bf16.mxu1 %v3428_v50  ;;  %v3442_v59 = vpack.c.bf16 %v3274_v2, %v3275_v38  ;;  %v3237_v50 = vrot.slane %v9251_v0, 2  ;;  %v3241_v2 = vrot.slane %v9289_v29, 2  ;;  %v3240_v38 = vrot.slane %v9266_v16, 2 }
 0x71e   : > { %4786 = vmatmul.mubr.bf16.gmra.mrb[24].mxu1 %v9572_v39  ;;  %v3272_v39 = vsel %vm795_vm4, %v3232_v42, %v3233_v14  ;;  %v10421_v42 = vld [vmem:[#allocation19_spill] sm:$0xff] }
 0x71f   : > { %4793 = vmatprep.mubr.bf16.mxu1 %v3435_v11  ;;  %v3449_v41 = vpack.c.bf16 %v3272_v39, %v3273_v3  ;;  %v3238_v11 = vrot.slane %v9242_v10, 2  ;;  %v3243_v39 = vrot.slane %v9303_v57, 2  ;;  %v3242_v3 = vrot.slane %v9283_v5, 2 }
 0x721   : > { %v3267_v20 = vsel %vm795_vm4, %v3237_v50, %v3238_v11 }
 0x726   : > { %4794 = vmatmul.mubr.bf16.gmra.mrb[28].mxu1 %v9585_v53  ;;  %v3270_v53 = vsel %vm795_vm4, %v3234_v37, %v3235_v63  ;;  %v10422_v37 = vld [vmem:[#allocation18_spill] sm:$0xff] }
 0x727   : > { %4801 = vmatprep.mubr.bf16.mxu1 %v3442_v59  ;;  %v3456_v17 = vpack.c.bf16 %v3270_v53, %v3271_v13  ;;  %v3265_v59 = vsel %vm795_vm4, %v3239_v8, %v3240_v38  ;;  %v3244_v53 = vrot.slane %v10379_v45, 2  ;;  %v10423_v13 = vrot.slane %v8642_v1, 2 }
 0x72e   : > { %4802 = vmatmul.mubr.bf16.gmra.mrb[32].mxu1 %v9598_v25  ;;  %v3268_v25 = vsel %vm795_vm4, %v3236_v9, %v3237_v50  ;;  %v3261_v50 = vsel %vm795_vm4, %v3243_v39, %v3244_v53 }
 0x72f   : > { %4809 = vmatprep.mubr.bf16.mxu1 %v3449_v41  ;;  %v3463_v56 = vpack.c.bf16 %v3268_v25, %v3269_v36  ;;  %v3263_v41 = vsel %vm795_vm4, %v3241_v2, %v3242_v3  ;;  %v10424_v25 = vld [vmem:[#allocation48_spill] sm:$0xff]  ;;  %v10425_v36 = vld [vmem:[#allocation47_spill] sm:$0xff] }
 0x736   : > { %4810 = vmatmul.mubr.bf16.gmra.mrb[36].mxu1 %v9609_v4  ;;  %v3266_v4 = vsel %vm795_vm4, %v3238_v11, %v3239_v8  ;;  %v10427_v8 = vld [vmem:[#allocation35_spill] sm:$0xff]  ;;  %v10428_v11 = vld [vmem:[#allocation49_spill] sm:$0xff] }
 0x737   : > { %4817 = vmatprep.mubr.bf16.mxu1 %v3456_v17  ;;  %v3470_v44 = vpack.c.bf16 %v3266_v4, %v3267_v20  ;;  %v3260_v17 = vsel %vm795_vm4, %v3244_v53, %v10423_v13  ;;  %v10429_v4 = vld [vmem:[#allocation50_spill] sm:$0xff]  ;;  %v10438_v13 = vld [vmem:[#allocation21_spill] sm:$0xff] }
 0x738   : > { %v3491_v9 = vpack.c.bf16 %v3260_v17, %v3261_v50  ;;  %v10430_v20 = vpack.c.bf16 %v10428_v11, %v10429_v4  ;;  %v10439_v17 = vld [vmem:[#allocation46_spill] sm:$0xff]  ;;  %v3301_v4 = vrot.slane %v8958_v22, 3  ;;  %v3302_v22 = vrot.slane %v8949_v46, 3 }
 0x739   : > { %v3299_v50 = vrot.slane %v10439_v17, 3 }
 0x73e   : > { %4818 = vmatmul.mubr.bf16.gmra.mrb[40].mxu1 %v9620_v62  ;;  %v3264_v62 = vsel %vm795_vm4, %v3240_v38, %v3241_v2  ;;  %v3252_v2 = vrot.slane %v8819_v51, 2  ;;  %v10432_v38 = vld [vmem:[#allocation51_spill] sm:$0xff] }
 0x73f   : > { %4825 = vmatprep.mubr.bf16.mxu1 %v3463_v56  ;;  %v3477_v14 = vpack.c.bf16 %v3264_v62, %v3265_v59  ;;  %v10426_v56 = vpack.c.bf16 %v10424_v25, %v10425_v36  ;;  %v10433_v62 = vld [vmem:[#allocation52_spill] sm:$0xff]  ;;  %v10435_v59 = vrot.slane %v10414_v43, 2 }
 0x740   : > { %v10441_v25 = vld [vmem:[#allocation44_spill] sm:$0xff] }
 0x741   : > { %v3298_v36 = vrot.slane %v10441_v25, 3 }
 0x746   : > { %4826 = vmatmul.mubr.bf16.gmra.mrb[44].mxu1 %v9631_v31  ;;  %v3262_v31 = vsel %vm795_vm4, %v3242_v3, %v3243_v39  ;;  %v10436_v3 = vld [vmem:[#allocation45_spill] sm:$0xff] }
 0x747   : > { %4833 = vmatprep.mubr.bf16.mxu1 %v3470_v44  ;;  %v3484_v63 = vpack.c.bf16 %v3262_v31, %v3263_v41  ;;  %v10431_v44 = vld [vmem:[#allocation43_spill] sm:$0xff]  ;;  %v10437_v31 = vld [vmem:[#allocation24_spill] sm:$0xff] }
 0x748   : > { %v3212_v41 = vrot.slane %v10437_v31, 2 }
 0x74e   : > { %4834 = vmatmul.mubr.bf16.gmra.mrb[48].mxu1 %v10421_v42 }
 0x74f   : > { %4841 = vmatprep.mubr.bf16.mxu1 %v3477_v14  ;;  %v3253_v14 = vsel %vm795_vm4, %v10435_v59, %v3252_v2  ;;  %v3305_v59 = vrot.slane %v9005_v28, 3  ;;  %v3306_v28 = vrot.slane %v9014_v32, 3 }
 0x756   : > { %4842 = vmatmul.mubr.bf16.gmra.mrb[52].mxu1 %v10422_v37 }
 0x757   : > { %4849 = vmatprep.mubr.bf16.mxu1 %v3484_v63  ;;  %v3292_v63 = vsel %vm795_vm4, %v3212_v41, %v3213_v21  ;;  %v3374_v21 = vsel %vm880_vm5, %v3298_v36, %v3299_v50 }
 0x75e   : > { %4850 = vmatmul.mubr.bf16.gmra.mrb[56].mxu1 %v9664_v26  ;;  %v10434_v26 = vpack.c.bf16 %v10432_v38, %v10433_v62  ;;  %v3303_v62 = vrot.slane %v8982_v18, 3  ;;  %v3304_v18 = vrot.slane %v8975_v54, 3  ;;  %v3367_v54 = vsel %vm880_vm5, %v3305_v59, %v3306_v28 }
 0x75f   : > { %4857 = vmatprep.mubr.bf16.mxu1 %v3491_v9  ;;  %v10440_v9 = vld [vmem:[#allocation17_spill] sm:$0xff] }
 0x760   : > { %v3369_v46 = vsel %vm880_vm5, %v3303_v62, %v3304_v18 }
 0x766   : > { %4858 = vmatmul.mubr.bf16.gmra.mrb[60].mxu1 %v9676_v47  ;;  %v3211_v47 = vrot.slane %v8635_v48, 2 }
 0x767   : > { %4865 = vmatprep.mubr.bf16.mxu1 %v10426_v56  ;;  %v3297_v56 = vrot.slane %v8824_v49, 3 }
 0x768   : > { %v3294_v42 = vsel %vm795_vm4, %v3252_v2, %v3211_v47  ;;  %v3293_v37 = vsel %vm795_vm4, %v3211_v47, %v3212_v41 }
 0x769   : > { %v3519_v39 = vpack.c.bf16 %v3294_v42, %v3253_v14  ;;  %v3524_v53 = vpack.c.bf16 %v3292_v63, %v3293_v37  ;;  %v3368_v14 = vsel %vm880_vm5, %v3304_v18, %v3305_v59  ;;  %v3309_v63 = vrot.slane %v9112_v33, 3 }
 0x76a   : > { %v3408_v42 = vpack.c.bf16 %v3368_v14, %v3369_v46  ;;  %v3310_v33 = vrot.slane %v9103_v24, 3  ;;  %v3325_v14 = vrot.slane %v9289_v29, 3  ;;  %v3326_v29 = vrot.slane %v9283_v5, 3 }
 0x76e   : > { %4866 = vmatmul.mubr.bf16.gmra.mrb[64].mxu1 %v10427_v8  ;;  %v3375_v8 = vsel %vm880_vm5, %v3297_v56, %v3298_v36 }
 0x76f   : > { %4873 = vmatprep.mubr.bf16.mxu1 %v10430_v20  ;;  %v3387_v11 = vpack.c.bf16 %v3374_v21, %v3375_v8  ;;  %v3300_v20 = vrot.slane %v8873_v55, 3  ;;  %v3371_v55 = vsel %vm880_vm5, %v3301_v4, %v3302_v22  ;;  %v3315_v21 = vrot.slane %v9183_v40, 3 }
 0x770   : > { %v3316_v40 = vrot.slane %v9176_v27, 3 }
 0x771   : > { %v3373_v2 = vsel %vm880_vm5, %v3299_v50, %v3300_v20 }
 0x776   : > { %4874 = vmatmul.mubr.bf16.gmra.mrb[68].mxu1 %v10431_v44  ;;  %v3372_v44 = vsel %vm880_vm5, %v3300_v20, %v3301_v4  ;;  %v3317_v4 = vrot.slane %v9205_v60, 3  ;;  %v3318_v60 = vrot.slane %v9198_v58, 3 }
 0x777   : > { %4881 = vmatprep.mubr.bf16.mxu1 %v10434_v26  ;;  %v3394_v38 = vpack.c.bf16 %v3372_v44, %v3373_v2  ;;  %v3370_v26 = vsel %vm880_vm5, %v3302_v22, %v3303_v62  ;;  %v3319_v2 = vrot.slane %v9227_v15, 3  ;;  %v3321_v22 = vrot.slane %v9251_v0, 3 }
 0x778   : > { %v3401_v47 = vpack.c.bf16 %v3370_v26, %v3371_v55  ;;  %v3356_v20 = vsel %vm880_vm5, %v3316_v40, %v3317_v4  ;;  %v3355_v27 = vsel %vm880_vm5, %v3317_v4, %v3318_v60  ;;  %v3320_v15 = vrot.slane %v9220_v23, 3 }
 0x779   : > { %v3322_v0 = vrot.slane %v9242_v10, 3 }
 0x77a   : > { %v3352_v26 = vsel %vm880_vm5, %v3320_v15, %v3321_v22  ;;  %v3353_v58 = vsel %vm880_vm5, %v3319_v2, %v3320_v15 }
 0x77b   : > { %v3464_v55 = vpack.c.bf16 %v3352_v26, %v3353_v58  ;;  %v3351_v23 = vsel %vm880_vm5, %v3321_v22, %v3322_v0 }
 0x77e   : > { %4882 = vmatmul.mubr.bf16.gmra.mrb[72].mxu1 %v10436_v3 }
 0x77f   : > { %4889 = vmatprep.mubr.bf16.mxu1 %v3519_v39  ;;  %v3307_v39 = vrot.slane %v9084_v35, 3  ;;  %v3308_v35 = vrot.slane %v9073_v19, 3  ;;  %v3363_v19 = vsel %vm880_vm5, %v3309_v63, %v3310_v33 }
 0x781   : > { %v3366_v3 = vsel %vm880_vm5, %v3306_v28, %v3307_v39  ;;  %v3364_v37 = vsel %vm880_vm5, %v3308_v35, %v3309_v63  ;;  %v3365_v32 = vsel %vm880_vm5, %v3307_v39, %v3308_v35  ;;  %v3327_v39 = vrot.slane %v9303_v57, 3  ;;  %v10443_v35 = vld [vmem:[#allocation54_spill] sm:$0xff] }
 0x782   : > { %v3415_v41 = vpack.c.bf16 %v3366_v3, %v3367_v54  ;;  %v3328_v54 = vrot.slane %v10379_v45, 3  ;;  %v10442_v57 = vrot.slane %v8642_v1, 3  ;;  %v10446_v45 = vld [vmem:[#allocation55_spill] sm:$0xff]  ;;  %v10447_v1 = vld [vmem:[#allocation56_spill] sm:$0xff] }
 0x783   : > { %v3346_v28 = vsel %vm880_vm5, %v3326_v29, %v3327_v39 }
 0x784   : > { %v3345_v5 = vsel %vm880_vm5, %v3327_v39, %v3328_v54 }
 0x786   : > { %4890 = vmatmul.mubr.bf16.gmra.mrb[76].mxu1 %v10438_v13  ;;  %v3311_v13 = vrot.slane %v9136_v12, 3  ;;  %v3312_v12 = vrot.slane %v9129_v61, 3 }
 0x787   : > { %4897 = vmatprep.mubr.bf16.mxu1 %v3524_v53  ;;  %v3422_v53 = vpack.c.bf16 %v3364_v37, %v3365_v32  ;;  %v10444_v37 = vld [vmem:[#allocation53_spill] sm:$0xff] }
 0x788   : > { %v3362_v17 = vsel %vm880_vm5, %v3310_v33, %v3311_v13  ;;  %v3361_v24 = vsel %vm880_vm5, %v3311_v13, %v3312_v12  ;;  %v10445_v32 = vpack.c.bf16 %v10443_v35, %v10444_v37  ;;  %v3336_v13 = vrot.slane %v8819_v51, 3  ;;  %v10449_v33 = vld [vmem:[#allocation58_spill] sm:$0xff] }
 0x789   : > { %v3429_v50 = vpack.c.bf16 %v3362_v17, %v3363_v19  ;;  %v10450_v17 = vld [vmem:[#allocation57_spill] sm:$0xff]  ;;  %v3296_v51 = vrot.slane %v10437_v31, 3 }
 0x78a   : > { %v10451_v19 = vpack.c.bf16 %v10449_v33, %v10450_v17 }
 0x78e   : > { %4898 = vmatmul.mubr.bf16.gmra.mrb[80].mxu1 %v10440_v9  ;;  %v3313_v9 = vrot.slane %v9160_v34, 3  ;;  %v3314_v34 = vrot.slane %v9153_v7, 3  ;;  %v3357_v7 = vsel %vm880_vm5, %v3315_v21, %v3316_v40 }
 0x78f   : > { %5741 = vmatprep.mubr.msk.bf16.mxu1 %vm6984_vm6, %v10404_v52  ;;  %v3450_v44 = vpack.c.bf16 %v3356_v20, %v3357_v7 }
 0x790   : > { %v3360_v25 = vsel %vm880_vm5, %v3312_v12, %v3313_v9  ;;  %v3358_v8 = vsel %vm880_vm5, %v3314_v34, %v3315_v21  ;;  %v3359_v61 = vsel %vm880_vm5, %v3313_v9, %v3314_v34  ;;  %v10452_v9 = vrot.slane %v10414_v43, 3  ;;  %v10028_v21 = vld [vmem:[%s10222_s6] ss:$0 sm:$0xff] }
 0x791   : > { %v3436_v36 = vpack.c.bf16 %v3360_v25, %v3361_v24 }
 0x792   : > { %v3337_v12 = vsel %vm880_vm5, %v10452_v9, %v3336_v13 }
 0x796   : > { %5742 = vmatmul.mubr.bf16.vlgmr.msra.gmra.mrb[0].mxu1 %v3387_v11  ;;  %v3443_v11 = vpack.c.bf16 %v3358_v8, %v3359_v61 }
 0x797   : > { %5745 = vmatprep.mubr.msk.bf16.mxu1 %vm6984_vm6, %v10404_v52 }
 0x79e   : > { %5746 = vmatmul.mubr.bf16.gmra.mrb[4].mxu1 %v3394_v38  ;;  %v3354_v38 = vsel %vm880_vm5, %v3318_v60, %v3319_v2 }
 0x79f   : > { %5749 = vmatprep.mubr.msk.bf16.mxu1 %vm6984_vm6, %v10404_v52  ;;  %v3457_v62 = vpack.c.bf16 %v3354_v38, %v3355_v27 }
 0x7a6   : > { %5750 = vmatmul.mubr.bf16.gmra.mrb[8].mxu1 %v3401_v47  ;;  %v3323_v47 = vrot.slane %v9272_v30, 3  ;;  %v3324_v30 = vrot.slane %v9266_v16, 3  ;;  %v3347_v16 = vsel %vm880_vm5, %v3325_v14, %v3326_v29 }
 0x7a7   : > { %5753 = vmatprep.mubr.msk.bf16.mxu1 %vm6984_vm6, %v10404_v52  ;;  %v3485_v3 = vpack.c.bf16 %v3346_v28, %v3347_v16 }
 0x7a8   : > { %v3350_v59 = vsel %vm880_vm5, %v3322_v0, %v3323_v47  ;;  %v3348_v46 = vsel %vm880_vm5, %v3324_v30, %v3325_v14  ;;  %v3349_v10 = vsel %vm880_vm5, %v3323_v47, %v3324_v30 }
 0x7a9   : > { %v3471_v18 = vpack.c.bf16 %v3350_v59, %v3351_v23 }
 0x7ae   : > { %5754 = vmatmul.mubr.bf16.gmra.mrb[12].mxu1 %v3408_v42  ;;  %v3478_v42 = vpack.c.bf16 %v3348_v46, %v3349_v10 }
 0x7af   : > { %5757 = vmatprep.mubr.msk.bf16.mxu1 %vm6984_vm6, %v10404_v52 }
 0x7b6   : > { %5758 = vmatmul.mubr.bf16.gmra.mrb[16].mxu1 %v3415_v41  ;;  %v3344_v41 = vsel %vm880_vm5, %v3328_v54, %v10442_v57 }
 0x7b7   : > { %5761 = vmatprep.mubr.msk.bf16.mxu1 %vm6984_vm6, %v10404_v52  ;;  %v3492_v63 = vpack.c.bf16 %v3344_v41, %v3345_v5 }
 0x7be   : > { %5762 = vmatmul.mubr.bf16.gmra.mrb[20].mxu1 %v3422_v53  ;;  %v10448_v53 = vpack.c.bf16 %v10446_v45, %v10447_v1 }
 0x7bf   : > { %5765 = vmatprep.mubr.msk.bf16.mxu1 %vm6984_vm6, %v10404_v52 }
 0x7c6   : > { %5766 = vmatmul.mubr.bf16.gmra.mrb[24].mxu1 %v3429_v50  ;;  %v3295_v50 = vrot.slane %v8635_v48, 3  ;;  %v3376_v48 = vsel %vm880_vm5, %v3296_v51, %v3297_v56 }
 0x7c7   : > { %5769 = vmatprep.mubr.msk.bf16.mxu1 %vm6984_vm6, %v10404_v52 }
 0x7c8   : > { %v3378_v25 = vsel %vm880_vm5, %v3336_v13, %v3295_v50  ;;  %v3377_v43 = vsel %vm880_vm5, %v3295_v50, %v3296_v51 }
 0x7c9   : > { %v3520_v24 = vpack.c.bf16 %v3378_v25, %v3337_v12 }
 0x7ce   : > { %5770 = vmatmul.mubr.bf16.gmra.mrb[28].mxu1 %v3436_v36  ;;  %v3525_v36 = vpack.c.bf16 %v3376_v48, %v3377_v43 }
 0x7cf   : > { %5773 = vmatprep.mubr.msk.bf16.mxu1 %vm6984_vm6, %v10404_v52 }
 0x7d6   : > { %5774 = vmatmul.mubr.bf16.gmra.mrb[32].mxu1 %v3443_v11 }
 0x7d7   : > { %5777 = vmatprep.mubr.msk.bf16.mxu1 %vm6984_vm6, %v10404_v52 }
 0x7de   : > { %5778 = vmatmul.mubr.bf16.gmra.mrb[36].mxu1 %v3450_v44 }
 0x7df   : > { %5781 = vmatprep.mubr.msk.bf16.mxu1 %vm6984_vm6, %v10404_v52 }
 0x7e6   : > { %5782 = vmatmul.mubr.bf16.gmra.mrb[40].mxu1 %v3457_v62 }
 0x7e7   : > { %5785 = vmatprep.mubr.msk.bf16.mxu1 %vm6984_vm6, %v10404_v52 }
 0x7ee   : > { %5786 = vmatmul.mubr.bf16.gmra.mrb[44].mxu1 %v3464_v55 }
 0x7ef   : > { %5789 = vmatprep.mubr.msk.bf16.mxu1 %vm6984_vm6, %v10404_v52 }
 0x7f6   : > { %5790 = vmatmul.mubr.bf16.gmra.mrb[48].mxu1 %v3471_v18 }
 0x7f7   : > { %5793 = vmatprep.mubr.msk.bf16.mxu1 %vm6984_vm6, %v10404_v52 }
 0x7fe   : > { %5794 = vmatmul.mubr.bf16.gmra.mrb[52].mxu1 %v3478_v42 }
 0x7ff   : > { %5797 = vmatprep.mubr.msk.bf16.mxu1 %vm6984_vm6, %v10404_v52 }
 0x806   : > { %5798 = vmatmul.mubr.bf16.gmra.mrb[56].mxu1 %v3485_v3 }
 0x807   : > { %5801 = vmatprep.mubr.msk.bf16.mxu1 %vm6984_vm6, %v10404_v52 }
 0x80e   : > { %5802 = vmatmul.mubr.bf16.gmra.mrb[60].mxu1 %v3492_v63 }
 0x80f   : > { %5805 = vmatprep.mubr.msk.bf16.mxu1 %vm6984_vm6, %v10404_v52 }
 0x816   : > { %5806 = vmatmul.mubr.bf16.gmra.mrb[64].mxu1 %v10445_v32 }
 0x817   : > { %5809 = vmatprep.mubr.msk.bf16.mxu1 %vm6984_vm6, %v10404_v52 }
 0x81e   : > { %5810 = vmatmul.mubr.bf16.gmra.mrb[68].mxu1 %v10448_v53 }
 0x81f   : > { %5813 = vmatprep.mubr.msk.bf16.mxu1 %vm6984_vm6, %v10404_v52 }
 0x826   : > { %5814 = vmatmul.mubr.bf16.gmra.mrb[72].mxu1 %v10451_v19 }
 0x827   : > { %5817 = vmatprep.mubr.msk.bf16.mxu1 %vm6984_vm6, %v10404_v52 }
 0x82e   : > { %5818 = vmatmul.mubr.bf16.gmra.mrb[76].mxu1 %v3520_v24 }
 0x82f   : > { %5821 = vmatprep.mubr.msk.bf16.mxu1 %vm6984_vm6, %v10404_v52  ;;  %v10033_v52 = vld [vmem:[%s10223_s7] ss:$0 sm:$0xff] }
 0x836   : > { %5822 = vmatmul.mubr.bf16.gmra.mrb[80].mxu1 %v3525_v36 }
 0x869   : > { %v4940_v34 = vpop.f32.mrb[0].mxu1 }
 0x86a   : > { %v5114_v49 = vmul.f32 %v10028_v21, %v4940_v34  ;;  %v5743_v31 = vpop.f32.mrb[1].mxu1 }
 0x86b   : > { %v4943_v56 = vpop.f32.mrb[2].mxu1 }
 0x86c   : > { %v5163_v6 = vadd.f32 %v10033_v52, %v5114_v49  ;;  %v5115_v8 = vmul.f32 %v10028_v21, %v4943_v56  ;;  %v5744_v61 = vpop.f32.mrb[3].mxu1 }
 0x86e   : > { %v5205_v11 = vmax.f32 %v5163_v6, 0.0  ;;  %v5164_v4 = vadd.f32 %v10033_v52, %v5115_v8 }
 0x870   : > { %5247 = vst [vmem:[%s10041_s21] sm:$0xff] %v5205_v11  ;;  %v5206_v40 = vmax.f32 %v5164_v4, 0.0 }
 0x871   : > { %v4948_v20 = vpop.f32.mrb[4].mxu1 }
 0x872   : > { %5248 = vst [vmem:[%s10041_s21 + $0x8] sm:$0xff] %v5206_v40  ;;  %v5116_v7 = vmul.f32 %v10028_v21, %v4948_v20  ;;  %v5747_v44 = vpop.f32.mrb[5].mxu1 }
 0x873   : > { %v4951_v2 = vpop.f32.mrb[6].mxu1 }
 0x874   : > { %v5165_v60 = vadd.f32 %v10033_v52, %v5116_v7  ;;  %v5117_v38 = vmul.f32 %v10028_v21, %v4951_v2  ;;  %v5748_v27 = vpop.f32.mrb[7].mxu1 }
 0x876   : > { %v5207_v62 = vmax.f32 %v5165_v60, 0.0  ;;  %v5166_v22 = vadd.f32 %v10033_v52, %v5117_v38 }
 0x878   : > { %5249 = vst [vmem:[%s10041_s21 + $0x10] sm:$0xff] %v5207_v62  ;;  %v5208_v15 = vmax.f32 %v5166_v22, 0.0 }
 0x879   : > { %v4956_v26 = vpop.f32.mrb[8].mxu1 }
 0x87a   : > { %5250 = vst [vmem:[%s10041_s21 + $0x18] sm:$0xff] %v5208_v15  ;;  %v5118_v58 = vmul.f32 %v10028_v21, %v4956_v26  ;;  %v5751_v55 = vpop.f32.mrb[9].mxu1 }
 0x87b   : > { %v4959_v47 = vpop.f32.mrb[10].mxu1 }
 0x87c   : > { %v5167_v0 = vadd.f32 %v10033_v52, %v5118_v58  ;;  %v5119_v59 = vmul.f32 %v10028_v21, %v4959_v47  ;;  %v5752_v23 = vpop.f32.mrb[11].mxu1 }
 0x87e   : > { %v5209_v18 = vmax.f32 %v5167_v0, 0.0  ;;  %v5168_v14 = vadd.f32 %v10033_v52, %v5119_v59 }
 0x880   : > { %5251 = vst [vmem:[%s10041_s21 + $0x20] sm:$0xff] %v5209_v18  ;;  %v5210_v30 = vmax.f32 %v5168_v14, 0.0 }
 0x881   : > { %v4964_v46 = vpop.f32.mrb[12].mxu1 }
 0x882   : > { %5252 = vst [vmem:[%s10041_s21 + $0x28] sm:$0xff] %v5210_v30  ;;  %v5120_v10 = vmul.f32 %v10028_v21, %v4964_v46  ;;  %v5755_v42 = vpop.f32.mrb[13].mxu1 }
 0x883   : > { %v4967_v39 = vpop.f32.mrb[14].mxu1 }
 0x884   : > { %v5169_v29 = vadd.f32 %v10033_v52, %v5120_v10  ;;  %v5121_v28 = vmul.f32 %v10028_v21, %v4967_v39  ;;  %v5756_v16 = vpop.f32.mrb[15].mxu1 }
 0x886   : > { %v5211_v3 = vmax.f32 %v5169_v29, 0.0  ;;  %v5170_v54 = vadd.f32 %v10033_v52, %v5121_v28 }
 0x888   : > { %5253 = vst [vmem:[%s10041_s21 + $0x30] sm:$0xff] %v5211_v3  ;;  %v5212_v57 = vmax.f32 %v5170_v54, 0.0 }
 0x889   : > { %v4972_v41 = vpop.f32.mrb[16].mxu1 }
 0x88a   : > { %5254 = vst [vmem:[%s10041_s21 + $0x38] sm:$0xff] %v5212_v57  ;;  %v5122_v5 = vmul.f32 %v10028_v21, %v4972_v41  ;;  %v5759_v63 = vpop.f32.mrb[17].mxu1 }
 0x88b   : > { %v4975_v35 = vpop.f32.mrb[18].mxu1 }
 0x88c   : > { %v5171_v37 = vadd.f32 %v10033_v52, %v5122_v5  ;;  %v5123_v32 = vmul.f32 %v10028_v21, %v4975_v35  ;;  %v5760_v45 = vpop.f32.mrb[19].mxu1 }
 0x88e   : > { %v5213_v1 = vmax.f32 %v5171_v37, 0.0  ;;  %v5172_v53 = vadd.f32 %v10033_v52, %v5123_v32 }
 0x890   : > { %5255 = vst [vmem:[%s10041_s21 + $0x40] sm:$0xff] %v5213_v1  ;;  %v5214_v13 = vmax.f32 %v5172_v53, 0.0 }
 0x891   : > { %v4980_v33 = vpop.f32.mrb[20].mxu1 }
 0x892   : > { %5256 = vst [vmem:[%s10041_s21 + $0x48] sm:$0xff] %v5214_v13  ;;  %v5124_v17 = vmul.f32 %v10028_v21, %v4980_v33  ;;  %v5763_v19 = vpop.f32.mrb[21].mxu1 }
 0x893   : > { %v4983_v50 = vpop.f32.mrb[22].mxu1 }
 0x894   : > { %v5173_v9 = vadd.f32 %v10033_v52, %v5124_v17  ;;  %v5125_v12 = vmul.f32 %v10028_v21, %v4983_v50  ;;  %v5764_v25 = vpop.f32.mrb[23].mxu1 }
 0x896   : > { %v5215_v24 = vmax.f32 %v5173_v9, 0.0  ;;  %v5174_v51 = vadd.f32 %v10033_v52, %v5125_v12 }
 0x898   : > { %5257 = vst [vmem:[%s10041_s21 + $0x50] sm:$0xff] %v5215_v24  ;;  %v5216_v48 = vmax.f32 %v5174_v51, 0.0 }
 0x899   : > { %v4988_v43 = vpop.f32.mrb[24].mxu1 }
 0x89a   : > { %5258 = vst [vmem:[%s10041_s21 + $0x58] sm:$0xff] %v5216_v48  ;;  %v5126_v36 = vmul.f32 %v10028_v21, %v4988_v43  ;;  %v5767_v34 = vpop.f32.mrb[25].mxu1 }
 0x89b   : > { %v4991_v49 = vpop.f32.mrb[26].mxu1 }
 0x89c   : > { %v5175_v31 = vadd.f32 %v10033_v52, %v5126_v36  ;;  %v5127_v56 = vmul.f32 %v10028_v21, %v4991_v49  ;;  %v5768_v6 = vpop.f32.mrb[27].mxu1 }
 0x89e   : > { %v5217_v8 = vmax.f32 %v5175_v31, 0.0  ;;  %v5176_v61 = vadd.f32 %v10033_v52, %v5127_v56 }
 0x8a0   : > { %5259 = vst [vmem:[%s10041_s21 + $0x60] sm:$0xff] %v5217_v8  ;;  %v5218_v11 = vmax.f32 %v5176_v61, 0.0 }
 0x8a1   : > { %v4996_v4 = vpop.f32.mrb[28].mxu1 }
 0x8a2   : > { %5260 = vst [vmem:[%s10041_s21 + $0x68] sm:$0xff] %v5218_v11  ;;  %v5128_v40 = vmul.f32 %v10028_v21, %v4996_v4  ;;  %v5771_v20 = vpop.f32.mrb[29].mxu1 }
 0x8a3   : > { %v4999_v7 = vpop.f32.mrb[30].mxu1 }
 0x8a4   : > { %v5177_v44 = vadd.f32 %v10033_v52, %v5128_v40  ;;  %v5129_v2 = vmul.f32 %v10028_v21, %v4999_v7  ;;  %v5772_v60 = vpop.f32.mrb[31].mxu1 }
 0x8a6   : > { %v5219_v38 = vmax.f32 %v5177_v44, 0.0  ;;  %v5178_v27 = vadd.f32 %v10033_v52, %v5129_v2 }
 0x8a8   : > { %5261 = vst [vmem:[%s10041_s21 + $0x70] sm:$0xff] %v5219_v38  ;;  %v5220_v62 = vmax.f32 %v5178_v27, 0.0 }
 0x8a9   : > { %v5004_v22 = vpop.f32.mrb[32].mxu1 }
 0x8aa   : > { %5262 = vst [vmem:[%s10041_s21 + $0x78] sm:$0xff] %v5220_v62  ;;  %v5130_v15 = vmul.f32 %v10028_v21, %v5004_v22  ;;  %v5775_v26 = vpop.f32.mrb[33].mxu1 }
 0x8ab   : > { %v5007_v58 = vpop.f32.mrb[34].mxu1 }
 0x8ac   : > { %v5179_v55 = vadd.f32 %v10033_v52, %v5130_v15  ;;  %v5131_v47 = vmul.f32 %v10028_v21, %v5007_v58  ;;  %v5776_v0 = vpop.f32.mrb[35].mxu1 }
 0x8ae   : > { %v5221_v59 = vmax.f32 %v5179_v55, 0.0  ;;  %v5180_v23 = vadd.f32 %v10033_v52, %v5131_v47 }
 0x8b0   : > { %5263 = vst [vmem:[%s10041_s21 + $0x80] sm:$0xff] %v5221_v59  ;;  %v5222_v18 = vmax.f32 %v5180_v23, 0.0 }
 0x8b1   : > { %v5012_v14 = vpop.f32.mrb[36].mxu1 }
 0x8b2   : > { %5264 = vst [vmem:[%s10041_s21 + $0x88] sm:$0xff] %v5222_v18  ;;  %v5132_v30 = vmul.f32 %v10028_v21, %v5012_v14  ;;  %v5779_v46 = vpop.f32.mrb[37].mxu1 }
 0x8b3   : > { %v5015_v10 = vpop.f32.mrb[38].mxu1 }
 0x8b4   : > { %v5181_v42 = vadd.f32 %v10033_v52, %v5132_v30  ;;  %v5133_v39 = vmul.f32 %v10028_v21, %v5015_v10  ;;  %v5780_v29 = vpop.f32.mrb[39].mxu1 }
 0x8b6   : > { %v5223_v28 = vmax.f32 %v5181_v42, 0.0  ;;  %v5182_v16 = vadd.f32 %v10033_v52, %v5133_v39 }
 0x8b8   : > { %5265 = vst [vmem:[%s10041_s21 + $0x90] sm:$0xff] %v5223_v28  ;;  %v5224_v3 = vmax.f32 %v5182_v16, 0.0 }
 0x8b9   : > { %v5020_v54 = vpop.f32.mrb[40].mxu1 }
 0x8ba   : > { %5266 = vst [vmem:[%s10041_s21 + $0x98] sm:$0xff] %v5224_v3  ;;  %v5134_v57 = vmul.f32 %v10028_v21, %v5020_v54  ;;  %v5783_v41 = vpop.f32.mrb[41].mxu1 }
 0x8bb   : > { %v5023_v5 = vpop.f32.mrb[42].mxu1 }
 0x8bc   : > { %v5183_v63 = vadd.f32 %v10033_v52, %v5134_v57  ;;  %v5135_v35 = vmul.f32 %v10028_v21, %v5023_v5  ;;  %v5784_v37 = vpop.f32.mrb[43].mxu1 }
 0x8be   : > { %v5225_v32 = vmax.f32 %v5183_v63, 0.0  ;;  %v5184_v45 = vadd.f32 %v10033_v52, %v5135_v35 }
 0x8c0   : > { %5267 = vst [vmem:[%s10041_s21 + $0xa0] sm:$0xff] %v5225_v32  ;;  %v5226_v1 = vmax.f32 %v5184_v45, 0.0 }
 0x8c1   : > { %v5028_v53 = vpop.f32.mrb[44].mxu1 }
 0x8c2   : > { %5268 = vst [vmem:[%s10041_s21 + $0xa8] sm:$0xff] %v5226_v1  ;;  %v5136_v13 = vmul.f32 %v10028_v21, %v5028_v53  ;;  %v5787_v33 = vpop.f32.mrb[45].mxu1 }
 0x8c3   : > { %v5031_v17 = vpop.f32.mrb[46].mxu1 }
 0x8c4   : > { %v5185_v19 = vadd.f32 %v10033_v52, %v5136_v13  ;;  %v5137_v50 = vmul.f32 %v10028_v21, %v5031_v17  ;;  %v5788_v9 = vpop.f32.mrb[47].mxu1 }
 0x8c6   : > { %v5227_v12 = vmax.f32 %v5185_v19, 0.0  ;;  %v5186_v25 = vadd.f32 %v10033_v52, %v5137_v50 }
 0x8c8   : > { %5269 = vst [vmem:[%s10041_s21 + $0xb0] sm:$0xff] %v5227_v12  ;;  %v5228_v24 = vmax.f32 %v5186_v25, 0.0 }
 0x8c9   : > { %v5036_v51 = vpop.f32.mrb[48].mxu1 }
 0x8ca   : > { %5270 = vst [vmem:[%s10041_s21 + $0xb8] sm:$0xff] %v5228_v24  ;;  %v5138_v48 = vmul.f32 %v10028_v21, %v5036_v51  ;;  %v5791_v43 = vpop.f32.mrb[49].mxu1 }
 0x8cb   : > { %v5039_v36 = vpop.f32.mrb[50].mxu1 }
 0x8cc   : > { %v5187_v34 = vadd.f32 %v10033_v52, %v5138_v48  ;;  %v5139_v49 = vmul.f32 %v10028_v21, %v5039_v36  ;;  %v5792_v31 = vpop.f32.mrb[51].mxu1 }
 0x8ce   : > { %v5229_v56 = vmax.f32 %v5187_v34, 0.0  ;;  %v5188_v6 = vadd.f32 %v10033_v52, %v5139_v49 }
 0x8d0   : > { %5271 = vst [vmem:[%s10041_s21 + $0xc0] sm:$0xff] %v5229_v56  ;;  %v5230_v8 = vmax.f32 %v5188_v6, 0.0 }
 0x8d1   : > { %v5044_v61 = vpop.f32.mrb[52].mxu1 }
 0x8d2   : > { %5272 = vst [vmem:[%s10041_s21 + $0xc8] sm:$0xff] %v5230_v8  ;;  %v5140_v11 = vmul.f32 %v10028_v21, %v5044_v61  ;;  %v5795_v4 = vpop.f32.mrb[53].mxu1 }
 0x8d3   : > { %v5047_v40 = vpop.f32.mrb[54].mxu1 }
 0x8d4   : > { %v5189_v20 = vadd.f32 %v10033_v52, %v5140_v11  ;;  %v5141_v7 = vmul.f32 %v10028_v21, %v5047_v40  ;;  %v5796_v44 = vpop.f32.mrb[55].mxu1 }
 0x8d6   : > { %v5231_v2 = vmax.f32 %v5189_v20, 0.0  ;;  %v5190_v60 = vadd.f32 %v10033_v52, %v5141_v7 }
 0x8d8   : > { %5273 = vst [vmem:[%s10041_s21 + $0xd0] sm:$0xff] %v5231_v2  ;;  %v5232_v38 = vmax.f32 %v5190_v60, 0.0 }
 0x8d9   : > { %v5052_v27 = vpop.f32.mrb[56].mxu1 }
 0x8da   : > { %5274 = vst [vmem:[%s10041_s21 + $0xd8] sm:$0xff] %v5232_v38  ;;  %v5142_v62 = vmul.f32 %v10028_v21, %v5052_v27  ;;  %v5799_v22 = vpop.f32.mrb[57].mxu1 }
 0x8db   : > { %v5055_v15 = vpop.f32.mrb[58].mxu1 }
 0x8dc   : > { %v5191_v26 = vadd.f32 %v10033_v52, %v5142_v62  ;;  %v5143_v58 = vmul.f32 %v10028_v21, %v5055_v15  ;;  %v5800_v55 = vpop.f32.mrb[59].mxu1 }
 0x8de   : > { %v5233_v47 = vmax.f32 %v5191_v26, 0.0  ;;  %v5192_v0 = vadd.f32 %v10033_v52, %v5143_v58 }
 0x8e0   : > { %5275 = vst [vmem:[%s10041_s21 + $0xe0] sm:$0xff] %v5233_v47  ;;  %v5234_v59 = vmax.f32 %v5192_v0, 0.0 }
 0x8e1   : > { %v5060_v23 = vpop.f32.mrb[60].mxu1 }
 0x8e2   : > { %5276 = vst [vmem:[%s10041_s21 + $0xe8] sm:$0xff] %v5234_v59  ;;  %v5144_v18 = vmul.f32 %v10028_v21, %v5060_v23  ;;  %v5803_v14 = vpop.f32.mrb[61].mxu1 }
 0x8e3   : > { %v5063_v30 = vpop.f32.mrb[62].mxu1 }
 0x8e4   : > { %v5193_v46 = vadd.f32 %v10033_v52, %v5144_v18  ;;  %v5145_v10 = vmul.f32 %v10028_v21, %v5063_v30  ;;  %v5804_v42 = vpop.f32.mrb[63].mxu1 }
 0x8e6   : > { %v5235_v39 = vmax.f32 %v5193_v46, 0.0  ;;  %v5194_v29 = vadd.f32 %v10033_v52, %v5145_v10 }
 0x8e8   : > { %5277 = vst [vmem:[%s10041_s21 + $0xf0] sm:$0xff] %v5235_v39  ;;  %v5236_v28 = vmax.f32 %v5194_v29, 0.0 }
 0x8e9   : > { %v5068_v16 = vpop.f32.mrb[64].mxu1 }
 0x8ea   : > { %5278 = vst [vmem:[%s10041_s21 + $0xf8] sm:$0xff] %v5236_v28  ;;  %v5146_v3 = vmul.f32 %v10028_v21, %v5068_v16  ;;  %v5807_v54 = vpop.f32.mrb[65].mxu1 }
 0x8eb   : > { %v5071_v57 = vpop.f32.mrb[66].mxu1 }
 0x8ec   : > { %v5195_v41 = vadd.f32 %v10033_v52, %v5146_v3  ;;  %v5147_v5 = vmul.f32 %v10028_v21, %v5071_v57  ;;  %v5808_v63 = vpop.f32.mrb[67].mxu1 }
 0x8ee   : > { %v5237_v35 = vmax.f32 %v5195_v41, 0.0  ;;  %v5196_v37 = vadd.f32 %v10033_v52, %v5147_v5 }
 0x8f0   : > { %5279 = vst [vmem:[%s10041_s21 + $0x100] sm:$0xff] %v5237_v35  ;;  %v5238_v32 = vmax.f32 %v5196_v37, 0.0 }
 0x8f1   : > { %v5076_v45 = vpop.f32.mrb[68].mxu1 }
 0x8f2   : > { %5280 = vst [vmem:[%s10041_s21 + $0x108] sm:$0xff] %v5238_v32  ;;  %v5148_v1 = vmul.f32 %v10028_v21, %v5076_v45  ;;  %v5811_v53 = vpop.f32.mrb[69].mxu1 }
 0x8f3   : > { %v5079_v13 = vpop.f32.mrb[70].mxu1 }
 0x8f4   : > { %v5197_v33 = vadd.f32 %v10033_v52, %v5148_v1  ;;  %v5149_v17 = vmul.f32 %v10028_v21, %v5079_v13  ;;  %v5812_v19 = vpop.f32.mrb[71].mxu1 }
 0x8f6   : > { %v5239_v50 = vmax.f32 %v5197_v33, 0.0  ;;  %v5198_v9 = vadd.f32 %v10033_v52, %v5149_v17 }
 0x8f8   : > { %5281 = vst [vmem:[%s10041_s21 + $0x110] sm:$0xff] %v5239_v50  ;;  %v5240_v12 = vmax.f32 %v5198_v9, 0.0 }
 0x8f9   : > { %v5084_v25 = vpop.f32.mrb[72].mxu1 }
 0x8fa   : > { %5282 = vst [vmem:[%s10041_s21 + $0x118] sm:$0xff] %v5240_v12  ;;  %v5150_v24 = vmul.f32 %v10028_v21, %v5084_v25  ;;  %v5815_v51 = vpop.f32.mrb[73].mxu1 }
 0x8fb   : > { %v5087_v48 = vpop.f32.mrb[74].mxu1 }
 0x8fc   : > { %v5199_v43 = vadd.f32 %v10033_v52, %v5150_v24  ;;  %v5151_v36 = vmul.f32 %v10028_v21, %v5087_v48  ;;  %v5816_v34 = vpop.f32.mrb[75].mxu1 }
 0x8fe   : > { %v5241_v49 = vmax.f32 %v5199_v43, 0.0  ;;  %v5200_v31 = vadd.f32 %v10033_v52, %v5151_v36 }
 0x900   : > { %5283 = vst [vmem:[%s10041_s21 + $0x120] sm:$0xff] %v5241_v49  ;;  %v5242_v56 = vmax.f32 %v5200_v31, 0.0 }
 0x901   : > { %v5092_v6 = vpop.f32.mrb[76].mxu1 }
 0x902   : > { %5284 = vst [vmem:[%s10041_s21 + $0x128] sm:$0xff] %v5242_v56  ;;  %v5152_v8 = vmul.f32 %v10028_v21, %v5092_v6  ;;  %v5819_v61 = vpop.f32.mrb[77].mxu1 }
 0x903   : > { %v5095_v11 = vpop.f32.mrb[78].mxu1 }
 0x904   : > { %v5201_v4 = vadd.f32 %v10033_v52, %v5152_v8  ;;  %v5153_v40 = vmul.f32 %v10028_v21, %v5095_v11  ;;  %v5820_v20 = vpop.f32.mrb[79].mxu1 }
 0x906   : > { %v5243_v7 = vmax.f32 %v5201_v4, 0.0  ;;  %v5202_v44 = vadd.f32 %v10033_v52, %v5153_v40 }
 0x908   : > { %5285 = vst [vmem:[%s10041_s21 + $0x130] sm:$0xff] %v5243_v7  ;;  %v5244_v2 = vmax.f32 %v5202_v44, 0.0 }
 0x909   : > { %v5100_v60 = vpop.f32.mrb[80].mxu1 }
 0x90a   : > { %5286 = vst [vmem:[%s10041_s21 + $0x138] sm:$0xff] %v5244_v2  ;;  %v5154_v38 = vmul.f32 %v10028_v21, %v5100_v60  ;;  %v5823_v27 = vpop.f32.mrb[81].mxu1 }
 0x90b   : > { %v5103_v62 = vpop.f32.mrb[82].mxu1 }
 0x90c   : > { %v5203_v22 = vadd.f32 %v10033_v52, %v5154_v38  ;;  %v5155_v15 = vmul.f32 %v10028_v21, %v5103_v62  ;;  %v5824_v26 = vpop.f32.mrb[83].mxu1 }
 0x90e   : > { %v5245_v58 = vmax.f32 %v5203_v22, 0.0  ;;  %v5204_v55 = vadd.f32 %v10033_v52, %v5155_v15 }
 0x910   : > { %5287 = vst [vmem:[%s10041_s21 + $0x140] sm:$0xff] %v5245_v58  ;;  %v5246_v47 = vmax.f32 %v5204_v55, 0.0 }
 0x912   : > { %5288 = vst [vmem:[%s10041_s21 + $0x148] sm:$0xff] %v5246_v47 }
 0x913   : > { %6911 = shalt.err (!%p6908_p4)
}
 0x914   : > { %s6912_s22 = scalar_lea.hbm %s10168_s23, 5376  ;;  %s6916_s14 = scalar_lea.hbm %s10224_s8, 10752 }
 0x915   : > { %p6913_p9 = scmp.ne.s32.totalorder %s10168_s23, %s6912_s22  ;;  %p6917_p8 = scmp.lt.u32.totalorder %s10168_s23, %s10224_s8 }
 0x916   : > { %p6918_p13 = scmp.lt.u32.totalorder %s6916_s14, %s6912_s22  ;;  %p6920_p10 = scmp.lt.u32.totalorder %s6912_s22, %s10168_s23 }
 0x917   : > { %p6914_p0 = pnand %p6913_p9, %p7178_p5 }
 0x918   : > { %p6919_p6 = por %p6918_p13, %p6917_p8 }
 0x919   : > { %p6915_p7 = pneg %p6914_p0 }
 0x91a   : > { %p6921_p3 = por %p6920_p10, %p6919_p6 }
 0x91c   : > { %p6922_p11 = pnand %p6921_p3, %p6915_p7 }
 0x91e   : > { %6925 = shalt.err (!%p6922_p11)
}
 0x91f   : > { %s6986_s27 = smov 128   ;;  %s6987_s11 = smov 8  }
 0x920   : > { %6515 = dma.vmem_to_hbm [thread:$0]  (%p7178_p5), %s10171_s26, 5376, %s10168_s23, %s5290_s9, %s6986_s27, %s6986_s27, %s6987_s11  }
 0x921 PF: > { %s10453_s13 = sld [smem:[#allocation15_spill]]  ;;  %s10454_s15 = sld [smem:[#allocation16_spill]] }
 0x922   : > { %p10456_p1 = scmp.ge.s32.totalorder %s6972_s30, 2 }
 0x927   : > { %s5318_s18 = sand.u32 1, %s10453_s13   ;;  %p10455_p12 = scmp.ne.s32.totalorder %s10454_s15, 0 }
 0x928   : > { %s5319_s19 = scalar_lea.sflag [#allocation4], %s5318_s18 }
 0x929   : > { %p6532_p2 = pnand %p10456_p1, %p10455_p12 }
 0x92b   : > { %6955 = dma.done.wait (!%p6532_p2), %s5319_s19, 5376  }
 0x92c   : > { %6957 = vsyncadd (!%p6532_p2), %s5319_s19, 4294961920  ;;  %p23_p4 = scmp.ge.s32.totalorder %s7146_s25, 4   ;;  %s10457_s27 = smov %s6964_s28 }
 0x92d   : > { %s10458_s28 = smov %s6968_s29  ;;  %s10459_s29 = smov %s7174_s16 }
 0x92e   : > { %s10460_s30 = smov %s7146_s25  ;;  %25 = sbr.rel (!%p23_p4) target bundleno = 9 (0x9), region = 109 }
 0x935   :  { %5324 = vsyncpa [#allocation3], 1 }
 0x936   :  { %5326 = vsyncpa [#allocation3 + $0x1], 1 }
 0x937   :  { %5327 = vsyncpa [#allocation6], 1 }
 0x938   :  { %5328 = vsyncpa [#allocation9], 1 }
 0x939   :  { %5329 = vsyncpa [#allocation4], 1 }
 0x93a   :  { %5331 = vsyncpa [#allocation4 + $0x1], 1 }

</bundles_post_ra>
